<compile_context>
chip_gen: v7x
topology: tpu7x:2x2x1
jax: 0.10.0
libtpu: 0.0.40
codegen_flags: <defaults>
</compile_context>

<pallas_src>
import functools

import jax
import jax.numpy as jnp
from jax.experimental import pallas as pl
from jax.experimental.pallas import tpu as pltpu


# ----------------------------------------------------------------------------
# Pallas kernel
# ----------------------------------------------------------------------------

def _sa_kernel(x_ref, w_ref, o_ref, pad_ref, flat_ref, *, H, W, G):
    """Fused spatial attention on a lane-dense (NB, C, H*W) block.

    x_ref    : VMEM (NB, C, H*W)   input block (NB whole images, flattened HW)
    w_ref    : SMEM (98,)          flattened conv weight, idx = c*49 + dy*7 + dx
    o_ref    : VMEM (NB, C, H*W)   gated output
    pad_ref  : VMEM (2, H+6, W+6)  zero-bordered [mean, max] planes (scratch)
    flat_ref : VMEM (2, H*W)       flat staging for the planes / attention map
    """
    NB, C, HW = x_ref.shape
    nG = C // G
    inv_c = 1.0 / C

    def _load_chunk(b, i):
        off = i * G
        if not isinstance(off, int):
            off = pl.multiple_of(off, G)
        return x_ref[b, pl.ds(off, G), :].astype(jnp.float32)        # (G, HW)

    for b in range(NB):
        # ---- 1) channel mean / max, chunked over C (no full f32 shadow) ----
        def _red(i, carry):
            s, m = carry
            xc = _load_chunk(b, i)
            return (s + jnp.sum(xc, axis=0, keepdims=True),
                    jnp.maximum(m, jnp.max(xc, axis=0, keepdims=True)))

        s = jnp.zeros((1, HW), jnp.float32)
        m = jnp.full((1, HW), -jnp.inf, jnp.float32)
        if nG <= 8:
            for i in range(nG):
                s, m = _red(i, (s, m))
        else:
            s, m = jax.lax.fori_loop(0, nG, _red, (s, m))

        flat_ref[0:1, :] = s * inv_c          # mean plane, flat
        flat_ref[1:2, :] = m                  # max  plane, flat

        # ---- 2) zero only the 3-wide border of the padded planes; done every
        #         step so the kernel stays correct when the "parallel" batch
        #         axis is sharded across TensorCores (each core owns its own
        #         scratch and may never see program_id == 0). ----
        zr = jnp.zeros((3, W + 6), jnp.float32)
        zc = jnp.zeros((H, 3), jnp.float32)
        for c in range(2):
            pad_ref[c, 0:3, :] = zr
            pad_ref[c, 3 + H:6 + H, :] = zr
            pad_ref[c, 3:3 + H, 0:3] = zc
            pad_ref[c, 3:3 + H, 3 + W:6 + W] = zc
            # interior rows, copied from the flat staging buffer
            for y in range(H):
                pad_ref[c, 3 + y, 3:3 + W] = flat_ref[c, y * W:(y + 1) * W]

        # ---- 3) 7x7 conv (2 -> 1, pad 3, no bias) as 98 scalar-weighted
        #         window FMAs; strips hoisted per (c, dy); 4 accumulators ----
        accs = [jnp.zeros((H, W), jnp.float32) for _ in range(4)]
        k = 0
        for c in range(2):
            for dy in range(7):
                strip = pad_ref[c, dy:dy + H, :]                      # (H, W+6)
                for dx in range(7):
                    wgt = w_ref[c * 49 + dy * 7 + dx]
                    accs[k & 3] = accs[k & 3] + strip[:, dx:dx + W] * wgt
                    k += 1
        att2d = jax.nn.sigmoid((accs[0] + accs[1]) + (accs[2] + accs[3]))

        # ---- 4) flatten the attention map back to (1, HW) via the scratch ----
        pad_ref[0, 3:3 + H, 3:3 + W] = att2d
        for y in range(H):
            flat_ref[0, y * W:(y + 1) * W] = pad_ref[0, 3 + y, 3:3 + W]
        att_row = flat_ref[0:1, :]                                    # (1, HW)

        # ---- 5) gate x with lane-dense chunked loads / stores ----
        def _gate(i, carry):
            off = i * G
            if not isinstance(off, int):
                off = pl.multiple_of(off, G)
            xc = x_ref[b, pl.ds(off, G), :].astype(jnp.float32)
            o_ref[b, pl.ds(off, G), :] = (xc * att_row).astype(o_ref.dtype)
            return carry

        if nG <= 8:
            for i in range(nG):
                _gate(i, 0)
        else:
            jax.lax.fori_loop(0, nG, _gate, 0)


# ----------------------------------------------------------------------------
# Wrapper
# ----------------------------------------------------------------------------

def spatial_attention(x_nchw, w_conv):
    """x_nchw: (N, C, H, W); w_conv: (1, 2, 7, 7) torch-layout weight (no bias)."""
    N, C, H, W = x_nchw.shape
    HW = H * W
    itemsize = jnp.dtype(x_nchw.dtype).itemsize

    # Lane-dense view of the bulk data; free metadata reshape for NCHW.
    x_flat = x_nchw.reshape(N, C, HW)
    # Flatten weight so index = c*49 + dy*7 + dx (c: 0 = mean plane, 1 = max).
    w_flat = w_conv[0].reshape(-1).astype(jnp.float32)                # (98,)

    # Channel chunk so reductions / gating never materialize a full f32 copy.
    G = 1
    for g in (8, 4, 2):
        if C % g == 0:
            G = g
            break

    # Images per block: target ~2 MiB blocks, keep >= 2 grid steps when N >= 2
    # (so both v7x TensorCores get work), and require NB | N.
    per_img = C * HW * itemsize
    nb = max(1, min(4, (2 * 1024 * 1024) // per_img))
    nb = min(nb, N)
    if N >= 2:
        nb = min(nb, max(1, N // 2))
    while N % nb:
        nb -= 1

    kernel = functools.partial(_sa_kernel, H=H, W=W, G=G)

    cost = pl.CostEstimate(
        flops=int(N * (4 * C * HW + 2 * 98 * HW)),
        transcendentals=int(N * HW),
        bytes_accessed=int(2 * N * C * HW * itemsize + 98 * 4),
    )

    out_flat = pl.pallas_call(
        kernel,
        out_shape=jax.ShapeDtypeStruct((N, C, HW), x_nchw.dtype),
        grid=(N // nb,),
        in_specs=[
            pl.BlockSpec((nb, C, HW), lambda n: (n, 0, 0)),
            pl.BlockSpec(memory_space=pltpu.MemorySpace.SMEM),
        ],
        out_specs=pl.BlockSpec((nb, C, HW), lambda n: (n, 0, 0)),
        scratch_shapes=[
            pltpu.VMEM((2, H + 6, W + 6), jnp.float32),
            pltpu.VMEM((2, HW), jnp.float32),
        ],
        compiler_params=pltpu.CompilerParams(
            dimension_semantics=("parallel",),
            vmem_limit_bytes=32 * 1024 * 1024,
        ),
        cost_estimate=cost,
    )(x_flat, w_flat)

    return out_flat.reshape(N, C, H, W)


@jax.jit
def sa_forward(x_nchw, w_conv):
    return spatial_attention(x_nchw, w_conv)


# ----------------------------------------------------------------------------
# Pure-JAX reference (for correctness check)
# ----------------------------------------------------------------------------

def _sa_reference(x, w):
    avg = jnp.mean(x, axis=1, keepdims=True)
    mx = jnp.max(x, axis=1, keepdims=True)
    cat = jnp.concatenate([avg, mx], axis=1)
    net = jax.lax.conv_general_dilated(
        cat, w, window_strides=(1, 1), padding=((3, 3), (3, 3)),
        dimension_numbers=("NCHW", "OIHW", "NCHW"),
        precision=jax.lax.Precision.HIGHEST)
    return jax.nn.sigmoid(net) * x


# ----------------------------------------------------------------------------
# Main
# ----------------------------------------------------------------------------

if __name__ == "__main__":
    key = jax.random.PRNGKey(0)
    kx, kw = jax.random.split(key)

    N, C, H, W = 2, 4, 16, 16
    x = jax.random.normal(kx, (N, C, H, W), jnp.float32)

    # PyTorch Conv2d default init bound ~ 1/sqrt(fan_in), fan_in = 2*7*7.
    bound = float((2 * 7 * 7) ** -0.5)
    w = jax.random.uniform(kw, (1, 2, 7, 7), jnp.float32, -bound, bound)

    out = jax.block_until_ready(sa_forward(x, w))

    assert out.shape == (N, C, H, W), out.shape
    assert bool(jnp.all(jnp.isfinite(out)))

    ref = _sa_reference(x, w)
    max_err = float(jnp.max(jnp.abs(out - ref)))
    assert max_err < 1e-3, f"mismatch vs reference: {max_err}"

    print("KERNEL_OK")
</pallas_src>

<mosaic_0001>
module attributes {stable_mosaic.version = 11 : i64} {
  func.func @_sa_kernel(%arg0: i32, %arg1: memref<1x4x256xf32, #tpu.memory_space<vmem>>, %arg2: memref<98xf32, #tpu.memory_space<smem>>, %arg3: memref<1x4x256xf32, #tpu.memory_space<vmem>>, %arg4: memref<2x22x22xf32, #tpu.memory_space<vmem>>, %arg5: memref<2x256xf32, #tpu.memory_space<vmem>>) attributes {dimension_semantics = [#tpu.dimension_semantics<parallel>], iteration_bounds = array<i64: 2>, scalar_prefetch = 0 : i64, scratch_operands = 2 : i64, tpu.core_type = #tpu.core_type<tc>, window_params = [{transform_indices = @transform_0, window_bounds = array<i64: 1, 4, 256>}, {transform_indices = @transform_1, window_bounds = array<i64: 98>}, {transform_indices = @transform_2, window_bounds = array<i64: 1, 4, 256>}]} {
    %cst = arith.constant 0.000000e+00 : f32
    %0 = vector.broadcast %cst : f32 to vector<1x256xf32>
    %cst_0 = arith.constant 0xFF800000 : f32
    %1 = vector.broadcast %cst_0 : f32 to vector<1x256xf32>
    %c0 = arith.constant 0 : index
    %c0_1 = arith.constant 0 : index
    %c0_2 = arith.constant 0 : index
    %2 = vector.load %arg1[%c0, %c0_1, %c0_2] : memref<1x4x256xf32, #tpu.memory_space<vmem>>, vector<1x4x256xf32>
    %3 = vector.shape_cast %2 : vector<1x4x256xf32> to vector<4x256xf32>
    %cst_3 = arith.constant dense<0.000000e+00> : vector<256xf32>
    %4 = vector.multi_reduction <add>, %3, %cst_3 [0] : vector<4x256xf32> to vector<256xf32>
    %5 = vector.shape_cast %4 : vector<256xf32> to vector<1x256xf32>
    %6 = arith.addf %0, %5 : vector<1x256xf32>
    %cst_4 = arith.constant dense<0xFF800000> : vector<256xf32>
    %7 = vector.multi_reduction <maximumf>, %3, %cst_4 [0] : vector<4x256xf32> to vector<256xf32>
    %8 = vector.shape_cast %7 : vector<256xf32> to vector<1x256xf32>
    %9 = arith.maximumf %1, %8 : vector<1x256xf32>
    %cst_5 = arith.constant 2.500000e-01 : f32
    %10 = vector.broadcast %cst_5 : f32 to vector<1x256xf32>
    %11 = arith.mulf %6, %10 : vector<1x256xf32>
    %c0_6 = arith.constant 0 : index
    %c0_7 = arith.constant 0 : index
    %12 = vector.load %arg5[%c0_6, %c0_7] : memref<2x256xf32, #tpu.memory_space<vmem>>, vector<1x256xf32>
    tpu.vector_store %arg5[%c0_6, %c0_7], %11 {strides = array<i32>} : memref<2x256xf32, #tpu.memory_space<vmem>>, vector<1x256xf32>,
    %c1 = arith.constant 1 : index
    %c0_8 = arith.constant 0 : index
    %13 = vector.load %arg5[%c1, %c0_8] : memref<2x256xf32, #tpu.memory_space<vmem>>, vector<1x256xf32>
    tpu.vector_store %arg5[%c1, %c0_8], %9 {strides = array<i32>} : memref<2x256xf32, #tpu.memory_space<vmem>>, vector<1x256xf32>,
    %cst_9 = arith.constant 0.000000e+00 : f32
    %14 = vector.broadcast %cst_9 : f32 to vector<3x22xf32>
    %cst_10 = arith.constant 0.000000e+00 : f32
    %15 = vector.broadcast %cst_10 : f32 to vector<16x3xf32>
    %c0_11 = arith.constant 0 : index
    %c0_12 = arith.constant 0 : index
    %c0_13 = arith.constant 0 : index
    %16 = vector.load %arg4[%c0_11, %c0_12, %c0_13] : memref<2x22x22xf32, #tpu.memory_space<vmem>>, vector<1x3x22xf32>
    %17 = vector.shape_cast %16 : vector<1x3x22xf32> to vector<3x22xf32>
    %18 = vector.shape_cast %14 : vector<3x22xf32> to vector<1x3x22xf32>
    tpu.vector_store %arg4[%c0_11, %c0_12, %c0_13], %18 {strides = array<i32>} : memref<2x22x22xf32, #tpu.memory_space<vmem>>, vector<1x3x22xf32>,
    %c0_14 = arith.constant 0 : index
    %c19 = arith.constant 19 : index
    %c0_15 = arith.constant 0 : index
    %19 = vector.load %arg4[%c0_14, %c19, %c0_15] : memref<2x22x22xf32, #tpu.memory_space<vmem>>, vector<1x3x22xf32>
    %20 = vector.shape_cast %19 : vector<1x3x22xf32> to vector<3x22xf32>
    %21 = vector.shape_cast %14 : vector<3x22xf32> to vector<1x3x22xf32>
    tpu.vector_store %arg4[%c0_14, %c19, %c0_15], %21 {strides = array<i32>} : memref<2x22x22xf32, #tpu.memory_space<vmem>>, vector<1x3x22xf32>,
    %c0_16 = arith.constant 0 : index
    %c3 = arith.constant 3 : index
    %c0_17 = arith.constant 0 : index
    %22 = vector.load %arg4[%c0_16, %c3, %c0_17] : memref<2x22x22xf32, #tpu.memory_space<vmem>>, vector<1x16x3xf32>
    %23 = vector.shape_cast %22 : vector<1x16x3xf32> to vector<16x3xf32>
    %24 = vector.shape_cast %15 : vector<16x3xf32> to vector<1x16x3xf32>
    tpu.vector_store %arg4[%c0_16, %c3, %c0_17], %24 {strides = array<i32>} : memref<2x22x22xf32, #tpu.memory_space<vmem>>, vector<1x16x3xf32>,
    %c0_18 = arith.constant 0 : index
    %c3_19 = arith.constant 3 : index
    %c19_20 = arith.constant 19 : index
    %25 = vector.load %arg4[%c0_18, %c3_19, %c19_20] : memref<2x22x22xf32, #tpu.memory_space<vmem>>, vector<1x16x3xf32>
    %26 = vector.shape_cast %25 : vector<1x16x3xf32> to vector<16x3xf32>
    %27 = vector.shape_cast %15 : vector<16x3xf32> to vector<1x16x3xf32>
    tpu.vector_store %arg4[%c0_18, %c3_19, %c19_20], %27 {strides = array<i32>} : memref<2x22x22xf32, #tpu.memory_space<vmem>>, vector<1x16x3xf32>,
    %c0_21 = arith.constant 0 : index
    %c0_22 = arith.constant 0 : index
    %28 = vector.load %arg5[%c0_21, %c0_22] : memref<2x256xf32, #tpu.memory_space<vmem>>, vector<1x16xf32>
    %29 = vector.shape_cast %28 : vector<1x16xf32> to vector<16xf32>
    %c0_23 = arith.constant 0 : index
    %c3_24 = arith.constant 3 : index
    %c3_25 = arith.constant 3 : index
    %30 = vector.load %arg4[%c0_23, %c3_24, %c3_25] : memref<2x22x22xf32, #tpu.memory_space<vmem>>, vector<1x1x16xf32>
    %31 = vector.shape_cast %30 : vector<1x1x16xf32> to vector<16xf32>
    %32 = vector.shape_cast %29 : vector<16xf32> to vector<1x1x16xf32>
    tpu.vector_store %arg4[%c0_23, %c3_24, %c3_25], %32 {strides = array<i32>} : memref<2x22x22xf32, #tpu.memory_space<vmem>>, vector<1x1x16xf32>,
    %c0_26 = arith.constant 0 : index
    %c16 = arith.constant 16 : index
    %33 = vector.load %arg5[%c0_26, %c16] : memref<2x256xf32, #tpu.memory_space<vmem>>, vector<1x16xf32>
    %34 = vector.shape_cast %33 : vector<1x16xf32> to vector<16xf32>
    %c0_27 = arith.constant 0 : index
    %c4 = arith.constant 4 : index
    %c3_28 = arith.constant 3 : index
    %35 = vector.load %arg4[%c0_27, %c4, %c3_28] : memref<2x22x22xf32, #tpu.memory_space<vmem>>, vector<1x1x16xf32>
    %36 = vector.shape_cast %35 : vector<1x1x16xf32> to vector<16xf32>
    %37 = vector.shape_cast %34 : vector<16xf32> to vector<1x1x16xf32>
    tpu.vector_store %arg4[%c0_27, %c4, %c3_28], %37 {strides = array<i32>} : memref<2x22x22xf32, #tpu.memory_space<vmem>>, vector<1x1x16xf32>,
    %c0_29 = arith.constant 0 : index
    %c32 = arith.constant 32 : index
    %38 = vector.load %arg5[%c0_29, %c32] : memref<2x256xf32, #tpu.memory_space<vmem>>, vector<1x16xf32>
    %39 = vector.shape_cast %38 : vector<1x16xf32> to vector<16xf32>
    %c0_30 = arith.constant 0 : index
    %c5 = arith.constant 5 : index
    %c3_31 = arith.constant 3 : index
    %40 = vector.load %arg4[%c0_30, %c5, %c3_31] : memref<2x22x22xf32, #tpu.memory_space<vmem>>, vector<1x1x16xf32>
    %41 = vector.shape_cast %40 : vector<1x1x16xf32> to vector<16xf32>
    %42 = vector.shape_cast %39 : vector<16xf32> to vector<1x1x16xf32>
    tpu.vector_store %arg4[%c0_30, %c5, %c3_31], %42 {strides = array<i32>} : memref<2x22x22xf32, #tpu.memory_space<vmem>>, vector<1x1x16xf32>,
    %c0_32 = arith.constant 0 : index
    %c48 = arith.constant 48 : index
    %43 = vector.load %arg5[%c0_32, %c48] : memref<2x256xf32, #tpu.memory_space<vmem>>, vector<1x16xf32>
    %44 = vector.shape_cast %43 : vector<1x16xf32> to vector<16xf32>
    %c0_33 = arith.constant 0 : index
    %c6 = arith.constant 6 : index
    %c3_34 = arith.constant 3 : index
    %45 = vector.load %arg4[%c0_33, %c6, %c3_34] : memref<2x22x22xf32, #tpu.memory_space<vmem>>, vector<1x1x16xf32>
    %46 = vector.shape_cast %45 : vector<1x1x16xf32> to vector<16xf32>
    %47 = vector.shape_cast %44 : vector<16xf32> to vector<1x1x16xf32>
    tpu.vector_store %arg4[%c0_33, %c6, %c3_34], %47 {strides = array<i32>} : memref<2x22x22xf32, #tpu.memory_space<vmem>>, vector<1x1x16xf32>,
    %c0_35 = arith.constant 0 : index
    %c64 = arith.constant 64 : index
    %48 = vector.load %arg5[%c0_35, %c64] : memref<2x256xf32, #tpu.memory_space<vmem>>, vector<1x16xf32>
    %49 = vector.shape_cast %48 : vector<1x16xf32> to vector<16xf32>
    %c0_36 = arith.constant 0 : index
    %c7 = arith.constant 7 : index
    %c3_37 = arith.constant 3 : index
    %50 = vector.load %arg4[%c0_36, %c7, %c3_37] : memref<2x22x22xf32, #tpu.memory_space<vmem>>, vector<1x1x16xf32>
    %51 = vector.shape_cast %50 : vector<1x1x16xf32> to vector<16xf32>
    %52 = vector.shape_cast %49 : vector<16xf32> to vector<1x1x16xf32>
    tpu.vector_store %arg4[%c0_36, %c7, %c3_37], %52 {strides = array<i32>} : memref<2x22x22xf32, #tpu.memory_space<vmem>>, vector<1x1x16xf32>,
    %c0_38 = arith.constant 0 : index
    %c80 = arith.constant 80 : index
    %53 = vector.load %arg5[%c0_38, %c80] : memref<2x256xf32, #tpu.memory_space<vmem>>, vector<1x16xf32>
    %54 = vector.shape_cast %53 : vector<1x16xf32> to vector<16xf32>
    %c0_39 = arith.constant 0 : index
    %c8 = arith.constant 8 : index
    %c3_40 = arith.constant 3 : index
    %55 = vector.load %arg4[%c0_39, %c8, %c3_40] : memref<2x22x22xf32, #tpu.memory_space<vmem>>, vector<1x1x16xf32>
    %56 = vector.shape_cast %55 : vector<1x1x16xf32> to vector<16xf32>
    %57 = vector.shape_cast %54 : vector<16xf32> to vector<1x1x16xf32>
    tpu.vector_store %arg4[%c0_39, %c8, %c3_40], %57 {strides = array<i32>} : memref<2x22x22xf32, #tpu.memory_space<vmem>>, vector<1x1x16xf32>,
    %c0_41 = arith.constant 0 : index
    %c96 = arith.constant 96 : index
    %58 = vector.load %arg5[%c0_41, %c96] : memref<2x256xf32, #tpu.memory_space<vmem>>, vector<1x16xf32>
    %59 = vector.shape_cast %58 : vector<1x16xf32> to vector<16xf32>
    %c0_42 = arith.constant 0 : index
    %c9 = arith.constant 9 : index
    %c3_43 = arith.constant 3 : index
    %60 = vector.load %arg4[%c0_42, %c9, %c3_43] : memref<2x22x22xf32, #tpu.memory_space<vmem>>, vector<1x1x16xf32>
    %61 = vector.shape_cast %60 : vector<1x1x16xf32> to vector<16xf32>
    %62 = vector.shape_cast %59 : vector<16xf32> to vector<1x1x16xf32>
    tpu.vector_store %arg4[%c0_42, %c9, %c3_43], %62 {strides = array<i32>} : memref<2x22x22xf32, #tpu.memory_space<vmem>>, vector<1x1x16xf32>,
    %c0_44 = arith.constant 0 : index
    %c112 = arith.constant 112 : index
    %63 = vector.load %arg5[%c0_44, %c112] : memref<2x256xf32, #tpu.memory_space<vmem>>, vector<1x16xf32>
    %64 = vector.shape_cast %63 : vector<1x16xf32> to vector<16xf32>
    %c0_45 = arith.constant 0 : index
    %c10 = arith.constant 10 : index
    %c3_46 = arith.constant 3 : index
    %65 = vector.load %arg4[%c0_45, %c10, %c3_46] : memref<2x22x22xf32, #tpu.memory_space<vmem>>, vector<1x1x16xf32>
    %66 = vector.shape_cast %65 : vector<1x1x16xf32> to vector<16xf32>
    %67 = vector.shape_cast %64 : vector<16xf32> to vector<1x1x16xf32>
    tpu.vector_store %arg4[%c0_45, %c10, %c3_46], %67 {strides = array<i32>} : memref<2x22x22xf32, #tpu.memory_space<vmem>>, vector<1x1x16xf32>,
    %c0_47 = arith.constant 0 : index
    %c128 = arith.constant 128 : index
    %68 = vector.load %arg5[%c0_47, %c128] : memref<2x256xf32, #tpu.memory_space<vmem>>, vector<1x16xf32>
    %69 = vector.shape_cast %68 : vector<1x16xf32> to vector<16xf32>
    %c0_48 = arith.constant 0 : index
    %c11 = arith.constant 11 : index
    %c3_49 = arith.constant 3 : index
    %70 = vector.load %arg4[%c0_48, %c11, %c3_49] : memref<2x22x22xf32, #tpu.memory_space<vmem>>, vector<1x1x16xf32>
    %71 = vector.shape_cast %70 : vector<1x1x16xf32> to vector<16xf32>
    %72 = vector.shape_cast %69 : vector<16xf32> to vector<1x1x16xf32>
    tpu.vector_store %arg4[%c0_48, %c11, %c3_49], %72 {strides = array<i32>} : memref<2x22x22xf32, #tpu.memory_space<vmem>>, vector<1x1x16xf32>,
    %c0_50 = arith.constant 0 : index
    %c144 = arith.constant 144 : index
    %73 = vector.load %arg5[%c0_50, %c144] : memref<2x256xf32, #tpu.memory_space<vmem>>, vector<1x16xf32>
    %74 = vector.shape_cast %73 : vector<1x16xf32> to vector<16xf32>
    %c0_51 = arith.constant 0 : index
    %c12 = arith.constant 12 : index
    %c3_52 = arith.constant 3 : index
    %75 = vector.load %arg4[%c0_51, %c12, %c3_52] : memref<2x22x22xf32, #tpu.memory_space<vmem>>, vector<1x1x16xf32>
    %76 = vector.shape_cast %75 : vector<1x1x16xf32> to vector<16xf32>
    %77 = vector.shape_cast %74 : vector<16xf32> to vector<1x1x16xf32>
    tpu.vector_store %arg4[%c0_51, %c12, %c3_52], %77 {strides = array<i32>} : memref<2x22x22xf32, #tpu.memory_space<vmem>>, vector<1x1x16xf32>,
    %c0_53 = arith.constant 0 : index
    %c160 = arith.constant 160 : index
    %78 = vector.load %arg5[%c0_53, %c160] : memref<2x256xf32, #tpu.memory_space<vmem>>, vector<1x16xf32>
    %79 = vector.shape_cast %78 : vector<1x16xf32> to vector<16xf32>
    %c0_54 = arith.constant 0 : index
    %c13 = arith.constant 13 : index
    %c3_55 = arith.constant 3 : index
    %80 = vector.load %arg4[%c0_54, %c13, %c3_55] : memref<2x22x22xf32, #tpu.memory_space<vmem>>, vector<1x1x16xf32>
    %81 = vector.shape_cast %80 : vector<1x1x16xf32> to vector<16xf32>
    %82 = vector.shape_cast %79 : vector<16xf32> to vector<1x1x16xf32>
    tpu.vector_store %arg4[%c0_54, %c13, %c3_55], %82 {strides = array<i32>} : memref<2x22x22xf32, #tpu.memory_space<vmem>>, vector<1x1x16xf32>,
    %c0_56 = arith.constant 0 : index
    %c176 = arith.constant 176 : index
    %83 = vector.load %arg5[%c0_56, %c176] : memref<2x256xf32, #tpu.memory_space<vmem>>, vector<1x16xf32>
    %84 = vector.shape_cast %83 : vector<1x16xf32> to vector<16xf32>
    %c0_57 = arith.constant 0 : index
    %c14 = arith.constant 14 : index
    %c3_58 = arith.constant 3 : index
    %85 = vector.load %arg4[%c0_57, %c14, %c3_58] : memref<2x22x22xf32, #tpu.memory_space<vmem>>, vector<1x1x16xf32>
    %86 = vector.shape_cast %85 : vector<1x1x16xf32> to vector<16xf32>
    %87 = vector.shape_cast %84 : vector<16xf32> to vector<1x1x16xf32>
    tpu.vector_store %arg4[%c0_57, %c14, %c3_58], %87 {strides = array<i32>} : memref<2x22x22xf32, #tpu.memory_space<vmem>>, vector<1x1x16xf32>,
    %c0_59 = arith.constant 0 : index
    %c192 = arith.constant 192 : index
    %88 = vector.load %arg5[%c0_59, %c192] : memref<2x256xf32, #tpu.memory_space<vmem>>, vector<1x16xf32>
    %89 = vector.shape_cast %88 : vector<1x16xf32> to vector<16xf32>
    %c0_60 = arith.constant 0 : index
    %c15 = arith.constant 15 : index
    %c3_61 = arith.constant 3 : index
    %90 = vector.load %arg4[%c0_60, %c15, %c3_61] : memref<2x22x22xf32, #tpu.memory_space<vmem>>, vector<1x1x16xf32>
    %91 = vector.shape_cast %90 : vector<1x1x16xf32> to vector<16xf32>
    %92 = vector.shape_cast %89 : vector<16xf32> to vector<1x1x16xf32>
    tpu.vector_store %arg4[%c0_60, %c15, %c3_61], %92 {strides = array<i32>} : memref<2x22x22xf32, #tpu.memory_space<vmem>>, vector<1x1x16xf32>,
    %c0_62 = arith.constant 0 : index
    %c208 = arith.constant 208 : index
    %93 = vector.load %arg5[%c0_62, %c208] : memref<2x256xf32, #tpu.memory_space<vmem>>, vector<1x16xf32>
    %94 = vector.shape_cast %93 : vector<1x16xf32> to vector<16xf32>
    %c0_63 = arith.constant 0 : index
    %c16_64 = arith.constant 16 : index
    %c3_65 = arith.constant 3 : index
    %95 = vector.load %arg4[%c0_63, %c16_64, %c3_65] : memref<2x22x22xf32, #tpu.memory_space<vmem>>, vector<1x1x16xf32>
    %96 = vector.shape_cast %95 : vector<1x1x16xf32> to vector<16xf32>
    %97 = vector.shape_cast %94 : vector<16xf32> to vector<1x1x16xf32>
    tpu.vector_store %arg4[%c0_63, %c16_64, %c3_65], %97 {strides = array<i32>} : memref<2x22x22xf32, #tpu.memory_space<vmem>>, vector<1x1x16xf32>,
    %c0_66 = arith.constant 0 : index
    %c224 = arith.constant 224 : index
    %98 = vector.load %arg5[%c0_66, %c224] : memref<2x256xf32, #tpu.memory_space<vmem>>, vector<1x16xf32>
    %99 = vector.shape_cast %98 : vector<1x16xf32> to vector<16xf32>
    %c0_67 = arith.constant 0 : index
    %c17 = arith.constant 17 : index
    %c3_68 = arith.constant 3 : index
    %100 = vector.load %arg4[%c0_67, %c17, %c3_68] : memref<2x22x22xf32, #tpu.memory_space<vmem>>, vector<1x1x16xf32>
    %101 = vector.shape_cast %100 : vector<1x1x16xf32> to vector<16xf32>
    %102 = vector.shape_cast %99 : vector<16xf32> to vector<1x1x16xf32>
    tpu.vector_store %arg4[%c0_67, %c17, %c3_68], %102 {strides = array<i32>} : memref<2x22x22xf32, #tpu.memory_space<vmem>>, vector<1x1x16xf32>,
    %c0_69 = arith.constant 0 : index
    %c240 = arith.constant 240 : index
    %103 = vector.load %arg5[%c0_69, %c240] : memref<2x256xf32, #tpu.memory_space<vmem>>, vector<1x16xf32>
    %104 = vector.shape_cast %103 : vector<1x16xf32> to vector<16xf32>
    %c0_70 = arith.constant 0 : index
    %c18 = arith.constant 18 : index
    %c3_71 = arith.constant 3 : index
    %105 = vector.load %arg4[%c0_70, %c18, %c3_71] : memref<2x22x22xf32, #tpu.memory_space<vmem>>, vector<1x1x16xf32>
    %106 = vector.shape_cast %105 : vector<1x1x16xf32> to vector<16xf32>
    %107 = vector.shape_cast %104 : vector<16xf32> to vector<1x1x16xf32>
    tpu.vector_store %arg4[%c0_70, %c18, %c3_71], %107 {strides = array<i32>} : memref<2x22x22xf32, #tpu.memory_space<vmem>>, vector<1x1x16xf32>,
    %c1_72 = arith.constant 1 : index
    %c0_73 = arith.constant 0 : index
    %c0_74 = arith.constant 0 : index
    %108 = vector.load %arg4[%c1_72, %c0_73, %c0_74] : memref<2x22x22xf32, #tpu.memory_space<vmem>>, vector<1x3x22xf32>
    %109 = vector.shape_cast %108 : vector<1x3x22xf32> to vector<3x22xf32>
    %110 = vector.shape_cast %14 : vector<3x22xf32> to vector<1x3x22xf32>
    tpu.vector_store %arg4[%c1_72, %c0_73, %c0_74], %110 {strides = array<i32>} : memref<2x22x22xf32, #tpu.memory_space<vmem>>, vector<1x3x22xf32>,
    %c1_75 = arith.constant 1 : index
    %c19_76 = arith.constant 19 : index
    %c0_77 = arith.constant 0 : index
    %111 = vector.load %arg4[%c1_75, %c19_76, %c0_77] : memref<2x22x22xf32, #tpu.memory_space<vmem>>, vector<1x3x22xf32>
    %112 = vector.shape_cast %111 : vector<1x3x22xf32> to vector<3x22xf32>
    %113 = vector.shape_cast %14 : vector<3x22xf32> to vector<1x3x22xf32>
    tpu.vector_store %arg4[%c1_75, %c19_76, %c0_77], %113 {strides = array<i32>} : memref<2x22x22xf32, #tpu.memory_space<vmem>>, vector<1x3x22xf32>,
    %c1_78 = arith.constant 1 : index
    %c3_79 = arith.constant 3 : index
    %c0_80 = arith.constant 0 : index
    %114 = vector.load %arg4[%c1_78, %c3_79, %c0_80] : memref<2x22x22xf32, #tpu.memory_space<vmem>>, vector<1x16x3xf32>
    %115 = vector.shape_cast %114 : vector<1x16x3xf32> to vector<16x3xf32>
    %116 = vector.shape_cast %15 : vector<16x3xf32> to vector<1x16x3xf32>
    tpu.vector_store %arg4[%c1_78, %c3_79, %c0_80], %116 {strides = array<i32>} : memref<2x22x22xf32, #tpu.memory_space<vmem>>, vector<1x16x3xf32>,
    %c1_81 = arith.constant 1 : index
    %c3_82 = arith.constant 3 : index
    %c19_83 = arith.constant 19 : index
    %117 = vector.load %arg4[%c1_81, %c3_82, %c19_83] : memref<2x22x22xf32, #tpu.memory_space<vmem>>, vector<1x16x3xf32>
    %118 = vector.shape_cast %117 : vector<1x16x3xf32> to vector<16x3xf32>
    %119 = vector.shape_cast %15 : vector<16x3xf32> to vector<1x16x3xf32>
    tpu.vector_store %arg4[%c1_81, %c3_82, %c19_83], %119 {strides = array<i32>} : memref<2x22x22xf32, #tpu.memory_space<vmem>>, vector<1x16x3xf32>,
    %c1_84 = arith.constant 1 : index
    %c0_85 = arith.constant 0 : index
    %120 = vector.load %arg5[%c1_84, %c0_85] : memref<2x256xf32, #tpu.memory_space<vmem>>, vector<1x16xf32>
    %121 = vector.shape_cast %120 : vector<1x16xf32> to vector<16xf32>
    %c1_86 = arith.constant 1 : index
    %c3_87 = arith.constant 3 : index
    %c3_88 = arith.constant 3 : index
    %122 = vector.load %arg4[%c1_86, %c3_87, %c3_88] : memref<2x22x22xf32, #tpu.memory_space<vmem>>, vector<1x1x16xf32>
    %123 = vector.shape_cast %122 : vector<1x1x16xf32> to vector<16xf32>
    %124 = vector.shape_cast %121 : vector<16xf32> to vector<1x1x16xf32>
    tpu.vector_store %arg4[%c1_86, %c3_87, %c3_88], %124 {strides = array<i32>} : memref<2x22x22xf32, #tpu.memory_space<vmem>>, vector<1x1x16xf32>,
    %c1_89 = arith.constant 1 : index
    %c16_90 = arith.constant 16 : index
    %125 = vector.load %arg5[%c1_89, %c16_90] : memref<2x256xf32, #tpu.memory_space<vmem>>, vector<1x16xf32>
    %126 = vector.shape_cast %125 : vector<1x16xf32> to vector<16xf32>
    %c1_91 = arith.constant 1 : index
    %c4_92 = arith.constant 4 : index
    %c3_93 = arith.constant 3 : index
    %127 = vector.load %arg4[%c1_91, %c4_92, %c3_93] : memref<2x22x22xf32, #tpu.memory_space<vmem>>, vector<1x1x16xf32>
    %128 = vector.shape_cast %127 : vector<1x1x16xf32> to vector<16xf32>
    %129 = vector.shape_cast %126 : vector<16xf32> to vector<1x1x16xf32>
    tpu.vector_store %arg4[%c1_91, %c4_92, %c3_93], %129 {strides = array<i32>} : memref<2x22x22xf32, #tpu.memory_space<vmem>>, vector<1x1x16xf32>,
    %c1_94 = arith.constant 1 : index
    %c32_95 = arith.constant 32 : index
    %130 = vector.load %arg5[%c1_94, %c32_95] : memref<2x256xf32, #tpu.memory_space<vmem>>, vector<1x16xf32>
    %131 = vector.shape_cast %130 : vector<1x16xf32> to vector<16xf32>
    %c1_96 = arith.constant 1 : index
    %c5_97 = arith.constant 5 : index
    %c3_98 = arith.constant 3 : index
    %132 = vector.load %arg4[%c1_96, %c5_97, %c3_98] : memref<2x22x22xf32, #tpu.memory_space<vmem>>, vector<1x1x16xf32>
    %133 = vector.shape_cast %132 : vector<1x1x16xf32> to vector<16xf32>
    %134 = vector.shape_cast %131 : vector<16xf32> to vector<1x1x16xf32>
    tpu.vector_store %arg4[%c1_96, %c5_97, %c3_98], %134 {strides = array<i32>} : memref<2x22x22xf32, #tpu.memory_space<vmem>>, vector<1x1x16xf32>,
    %c1_99 = arith.constant 1 : index
    %c48_100 = arith.constant 48 : index
    %135 = vector.load %arg5[%c1_99, %c48_100] : memref<2x256xf32, #tpu.memory_space<vmem>>, vector<1x16xf32>
    %136 = vector.shape_cast %135 : vector<1x16xf32> to vector<16xf32>
    %c1_101 = arith.constant 1 : index
    %c6_102 = arith.constant 6 : index
    %c3_103 = arith.constant 3 : index
    %137 = vector.load %arg4[%c1_101, %c6_102, %c3_103] : memref<2x22x22xf32, #tpu.memory_space<vmem>>, vector<1x1x16xf32>
    %138 = vector.shape_cast %137 : vector<1x1x16xf32> to vector<16xf32>
    %139 = vector.shape_cast %136 : vector<16xf32> to vector<1x1x16xf32>
    tpu.vector_store %arg4[%c1_101, %c6_102, %c3_103], %139 {strides = array<i32>} : memref<2x22x22xf32, #tpu.memory_space<vmem>>, vector<1x1x16xf32>,
    %c1_104 = arith.constant 1 : index
    %c64_105 = arith.constant 64 : index
    %140 = vector.load %arg5[%c1_104, %c64_105] : memref<2x256xf32, #tpu.memory_space<vmem>>, vector<1x16xf32>
    %141 = vector.shape_cast %140 : vector<1x16xf32> to vector<16xf32>
    %c1_106 = arith.constant 1 : index
    %c7_107 = arith.constant 7 : index
    %c3_108 = arith.constant 3 : index
    %142 = vector.load %arg4[%c1_106, %c7_107, %c3_108] : memref<2x22x22xf32, #tpu.memory_space<vmem>>, vector<1x1x16xf32>
    %143 = vector.shape_cast %142 : vector<1x1x16xf32> to vector<16xf32>
    %144 = vector.shape_cast %141 : vector<16xf32> to vector<1x1x16xf32>
    tpu.vector_store %arg4[%c1_106, %c7_107, %c3_108], %144 {strides = array<i32>} : memref<2x22x22xf32, #tpu.memory_space<vmem>>, vector<1x1x16xf32>,
    %c1_109 = arith.constant 1 : index
    %c80_110 = arith.constant 80 : index
    %145 = vector.load %arg5[%c1_109, %c80_110] : memref<2x256xf32, #tpu.memory_space<vmem>>, vector<1x16xf32>
    %146 = vector.shape_cast %145 : vector<1x16xf32> to vector<16xf32>
    %c1_111 = arith.constant 1 : index
    %c8_112 = arith.constant 8 : index
    %c3_113 = arith.constant 3 : index
    %147 = vector.load %arg4[%c1_111, %c8_112, %c3_113] : memref<2x22x22xf32, #tpu.memory_space<vmem>>, vector<1x1x16xf32>
    %148 = vector.shape_cast %147 : vector<1x1x16xf32> to vector<16xf32>
    %149 = vector.shape_cast %146 : vector<16xf32> to vector<1x1x16xf32>
    tpu.vector_store %arg4[%c1_111, %c8_112, %c3_113], %149 {strides = array<i32>} : memref<2x22x22xf32, #tpu.memory_space<vmem>>, vector<1x1x16xf32>,
    %c1_114 = arith.constant 1 : index
    %c96_115 = arith.constant 96 : index
    %150 = vector.load %arg5[%c1_114, %c96_115] : memref<2x256xf32, #tpu.memory_space<vmem>>, vector<1x16xf32>
    %151 = vector.shape_cast %150 : vector<1x16xf32> to vector<16xf32>
    %c1_116 = arith.constant 1 : index
    %c9_117 = arith.constant 9 : index
    %c3_118 = arith.constant 3 : index
    %152 = vector.load %arg4[%c1_116, %c9_117, %c3_118] : memref<2x22x22xf32, #tpu.memory_space<vmem>>, vector<1x1x16xf32>
    %153 = vector.shape_cast %152 : vector<1x1x16xf32> to vector<16xf32>
    %154 = vector.shape_cast %151 : vector<16xf32> to vector<1x1x16xf32>
    tpu.vector_store %arg4[%c1_116, %c9_117, %c3_118], %154 {strides = array<i32>} : memref<2x22x22xf32, #tpu.memory_space<vmem>>, vector<1x1x16xf32>,
    %c1_119 = arith.constant 1 : index
    %c112_120 = arith.constant 112 : index
    %155 = vector.load %arg5[%c1_119, %c112_120] : memref<2x256xf32, #tpu.memory_space<vmem>>, vector<1x16xf32>
    %156 = vector.shape_cast %155 : vector<1x16xf32> to vector<16xf32>
    %c1_121 = arith.constant 1 : index
    %c10_122 = arith.constant 10 : index
    %c3_123 = arith.constant 3 : index
    %157 = vector.load %arg4[%c1_121, %c10_122, %c3_123] : memref<2x22x22xf32, #tpu.memory_space<vmem>>, vector<1x1x16xf32>
    %158 = vector.shape_cast %157 : vector<1x1x16xf32> to vector<16xf32>
    %159 = vector.shape_cast %156 : vector<16xf32> to vector<1x1x16xf32>
    tpu.vector_store %arg4[%c1_121, %c10_122, %c3_123], %159 {strides = array<i32>} : memref<2x22x22xf32, #tpu.memory_space<vmem>>, vector<1x1x16xf32>,
    %c1_124 = arith.constant 1 : index
    %c128_125 = arith.constant 128 : index
    %160 = vector.load %arg5[%c1_124, %c128_125] : memref<2x256xf32, #tpu.memory_space<vmem>>, vector<1x16xf32>
    %161 = vector.shape_cast %160 : vector<1x16xf32> to vector<16xf32>
    %c1_126 = arith.constant 1 : index
    %c11_127 = arith.constant 11 : index
    %c3_128 = arith.constant 3 : index
    %162 = vector.load %arg4[%c1_126, %c11_127, %c3_128] : memref<2x22x22xf32, #tpu.memory_space<vmem>>, vector<1x1x16xf32>
    %163 = vector.shape_cast %162 : vector<1x1x16xf32> to vector<16xf32>
    %164 = vector.shape_cast %161 : vector<16xf32> to vector<1x1x16xf32>
    tpu.vector_store %arg4[%c1_126, %c11_127, %c3_128], %164 {strides = array<i32>} : memref<2x22x22xf32, #tpu.memory_space<vmem>>, vector<1x1x16xf32>,
    %c1_129 = arith.constant 1 : index
    %c144_130 = arith.constant 144 : index
    %165 = vector.load %arg5[%c1_129, %c144_130] : memref<2x256xf32, #tpu.memory_space<vmem>>, vector<1x16xf32>
    %166 = vector.shape_cast %165 : vector<1x16xf32> to vector<16xf32>
    %c1_131 = arith.constant 1 : index
    %c12_132 = arith.constant 12 : index
    %c3_133 = arith.constant 3 : index
    %167 = vector.load %arg4[%c1_131, %c12_132, %c3_133] : memref<2x22x22xf32, #tpu.memory_space<vmem>>, vector<1x1x16xf32>
    %168 = vector.shape_cast %167 : vector<1x1x16xf32> to vector<16xf32>
    %169 = vector.shape_cast %166 : vector<16xf32> to vector<1x1x16xf32>
    tpu.vector_store %arg4[%c1_131, %c12_132, %c3_133], %169 {strides = array<i32>} : memref<2x22x22xf32, #tpu.memory_space<vmem>>, vector<1x1x16xf32>,
    %c1_134 = arith.constant 1 : index
    %c160_135 = arith.constant 160 : index
    %170 = vector.load %arg5[%c1_134, %c160_135] : memref<2x256xf32, #tpu.memory_space<vmem>>, vector<1x16xf32>
    %171 = vector.shape_cast %170 : vector<1x16xf32> to vector<16xf32>
    %c1_136 = arith.constant 1 : index
    %c13_137 = arith.constant 13 : index
    %c3_138 = arith.constant 3 : index
    %172 = vector.load %arg4[%c1_136, %c13_137, %c3_138] : memref<2x22x22xf32, #tpu.memory_space<vmem>>, vector<1x1x16xf32>
    %173 = vector.shape_cast %172 : vector<1x1x16xf32> to vector<16xf32>
    %174 = vector.shape_cast %171 : vector<16xf32> to vector<1x1x16xf32>
    tpu.vector_store %arg4[%c1_136, %c13_137, %c3_138], %174 {strides = array<i32>} : memref<2x22x22xf32, #tpu.memory_space<vmem>>, vector<1x1x16xf32>,
    %c1_139 = arith.constant 1 : index
    %c176_140 = arith.constant 176 : index
    %175 = vector.load %arg5[%c1_139, %c176_140] : memref<2x256xf32, #tpu.memory_space<vmem>>, vector<1x16xf32>
    %176 = vector.shape_cast %175 : vector<1x16xf32> to vector<16xf32>
    %c1_141 = arith.constant 1 : index
    %c14_142 = arith.constant 14 : index
    %c3_143 = arith.constant 3 : index
    %177 = vector.load %arg4[%c1_141, %c14_142, %c3_143] : memref<2x22x22xf32, #tpu.memory_space<vmem>>, vector<1x1x16xf32>
    %178 = vector.shape_cast %177 : vector<1x1x16xf32> to vector<16xf32>
    %179 = vector.shape_cast %176 : vector<16xf32> to vector<1x1x16xf32>
    tpu.vector_store %arg4[%c1_141, %c14_142, %c3_143], %179 {strides = array<i32>} : memref<2x22x22xf32, #tpu.memory_space<vmem>>, vector<1x1x16xf32>,
    %c1_144 = arith.constant 1 : index
    %c192_145 = arith.constant 192 : index
    %180 = vector.load %arg5[%c1_144, %c192_145] : memref<2x256xf32, #tpu.memory_space<vmem>>, vector<1x16xf32>
    %181 = vector.shape_cast %180 : vector<1x16xf32> to vector<16xf32>
    %c1_146 = arith.constant 1 : index
    %c15_147 = arith.constant 15 : index
    %c3_148 = arith.constant 3 : index
    %182 = vector.load %arg4[%c1_146, %c15_147, %c3_148] : memref<2x22x22xf32, #tpu.memory_space<vmem>>, vector<1x1x16xf32>
    %183 = vector.shape_cast %182 : vector<1x1x16xf32> to vector<16xf32>
    %184 = vector.shape_cast %181 : vector<16xf32> to vector<1x1x16xf32>
    tpu.vector_store %arg4[%c1_146, %c15_147, %c3_148], %184 {strides = array<i32>} : memref<2x22x22xf32, #tpu.memory_space<vmem>>, vector<1x1x16xf32>,
    %c1_149 = arith.constant 1 : index
    %c208_150 = arith.constant 208 : index
    %185 = vector.load %arg5[%c1_149, %c208_150] : memref<2x256xf32, #tpu.memory_space<vmem>>, vector<1x16xf32>
    %186 = vector.shape_cast %185 : vector<1x16xf32> to vector<16xf32>
    %c1_151 = arith.constant 1 : index
    %c16_152 = arith.constant 16 : index
    %c3_153 = arith.constant 3 : index
    %187 = vector.load %arg4[%c1_151, %c16_152, %c3_153] : memref<2x22x22xf32, #tpu.memory_space<vmem>>, vector<1x1x16xf32>
    %188 = vector.shape_cast %187 : vector<1x1x16xf32> to vector<16xf32>
    %189 = vector.shape_cast %186 : vector<16xf32> to vector<1x1x16xf32>
    tpu.vector_store %arg4[%c1_151, %c16_152, %c3_153], %189 {strides = array<i32>} : memref<2x22x22xf32, #tpu.memory_space<vmem>>, vector<1x1x16xf32>,
    %c1_154 = arith.constant 1 : index
    %c224_155 = arith.constant 224 : index
    %190 = vector.load %arg5[%c1_154, %c224_155] : memref<2x256xf32, #tpu.memory_space<vmem>>, vector<1x16xf32>
    %191 = vector.shape_cast %190 : vector<1x16xf32> to vector<16xf32>
    %c1_156 = arith.constant 1 : index
    %c17_157 = arith.constant 17 : index
    %c3_158 = arith.constant 3 : index
    %192 = vector.load %arg4[%c1_156, %c17_157, %c3_158] : memref<2x22x22xf32, #tpu.memory_space<vmem>>, vector<1x1x16xf32>
    %193 = vector.shape_cast %192 : vector<1x1x16xf32> to vector<16xf32>
    %194 = vector.shape_cast %191 : vector<16xf32> to vector<1x1x16xf32>
    tpu.vector_store %arg4[%c1_156, %c17_157, %c3_158], %194 {strides = array<i32>} : memref<2x22x22xf32, #tpu.memory_space<vmem>>, vector<1x1x16xf32>,
    %c1_159 = arith.constant 1 : index
    %c240_160 = arith.constant 240 : index
    %195 = vector.load %arg5[%c1_159, %c240_160] : memref<2x256xf32, #tpu.memory_space<vmem>>, vector<1x16xf32>
    %196 = vector.shape_cast %195 : vector<1x16xf32> to vector<16xf32>
    %c1_161 = arith.constant 1 : index
    %c18_162 = arith.constant 18 : index
    %c3_163 = arith.constant 3 : index
    %197 = vector.load %arg4[%c1_161, %c18_162, %c3_163] : memref<2x22x22xf32, #tpu.memory_space<vmem>>, vector<1x1x16xf32>
    %198 = vector.shape_cast %197 : vector<1x1x16xf32> to vector<16xf32>
    %199 = vector.shape_cast %196 : vector<16xf32> to vector<1x1x16xf32>
    tpu.vector_store %arg4[%c1_161, %c18_162, %c3_163], %199 {strides = array<i32>} : memref<2x22x22xf32, #tpu.memory_space<vmem>>, vector<1x1x16xf32>,
    %cst_164 = arith.constant 0.000000e+00 : f32
    %200 = vector.broadcast %cst_164 : f32 to vector<16x16xf32>
    %cst_165 = arith.constant 0.000000e+00 : f32
    %201 = vector.broadcast %cst_165 : f32 to vector<16x16xf32>
    %cst_166 = arith.constant 0.000000e+00 : f32
    %202 = vector.broadcast %cst_166 : f32 to vector<16x16xf32>
    %cst_167 = arith.constant 0.000000e+00 : f32
    %203 = vector.broadcast %cst_167 : f32 to vector<16x16xf32>
    %c0_168 = arith.constant 0 : index
    %c0_169 = arith.constant 0 : index
    %c0_170 = arith.constant 0 : index
    %204 = vector.load %arg4[%c0_168, %c0_169, %c0_170] : memref<2x22x22xf32, #tpu.memory_space<vmem>>, vector<1x16x22xf32>
    %205 = vector.shape_cast %204 : vector<1x16x22xf32> to vector<16x22xf32>
    %c0_171 = arith.constant 0 : index
    %206 = memref.load %arg2[%c0_171] : memref<98xf32, #tpu.memory_space<smem>>
    %207 = vector.extract_strided_slice %205 {offsets = [0, 0], sizes = [16, 16], strides = [1, 1]} : vector<16x22xf32> to vector<16x16xf32>
    %208 = vector.broadcast %206 : f32 to vector<16x16xf32>
    %209 = arith.mulf %207, %208 : vector<16x16xf32>
    %210 = arith.addf %200, %209 : vector<16x16xf32>
    %c1_172 = arith.constant 1 : index
    %211 = memref.load %arg2[%c1_172] : memref<98xf32, #tpu.memory_space<smem>>
    %212 = vector.extract_strided_slice %205 {offsets = [0, 1], sizes = [16, 16], strides = [1, 1]} : vector<16x22xf32> to vector<16x16xf32>
    %213 = vector.broadcast %211 : f32 to vector<16x16xf32>
    %214 = arith.mulf %212, %213 : vector<16x16xf32>
    %215 = arith.addf %201, %214 : vector<16x16xf32>
    %c2 = arith.constant 2 : index
    %216 = memref.load %arg2[%c2] : memref<98xf32, #tpu.memory_space<smem>>
    %217 = vector.extract_strided_slice %205 {offsets = [0, 2], sizes = [16, 16], strides = [1, 1]} : vector<16x22xf32> to vector<16x16xf32>
    %218 = vector.broadcast %216 : f32 to vector<16x16xf32>
    %219 = arith.mulf %217, %218 : vector<16x16xf32>
    %220 = arith.addf %202, %219 : vector<16x16xf32>
    %c3_173 = arith.constant 3 : index
    %221 = memref.load %arg2[%c3_173] : memref<98xf32, #tpu.memory_space<smem>>
    %222 = vector.extract_strided_slice %205 {offsets = [0, 3], sizes = [16, 16], strides = [1, 1]} : vector<16x22xf32> to vector<16x16xf32>
    %223 = vector.broadcast %221 : f32 to vector<16x16xf32>
    %224 = arith.mulf %222, %223 : vector<16x16xf32>
    %225 = arith.addf %203, %224 : vector<16x16xf32>
    %c4_174 = arith.constant 4 : index
    %226 = memref.load %arg2[%c4_174] : memref<98xf32, #tpu.memory_space<smem>>
    %227 = vector.extract_strided_slice %205 {offsets = [0, 4], sizes = [16, 16], strides = [1, 1]} : vector<16x22xf32> to vector<16x16xf32>
    %228 = vector.broadcast %226 : f32 to vector<16x16xf32>
    %229 = arith.mulf %227, %228 : vector<16x16xf32>
    %230 = arith.addf %210, %229 : vector<16x16xf32>
    %c5_175 = arith.constant 5 : index
    %231 = memref.load %arg2[%c5_175] : memref<98xf32, #tpu.memory_space<smem>>
    %232 = vector.extract_strided_slice %205 {offsets = [0, 5], sizes = [16, 16], strides = [1, 1]} : vector<16x22xf32> to vector<16x16xf32>
    %233 = vector.broadcast %231 : f32 to vector<16x16xf32>
    %234 = arith.mulf %232, %233 : vector<16x16xf32>
    %235 = arith.addf %215, %234 : vector<16x16xf32>
    %c6_176 = arith.constant 6 : index
    %236 = memref.load %arg2[%c6_176] : memref<98xf32, #tpu.memory_space<smem>>
    %237 = vector.extract_strided_slice %205 {offsets = [0, 6], sizes = [16, 16], strides = [1, 1]} : vector<16x22xf32> to vector<16x16xf32>
    %238 = vector.broadcast %236 : f32 to vector<16x16xf32>
    %239 = arith.mulf %237, %238 : vector<16x16xf32>
    %240 = arith.addf %220, %239 : vector<16x16xf32>
    %c0_177 = arith.constant 0 : index
    %c1_178 = arith.constant 1 : index
    %c0_179 = arith.constant 0 : index
    %241 = vector.load %arg4[%c0_177, %c1_178, %c0_179] : memref<2x22x22xf32, #tpu.memory_space<vmem>>, vector<1x16x22xf32>
    %242 = vector.shape_cast %241 : vector<1x16x22xf32> to vector<16x22xf32>
    %c7_180 = arith.constant 7 : index
    %243 = memref.load %arg2[%c7_180] : memref<98xf32, #tpu.memory_space<smem>>
    %244 = vector.extract_strided_slice %242 {offsets = [0, 0], sizes = [16, 16], strides = [1, 1]} : vector<16x22xf32> to vector<16x16xf32>
    %245 = vector.broadcast %243 : f32 to vector<16x16xf32>
    %246 = arith.mulf %244, %245 : vector<16x16xf32>
    %247 = arith.addf %225, %246 : vector<16x16xf32>
    %c8_181 = arith.constant 8 : index
    %248 = memref.load %arg2[%c8_181] : memref<98xf32, #tpu.memory_space<smem>>
    %249 = vector.extract_strided_slice %242 {offsets = [0, 1], sizes = [16, 16], strides = [1, 1]} : vector<16x22xf32> to vector<16x16xf32>
    %250 = vector.broadcast %248 : f32 to vector<16x16xf32>
    %251 = arith.mulf %249, %250 : vector<16x16xf32>
    %252 = arith.addf %230, %251 : vector<16x16xf32>
    %c9_182 = arith.constant 9 : index
    %253 = memref.load %arg2[%c9_182] : memref<98xf32, #tpu.memory_space<smem>>
    %254 = vector.extract_strided_slice %242 {offsets = [0, 2], sizes = [16, 16], strides = [1, 1]} : vector<16x22xf32> to vector<16x16xf32>
    %255 = vector.broadcast %253 : f32 to vector<16x16xf32>
    %256 = arith.mulf %254, %255 : vector<16x16xf32>
    %257 = arith.addf %235, %256 : vector<16x16xf32>
    %c10_183 = arith.constant 10 : index
    %258 = memref.load %arg2[%c10_183] : memref<98xf32, #tpu.memory_space<smem>>
    %259 = vector.extract_strided_slice %242 {offsets = [0, 3], sizes = [16, 16], strides = [1, 1]} : vector<16x22xf32> to vector<16x16xf32>
    %260 = vector.broadcast %258 : f32 to vector<16x16xf32>
    %261 = arith.mulf %259, %260 : vector<16x16xf32>
    %262 = arith.addf %240, %261 : vector<16x16xf32>
    %c11_184 = arith.constant 11 : index
    %263 = memref.load %arg2[%c11_184] : memref<98xf32, #tpu.memory_space<smem>>
    %264 = vector.extract_strided_slice %242 {offsets = [0, 4], sizes = [16, 16], strides = [1, 1]} : vector<16x22xf32> to vector<16x16xf32>
    %265 = vector.broadcast %263 : f32 to vector<16x16xf32>
    %266 = arith.mulf %264, %265 : vector<16x16xf32>
    %267 = arith.addf %247, %266 : vector<16x16xf32>
    %c12_185 = arith.constant 12 : index
    %268 = memref.load %arg2[%c12_185] : memref<98xf32, #tpu.memory_space<smem>>
    %269 = vector.extract_strided_slice %242 {offsets = [0, 5], sizes = [16, 16], strides = [1, 1]} : vector<16x22xf32> to vector<16x16xf32>
    %270 = vector.broadcast %268 : f32 to vector<16x16xf32>
    %271 = arith.mulf %269, %270 : vector<16x16xf32>
    %272 = arith.addf %252, %271 : vector<16x16xf32>
    %c13_186 = arith.constant 13 : index
    %273 = memref.load %arg2[%c13_186] : memref<98xf32, #tpu.memory_space<smem>>
    %274 = vector.extract_strided_slice %242 {offsets = [0, 6], sizes = [16, 16], strides = [1, 1]} : vector<16x22xf32> to vector<16x16xf32>
    %275 = vector.broadcast %273 : f32 to vector<16x16xf32>
    %276 = arith.mulf %274, %275 : vector<16x16xf32>
    %277 = arith.addf %257, %276 : vector<16x16xf32>
    %c0_187 = arith.constant 0 : index
    %c2_188 = arith.constant 2 : index
    %c0_189 = arith.constant 0 : index
    %278 = vector.load %arg4[%c0_187, %c2_188, %c0_189] : memref<2x22x22xf32, #tpu.memory_space<vmem>>, vector<1x16x22xf32>
    %279 = vector.shape_cast %278 : vector<1x16x22xf32> to vector<16x22xf32>
    %c14_190 = arith.constant 14 : index
    %280 = memref.load %arg2[%c14_190] : memref<98xf32, #tpu.memory_space<smem>>
    %281 = vector.extract_strided_slice %279 {offsets = [0, 0], sizes = [16, 16], strides = [1, 1]} : vector<16x22xf32> to vector<16x16xf32>
    %282 = vector.broadcast %280 : f32 to vector<16x16xf32>
    %283 = arith.mulf %281, %282 : vector<16x16xf32>
    %284 = arith.addf %262, %283 : vector<16x16xf32>
    %c15_191 = arith.constant 15 : index
    %285 = memref.load %arg2[%c15_191] : memref<98xf32, #tpu.memory_space<smem>>
    %286 = vector.extract_strided_slice %279 {offsets = [0, 1], sizes = [16, 16], strides = [1, 1]} : vector<16x22xf32> to vector<16x16xf32>
    %287 = vector.broadcast %285 : f32 to vector<16x16xf32>
    %288 = arith.mulf %286, %287 : vector<16x16xf32>
    %289 = arith.addf %267, %288 : vector<16x16xf32>
    %c16_192 = arith.constant 16 : index
    %290 = memref.load %arg2[%c16_192] : memref<98xf32, #tpu.memory_space<smem>>
    %291 = vector.extract_strided_slice %279 {offsets = [0, 2], sizes = [16, 16], strides = [1, 1]} : vector<16x22xf32> to vector<16x16xf32>
    %292 = vector.broadcast %290 : f32 to vector<16x16xf32>
    %293 = arith.mulf %291, %292 : vector<16x16xf32>
    %294 = arith.addf %272, %293 : vector<16x16xf32>
    %c17_193 = arith.constant 17 : index
    %295 = memref.load %arg2[%c17_193] : memref<98xf32, #tpu.memory_space<smem>>
    %296 = vector.extract_strided_slice %279 {offsets = [0, 3], sizes = [16, 16], strides = [1, 1]} : vector<16x22xf32> to vector<16x16xf32>
    %297 = vector.broadcast %295 : f32 to vector<16x16xf32>
    %298 = arith.mulf %296, %297 : vector<16x16xf32>
    %299 = arith.addf %277, %298 : vector<16x16xf32>
    %c18_194 = arith.constant 18 : index
    %300 = memref.load %arg2[%c18_194] : memref<98xf32, #tpu.memory_space<smem>>
    %301 = vector.extract_strided_slice %279 {offsets = [0, 4], sizes = [16, 16], strides = [1, 1]} : vector<16x22xf32> to vector<16x16xf32>
    %302 = vector.broadcast %300 : f32 to vector<16x16xf32>
    %303 = arith.mulf %301, %302 : vector<16x16xf32>
    %304 = arith.addf %284, %303 : vector<16x16xf32>
    %c19_195 = arith.constant 19 : index
    %305 = memref.load %arg2[%c19_195] : memref<98xf32, #tpu.memory_space<smem>>
    %306 = vector.extract_strided_slice %279 {offsets = [0, 5], sizes = [16, 16], strides = [1, 1]} : vector<16x22xf32> to vector<16x16xf32>
    %307 = vector.broadcast %305 : f32 to vector<16x16xf32>
    %308 = arith.mulf %306, %307 : vector<16x16xf32>
    %309 = arith.addf %289, %308 : vector<16x16xf32>
    %c20 = arith.constant 20 : index
    %310 = memref.load %arg2[%c20] : memref<98xf32, #tpu.memory_space<smem>>
    %311 = vector.extract_strided_slice %279 {offsets = [0, 6], sizes = [16, 16], strides = [1, 1]} : vector<16x22xf32> to vector<16x16xf32>
    %312 = vector.broadcast %310 : f32 to vector<16x16xf32>
    %313 = arith.mulf %311, %312 : vector<16x16xf32>
    %314 = arith.addf %294, %313 : vector<16x16xf32>
    %c0_196 = arith.constant 0 : index
    %c3_197 = arith.constant 3 : index
    %c0_198 = arith.constant 0 : index
    %315 = vector.load %arg4[%c0_196, %c3_197, %c0_198] : memref<2x22x22xf32, #tpu.memory_space<vmem>>, vector<1x16x22xf32>
    %316 = vector.shape_cast %315 : vector<1x16x22xf32> to vector<16x22xf32>
    %c21 = arith.constant 21 : index
    %317 = memref.load %arg2[%c21] : memref<98xf32, #tpu.memory_space<smem>>
    %318 = vector.extract_strided_slice %316 {offsets = [0, 0], sizes = [16, 16], strides = [1, 1]} : vector<16x22xf32> to vector<16x16xf32>
    %319 = vector.broadcast %317 : f32 to vector<16x16xf32>
    %320 = arith.mulf %318, %319 : vector<16x16xf32>
    %321 = arith.addf %299, %320 : vector<16x16xf32>
    %c22 = arith.constant 22 : index
    %322 = memref.load %arg2[%c22] : memref<98xf32, #tpu.memory_space<smem>>
    %323 = vector.extract_strided_slice %316 {offsets = [0, 1], sizes = [16, 16], strides = [1, 1]} : vector<16x22xf32> to vector<16x16xf32>
    %324 = vector.broadcast %322 : f32 to vector<16x16xf32>
    %325 = arith.mulf %323, %324 : vector<16x16xf32>
    %326 = arith.addf %304, %325 : vector<16x16xf32>
    %c23 = arith.constant 23 : index
    %327 = memref.load %arg2[%c23] : memref<98xf32, #tpu.memory_space<smem>>
    %328 = vector.extract_strided_slice %316 {offsets = [0, 2], sizes = [16, 16], strides = [1, 1]} : vector<16x22xf32> to vector<16x16xf32>
    %329 = vector.broadcast %327 : f32 to vector<16x16xf32>
    %330 = arith.mulf %328, %329 : vector<16x16xf32>
    %331 = arith.addf %309, %330 : vector<16x16xf32>
    %c24 = arith.constant 24 : index
    %332 = memref.load %arg2[%c24] : memref<98xf32, #tpu.memory_space<smem>>
    %333 = vector.extract_strided_slice %316 {offsets = [0, 3], sizes = [16, 16], strides = [1, 1]} : vector<16x22xf32> to vector<16x16xf32>
    %334 = vector.broadcast %332 : f32 to vector<16x16xf32>
    %335 = arith.mulf %333, %334 : vector<16x16xf32>
    %336 = arith.addf %314, %335 : vector<16x16xf32>
    %c25 = arith.constant 25 : index
    %337 = memref.load %arg2[%c25] : memref<98xf32, #tpu.memory_space<smem>>
    %338 = vector.extract_strided_slice %316 {offsets = [0, 4], sizes = [16, 16], strides = [1, 1]} : vector<16x22xf32> to vector<16x16xf32>
    %339 = vector.broadcast %337 : f32 to vector<16x16xf32>
    %340 = arith.mulf %338, %339 : vector<16x16xf32>
    %341 = arith.addf %321, %340 : vector<16x16xf32>
    %c26 = arith.constant 26 : index
    %342 = memref.load %arg2[%c26] : memref<98xf32, #tpu.memory_space<smem>>
    %343 = vector.extract_strided_slice %316 {offsets = [0, 5], sizes = [16, 16], strides = [1, 1]} : vector<16x22xf32> to vector<16x16xf32>
    %344 = vector.broadcast %342 : f32 to vector<16x16xf32>
    %345 = arith.mulf %343, %344 : vector<16x16xf32>
    %346 = arith.addf %326, %345 : vector<16x16xf32>
    %c27 = arith.constant 27 : index
    %347 = memref.load %arg2[%c27] : memref<98xf32, #tpu.memory_space<smem>>
    %348 = vector.extract_strided_slice %316 {offsets = [0, 6], sizes = [16, 16], strides = [1, 1]} : vector<16x22xf32> to vector<16x16xf32>
    %349 = vector.broadcast %347 : f32 to vector<16x16xf32>
    %350 = arith.mulf %348, %349 : vector<16x16xf32>
    %351 = arith.addf %331, %350 : vector<16x16xf32>
    %c0_199 = arith.constant 0 : index
    %c4_200 = arith.constant 4 : index
    %c0_201 = arith.constant 0 : index
    %352 = vector.load %arg4[%c0_199, %c4_200, %c0_201] : memref<2x22x22xf32, #tpu.memory_space<vmem>>, vector<1x16x22xf32>
    %353 = vector.shape_cast %352 : vector<1x16x22xf32> to vector<16x22xf32>
    %c28 = arith.constant 28 : index
    %354 = memref.load %arg2[%c28] : memref<98xf32, #tpu.memory_space<smem>>
    %355 = vector.extract_strided_slice %353 {offsets = [0, 0], sizes = [16, 16], strides = [1, 1]} : vector<16x22xf32> to vector<16x16xf32>
    %356 = vector.broadcast %354 : f32 to vector<16x16xf32>
    %357 = arith.mulf %355, %356 : vector<16x16xf32>
    %358 = arith.addf %336, %357 : vector<16x16xf32>
    %c29 = arith.constant 29 : index
    %359 = memref.load %arg2[%c29] : memref<98xf32, #tpu.memory_space<smem>>
    %360 = vector.extract_strided_slice %353 {offsets = [0, 1], sizes = [16, 16], strides = [1, 1]} : vector<16x22xf32> to vector<16x16xf32>
    %361 = vector.broadcast %359 : f32 to vector<16x16xf32>
    %362 = arith.mulf %360, %361 : vector<16x16xf32>
    %363 = arith.addf %341, %362 : vector<16x16xf32>
    %c30 = arith.constant 30 : index
    %364 = memref.load %arg2[%c30] : memref<98xf32, #tpu.memory_space<smem>>
    %365 = vector.extract_strided_slice %353 {offsets = [0, 2], sizes = [16, 16], strides = [1, 1]} : vector<16x22xf32> to vector<16x16xf32>
    %366 = vector.broadcast %364 : f32 to vector<16x16xf32>
    %367 = arith.mulf %365, %366 : vector<16x16xf32>
    %368 = arith.addf %346, %367 : vector<16x16xf32>
    %c31 = arith.constant 31 : index
    %369 = memref.load %arg2[%c31] : memref<98xf32, #tpu.memory_space<smem>>
    %370 = vector.extract_strided_slice %353 {offsets = [0, 3], sizes = [16, 16], strides = [1, 1]} : vector<16x22xf32> to vector<16x16xf32>
    %371 = vector.broadcast %369 : f32 to vector<16x16xf32>
    %372 = arith.mulf %370, %371 : vector<16x16xf32>
    %373 = arith.addf %351, %372 : vector<16x16xf32>
    %c32_202 = arith.constant 32 : index
    %374 = memref.load %arg2[%c32_202] : memref<98xf32, #tpu.memory_space<smem>>
    %375 = vector.extract_strided_slice %353 {offsets = [0, 4], sizes = [16, 16], strides = [1, 1]} : vector<16x22xf32> to vector<16x16xf32>
    %376 = vector.broadcast %374 : f32 to vector<16x16xf32>
    %377 = arith.mulf %375, %376 : vector<16x16xf32>
    %378 = arith.addf %358, %377 : vector<16x16xf32>
    %c33 = arith.constant 33 : index
    %379 = memref.load %arg2[%c33] : memref<98xf32, #tpu.memory_space<smem>>
    %380 = vector.extract_strided_slice %353 {offsets = [0, 5], sizes = [16, 16], strides = [1, 1]} : vector<16x22xf32> to vector<16x16xf32>
    %381 = vector.broadcast %379 : f32 to vector<16x16xf32>
    %382 = arith.mulf %380, %381 : vector<16x16xf32>
    %383 = arith.addf %363, %382 : vector<16x16xf32>
    %c34 = arith.constant 34 : index
    %384 = memref.load %arg2[%c34] : memref<98xf32, #tpu.memory_space<smem>>
    %385 = vector.extract_strided_slice %353 {offsets = [0, 6], sizes = [16, 16], strides = [1, 1]} : vector<16x22xf32> to vector<16x16xf32>
    %386 = vector.broadcast %384 : f32 to vector<16x16xf32>
    %387 = arith.mulf %385, %386 : vector<16x16xf32>
    %388 = arith.addf %368, %387 : vector<16x16xf32>
    %c0_203 = arith.constant 0 : index
    %c5_204 = arith.constant 5 : index
    %c0_205 = arith.constant 0 : index
    %389 = vector.load %arg4[%c0_203, %c5_204, %c0_205] : memref<2x22x22xf32, #tpu.memory_space<vmem>>, vector<1x16x22xf32>
    %390 = vector.shape_cast %389 : vector<1x16x22xf32> to vector<16x22xf32>
    %c35 = arith.constant 35 : index
    %391 = memref.load %arg2[%c35] : memref<98xf32, #tpu.memory_space<smem>>
    %392 = vector.extract_strided_slice %390 {offsets = [0, 0], sizes = [16, 16], strides = [1, 1]} : vector<16x22xf32> to vector<16x16xf32>
    %393 = vector.broadcast %391 : f32 to vector<16x16xf32>
    %394 = arith.mulf %392, %393 : vector<16x16xf32>
    %395 = arith.addf %373, %394 : vector<16x16xf32>
    %c36 = arith.constant 36 : index
    %396 = memref.load %arg2[%c36] : memref<98xf32, #tpu.memory_space<smem>>
    %397 = vector.extract_strided_slice %390 {offsets = [0, 1], sizes = [16, 16], strides = [1, 1]} : vector<16x22xf32> to vector<16x16xf32>
    %398 = vector.broadcast %396 : f32 to vector<16x16xf32>
    %399 = arith.mulf %397, %398 : vector<16x16xf32>
    %400 = arith.addf %378, %399 : vector<16x16xf32>
    %c37 = arith.constant 37 : index
    %401 = memref.load %arg2[%c37] : memref<98xf32, #tpu.memory_space<smem>>
    %402 = vector.extract_strided_slice %390 {offsets = [0, 2], sizes = [16, 16], strides = [1, 1]} : vector<16x22xf32> to vector<16x16xf32>
    %403 = vector.broadcast %401 : f32 to vector<16x16xf32>
    %404 = arith.mulf %402, %403 : vector<16x16xf32>
    %405 = arith.addf %383, %404 : vector<16x16xf32>
    %c38 = arith.constant 38 : index
    %406 = memref.load %arg2[%c38] : memref<98xf32, #tpu.memory_space<smem>>
    %407 = vector.extract_strided_slice %390 {offsets = [0, 3], sizes = [16, 16], strides = [1, 1]} : vector<16x22xf32> to vector<16x16xf32>
    %408 = vector.broadcast %406 : f32 to vector<16x16xf32>
    %409 = arith.mulf %407, %408 : vector<16x16xf32>
    %410 = arith.addf %388, %409 : vector<16x16xf32>
    %c39 = arith.constant 39 : index
    %411 = memref.load %arg2[%c39] : memref<98xf32, #tpu.memory_space<smem>>
    %412 = vector.extract_strided_slice %390 {offsets = [0, 4], sizes = [16, 16], strides = [1, 1]} : vector<16x22xf32> to vector<16x16xf32>
    %413 = vector.broadcast %411 : f32 to vector<16x16xf32>
    %414 = arith.mulf %412, %413 : vector<16x16xf32>
    %415 = arith.addf %395, %414 : vector<16x16xf32>
    %c40 = arith.constant 40 : index
    %416 = memref.load %arg2[%c40] : memref<98xf32, #tpu.memory_space<smem>>
    %417 = vector.extract_strided_slice %390 {offsets = [0, 5], sizes = [16, 16], strides = [1, 1]} : vector<16x22xf32> to vector<16x16xf32>
    %418 = vector.broadcast %416 : f32 to vector<16x16xf32>
    %419 = arith.mulf %417, %418 : vector<16x16xf32>
    %420 = arith.addf %400, %419 : vector<16x16xf32>
    %c41 = arith.constant 41 : index
    %421 = memref.load %arg2[%c41] : memref<98xf32, #tpu.memory_space<smem>>
    %422 = vector.extract_strided_slice %390 {offsets = [0, 6], sizes = [16, 16], strides = [1, 1]} : vector<16x22xf32> to vector<16x16xf32>
    %423 = vector.broadcast %421 : f32 to vector<16x16xf32>
    %424 = arith.mulf %422, %423 : vector<16x16xf32>
    %425 = arith.addf %405, %424 : vector<16x16xf32>
    %c0_206 = arith.constant 0 : index
    %c6_207 = arith.constant 6 : index
    %c0_208 = arith.constant 0 : index
    %426 = vector.load %arg4[%c0_206, %c6_207, %c0_208] : memref<2x22x22xf32, #tpu.memory_space<vmem>>, vector<1x16x22xf32>
    %427 = vector.shape_cast %426 : vector<1x16x22xf32> to vector<16x22xf32>
    %c42 = arith.constant 42 : index
    %428 = memref.load %arg2[%c42] : memref<98xf32, #tpu.memory_space<smem>>
    %429 = vector.extract_strided_slice %427 {offsets = [0, 0], sizes = [16, 16], strides = [1, 1]} : vector<16x22xf32> to vector<16x16xf32>
    %430 = vector.broadcast %428 : f32 to vector<16x16xf32>
    %431 = arith.mulf %429, %430 : vector<16x16xf32>
    %432 = arith.addf %410, %431 : vector<16x16xf32>
    %c43 = arith.constant 43 : index
    %433 = memref.load %arg2[%c43] : memref<98xf32, #tpu.memory_space<smem>>
    %434 = vector.extract_strided_slice %427 {offsets = [0, 1], sizes = [16, 16], strides = [1, 1]} : vector<16x22xf32> to vector<16x16xf32>
    %435 = vector.broadcast %433 : f32 to vector<16x16xf32>
    %436 = arith.mulf %434, %435 : vector<16x16xf32>
    %437 = arith.addf %415, %436 : vector<16x16xf32>
    %c44 = arith.constant 44 : index
    %438 = memref.load %arg2[%c44] : memref<98xf32, #tpu.memory_space<smem>>
    %439 = vector.extract_strided_slice %427 {offsets = [0, 2], sizes = [16, 16], strides = [1, 1]} : vector<16x22xf32> to vector<16x16xf32>
    %440 = vector.broadcast %438 : f32 to vector<16x16xf32>
    %441 = arith.mulf %439, %440 : vector<16x16xf32>
    %442 = arith.addf %420, %441 : vector<16x16xf32>
    %c45 = arith.constant 45 : index
    %443 = memref.load %arg2[%c45] : memref<98xf32, #tpu.memory_space<smem>>
    %444 = vector.extract_strided_slice %427 {offsets = [0, 3], sizes = [16, 16], strides = [1, 1]} : vector<16x22xf32> to vector<16x16xf32>
    %445 = vector.broadcast %443 : f32 to vector<16x16xf32>
    %446 = arith.mulf %444, %445 : vector<16x16xf32>
    %447 = arith.addf %425, %446 : vector<16x16xf32>
    %c46 = arith.constant 46 : index
    %448 = memref.load %arg2[%c46] : memref<98xf32, #tpu.memory_space<smem>>
    %449 = vector.extract_strided_slice %427 {offsets = [0, 4], sizes = [16, 16], strides = [1, 1]} : vector<16x22xf32> to vector<16x16xf32>
    %450 = vector.broadcast %448 : f32 to vector<16x16xf32>
    %451 = arith.mulf %449, %450 : vector<16x16xf32>
    %452 = arith.addf %432, %451 : vector<16x16xf32>
    %c47 = arith.constant 47 : index
    %453 = memref.load %arg2[%c47] : memref<98xf32, #tpu.memory_space<smem>>
    %454 = vector.extract_strided_slice %427 {offsets = [0, 5], sizes = [16, 16], strides = [1, 1]} : vector<16x22xf32> to vector<16x16xf32>
    %455 = vector.broadcast %453 : f32 to vector<16x16xf32>
    %456 = arith.mulf %454, %455 : vector<16x16xf32>
    %457 = arith.addf %437, %456 : vector<16x16xf32>
    %c48_209 = arith.constant 48 : index
    %458 = memref.load %arg2[%c48_209] : memref<98xf32, #tpu.memory_space<smem>>
    %459 = vector.extract_strided_slice %427 {offsets = [0, 6], sizes = [16, 16], strides = [1, 1]} : vector<16x22xf32> to vector<16x16xf32>
    %460 = vector.broadcast %458 : f32 to vector<16x16xf32>
    %461 = arith.mulf %459, %460 : vector<16x16xf32>
    %462 = arith.addf %442, %461 : vector<16x16xf32>
    %c1_210 = arith.constant 1 : index
    %c0_211 = arith.constant 0 : index
    %c0_212 = arith.constant 0 : index
    %463 = vector.load %arg4[%c1_210, %c0_211, %c0_212] : memref<2x22x22xf32, #tpu.memory_space<vmem>>, vector<1x16x22xf32>
    %464 = vector.shape_cast %463 : vector<1x16x22xf32> to vector<16x22xf32>
    %c49 = arith.constant 49 : index
    %465 = memref.load %arg2[%c49] : memref<98xf32, #tpu.memory_space<smem>>
    %466 = vector.extract_strided_slice %464 {offsets = [0, 0], sizes = [16, 16], strides = [1, 1]} : vector<16x22xf32> to vector<16x16xf32>
    %467 = vector.broadcast %465 : f32 to vector<16x16xf32>
    %468 = arith.mulf %466, %467 : vector<16x16xf32>
    %469 = arith.addf %447, %468 : vector<16x16xf32>
    %c50 = arith.constant 50 : index
    %470 = memref.load %arg2[%c50] : memref<98xf32, #tpu.memory_space<smem>>
    %471 = vector.extract_strided_slice %464 {offsets = [0, 1], sizes = [16, 16], strides = [1, 1]} : vector<16x22xf32> to vector<16x16xf32>
    %472 = vector.broadcast %470 : f32 to vector<16x16xf32>
    %473 = arith.mulf %471, %472 : vector<16x16xf32>
    %474 = arith.addf %452, %473 : vector<16x16xf32>
    %c51 = arith.constant 51 : index
    %475 = memref.load %arg2[%c51] : memref<98xf32, #tpu.memory_space<smem>>
    %476 = vector.extract_strided_slice %464 {offsets = [0, 2], sizes = [16, 16], strides = [1, 1]} : vector<16x22xf32> to vector<16x16xf32>
    %477 = vector.broadcast %475 : f32 to vector<16x16xf32>
    %478 = arith.mulf %476, %477 : vector<16x16xf32>
    %479 = arith.addf %457, %478 : vector<16x16xf32>
    %c52 = arith.constant 52 : index
    %480 = memref.load %arg2[%c52] : memref<98xf32, #tpu.memory_space<smem>>
    %481 = vector.extract_strided_slice %464 {offsets = [0, 3], sizes = [16, 16], strides = [1, 1]} : vector<16x22xf32> to vector<16x16xf32>
    %482 = vector.broadcast %480 : f32 to vector<16x16xf32>
    %483 = arith.mulf %481, %482 : vector<16x16xf32>
    %484 = arith.addf %462, %483 : vector<16x16xf32>
    %c53 = arith.constant 53 : index
    %485 = memref.load %arg2[%c53] : memref<98xf32, #tpu.memory_space<smem>>
    %486 = vector.extract_strided_slice %464 {offsets = [0, 4], sizes = [16, 16], strides = [1, 1]} : vector<16x22xf32> to vector<16x16xf32>
    %487 = vector.broadcast %485 : f32 to vector<16x16xf32>
    %488 = arith.mulf %486, %487 : vector<16x16xf32>
    %489 = arith.addf %469, %488 : vector<16x16xf32>
    %c54 = arith.constant 54 : index
    %490 = memref.load %arg2[%c54] : memref<98xf32, #tpu.memory_space<smem>>
    %491 = vector.extract_strided_slice %464 {offsets = [0, 5], sizes = [16, 16], strides = [1, 1]} : vector<16x22xf32> to vector<16x16xf32>
    %492 = vector.broadcast %490 : f32 to vector<16x16xf32>
    %493 = arith.mulf %491, %492 : vector<16x16xf32>
    %494 = arith.addf %474, %493 : vector<16x16xf32>
    %c55 = arith.constant 55 : index
    %495 = memref.load %arg2[%c55] : memref<98xf32, #tpu.memory_space<smem>>
    %496 = vector.extract_strided_slice %464 {offsets = [0, 6], sizes = [16, 16], strides = [1, 1]} : vector<16x22xf32> to vector<16x16xf32>
    %497 = vector.broadcast %495 : f32 to vector<16x16xf32>
    %498 = arith.mulf %496, %497 : vector<16x16xf32>
    %499 = arith.addf %479, %498 : vector<16x16xf32>
    %c1_213 = arith.constant 1 : index
    %c1_214 = arith.constant 1 : index
    %c0_215 = arith.constant 0 : index
    %500 = vector.load %arg4[%c1_213, %c1_214, %c0_215] : memref<2x22x22xf32, #tpu.memory_space<vmem>>, vector<1x16x22xf32>
    %501 = vector.shape_cast %500 : vector<1x16x22xf32> to vector<16x22xf32>
    %c56 = arith.constant 56 : index
    %502 = memref.load %arg2[%c56] : memref<98xf32, #tpu.memory_space<smem>>
    %503 = vector.extract_strided_slice %501 {offsets = [0, 0], sizes = [16, 16], strides = [1, 1]} : vector<16x22xf32> to vector<16x16xf32>
    %504 = vector.broadcast %502 : f32 to vector<16x16xf32>
    %505 = arith.mulf %503, %504 : vector<16x16xf32>
    %506 = arith.addf %484, %505 : vector<16x16xf32>
    %c57 = arith.constant 57 : index
    %507 = memref.load %arg2[%c57] : memref<98xf32, #tpu.memory_space<smem>>
    %508 = vector.extract_strided_slice %501 {offsets = [0, 1], sizes = [16, 16], strides = [1, 1]} : vector<16x22xf32> to vector<16x16xf32>
    %509 = vector.broadcast %507 : f32 to vector<16x16xf32>
    %510 = arith.mulf %508, %509 : vector<16x16xf32>
    %511 = arith.addf %489, %510 : vector<16x16xf32>
    %c58 = arith.constant 58 : index
    %512 = memref.load %arg2[%c58] : memref<98xf32, #tpu.memory_space<smem>>
    %513 = vector.extract_strided_slice %501 {offsets = [0, 2], sizes = [16, 16], strides = [1, 1]} : vector<16x22xf32> to vector<16x16xf32>
    %514 = vector.broadcast %512 : f32 to vector<16x16xf32>
    %515 = arith.mulf %513, %514 : vector<16x16xf32>
    %516 = arith.addf %494, %515 : vector<16x16xf32>
    %c59 = arith.constant 59 : index
    %517 = memref.load %arg2[%c59] : memref<98xf32, #tpu.memory_space<smem>>
    %518 = vector.extract_strided_slice %501 {offsets = [0, 3], sizes = [16, 16], strides = [1, 1]} : vector<16x22xf32> to vector<16x16xf32>
    %519 = vector.broadcast %517 : f32 to vector<16x16xf32>
    %520 = arith.mulf %518, %519 : vector<16x16xf32>
    %521 = arith.addf %499, %520 : vector<16x16xf32>
    %c60 = arith.constant 60 : index
    %522 = memref.load %arg2[%c60] : memref<98xf32, #tpu.memory_space<smem>>
    %523 = vector.extract_strided_slice %501 {offsets = [0, 4], sizes = [16, 16], strides = [1, 1]} : vector<16x22xf32> to vector<16x16xf32>
    %524 = vector.broadcast %522 : f32 to vector<16x16xf32>
    %525 = arith.mulf %523, %524 : vector<16x16xf32>
    %526 = arith.addf %506, %525 : vector<16x16xf32>
    %c61 = arith.constant 61 : index
    %527 = memref.load %arg2[%c61] : memref<98xf32, #tpu.memory_space<smem>>
    %528 = vector.extract_strided_slice %501 {offsets = [0, 5], sizes = [16, 16], strides = [1, 1]} : vector<16x22xf32> to vector<16x16xf32>
    %529 = vector.broadcast %527 : f32 to vector<16x16xf32>
    %530 = arith.mulf %528, %529 : vector<16x16xf32>
    %531 = arith.addf %511, %530 : vector<16x16xf32>
    %c62 = arith.constant 62 : index
    %532 = memref.load %arg2[%c62] : memref<98xf32, #tpu.memory_space<smem>>
    %533 = vector.extract_strided_slice %501 {offsets = [0, 6], sizes = [16, 16], strides = [1, 1]} : vector<16x22xf32> to vector<16x16xf32>
    %534 = vector.broadcast %532 : f32 to vector<16x16xf32>
    %535 = arith.mulf %533, %534 : vector<16x16xf32>
    %536 = arith.addf %516, %535 : vector<16x16xf32>
    %c1_216 = arith.constant 1 : index
    %c2_217 = arith.constant 2 : index
    %c0_218 = arith.constant 0 : index
    %537 = vector.load %arg4[%c1_216, %c2_217, %c0_218] : memref<2x22x22xf32, #tpu.memory_space<vmem>>, vector<1x16x22xf32>
    %538 = vector.shape_cast %537 : vector<1x16x22xf32> to vector<16x22xf32>
    %c63 = arith.constant 63 : index
    %539 = memref.load %arg2[%c63] : memref<98xf32, #tpu.memory_space<smem>>
    %540 = vector.extract_strided_slice %538 {offsets = [0, 0], sizes = [16, 16], strides = [1, 1]} : vector<16x22xf32> to vector<16x16xf32>
    %541 = vector.broadcast %539 : f32 to vector<16x16xf32>
    %542 = arith.mulf %540, %541 : vector<16x16xf32>
    %543 = arith.addf %521, %542 : vector<16x16xf32>
    %c64_219 = arith.constant 64 : index
    %544 = memref.load %arg2[%c64_219] : memref<98xf32, #tpu.memory_space<smem>>
    %545 = vector.extract_strided_slice %538 {offsets = [0, 1], sizes = [16, 16], strides = [1, 1]} : vector<16x22xf32> to vector<16x16xf32>
    %546 = vector.broadcast %544 : f32 to vector<16x16xf32>
    %547 = arith.mulf %545, %546 : vector<16x16xf32>
    %548 = arith.addf %526, %547 : vector<16x16xf32>
    %c65 = arith.constant 65 : index
    %549 = memref.load %arg2[%c65] : memref<98xf32, #tpu.memory_space<smem>>
    %550 = vector.extract_strided_slice %538 {offsets = [0, 2], sizes = [16, 16], strides = [1, 1]} : vector<16x22xf32> to vector<16x16xf32>
    %551 = vector.broadcast %549 : f32 to vector<16x16xf32>
    %552 = arith.mulf %550, %551 : vector<16x16xf32>
    %553 = arith.addf %531, %552 : vector<16x16xf32>
    %c66 = arith.constant 66 : index
    %554 = memref.load %arg2[%c66] : memref<98xf32, #tpu.memory_space<smem>>
    %555 = vector.extract_strided_slice %538 {offsets = [0, 3], sizes = [16, 16], strides = [1, 1]} : vector<16x22xf32> to vector<16x16xf32>
    %556 = vector.broadcast %554 : f32 to vector<16x16xf32>
    %557 = arith.mulf %555, %556 : vector<16x16xf32>
    %558 = arith.addf %536, %557 : vector<16x16xf32>
    %c67 = arith.constant 67 : index
    %559 = memref.load %arg2[%c67] : memref<98xf32, #tpu.memory_space<smem>>
    %560 = vector.extract_strided_slice %538 {offsets = [0, 4], sizes = [16, 16], strides = [1, 1]} : vector<16x22xf32> to vector<16x16xf32>
    %561 = vector.broadcast %559 : f32 to vector<16x16xf32>
    %562 = arith.mulf %560, %561 : vector<16x16xf32>
    %563 = arith.addf %543, %562 : vector<16x16xf32>
    %c68 = arith.constant 68 : index
    %564 = memref.load %arg2[%c68] : memref<98xf32, #tpu.memory_space<smem>>
    %565 = vector.extract_strided_slice %538 {offsets = [0, 5], sizes = [16, 16], strides = [1, 1]} : vector<16x22xf32> to vector<16x16xf32>
    %566 = vector.broadcast %564 : f32 to vector<16x16xf32>
    %567 = arith.mulf %565, %566 : vector<16x16xf32>
    %568 = arith.addf %548, %567 : vector<16x16xf32>
    %c69 = arith.constant 69 : index
    %569 = memref.load %arg2[%c69] : memref<98xf32, #tpu.memory_space<smem>>
    %570 = vector.extract_strided_slice %538 {offsets = [0, 6], sizes = [16, 16], strides = [1, 1]} : vector<16x22xf32> to vector<16x16xf32>
    %571 = vector.broadcast %569 : f32 to vector<16x16xf32>
    %572 = arith.mulf %570, %571 : vector<16x16xf32>
    %573 = arith.addf %553, %572 : vector<16x16xf32>
    %c1_220 = arith.constant 1 : index
    %c3_221 = arith.constant 3 : index
    %c0_222 = arith.constant 0 : index
    %574 = vector.load %arg4[%c1_220, %c3_221, %c0_222] : memref<2x22x22xf32, #tpu.memory_space<vmem>>, vector<1x16x22xf32>
    %575 = vector.shape_cast %574 : vector<1x16x22xf32> to vector<16x22xf32>
    %c70 = arith.constant 70 : index
    %576 = memref.load %arg2[%c70] : memref<98xf32, #tpu.memory_space<smem>>
    %577 = vector.extract_strided_slice %575 {offsets = [0, 0], sizes = [16, 16], strides = [1, 1]} : vector<16x22xf32> to vector<16x16xf32>
    %578 = vector.broadcast %576 : f32 to vector<16x16xf32>
    %579 = arith.mulf %577, %578 : vector<16x16xf32>
    %580 = arith.addf %558, %579 : vector<16x16xf32>
    %c71 = arith.constant 71 : index
    %581 = memref.load %arg2[%c71] : memref<98xf32, #tpu.memory_space<smem>>
    %582 = vector.extract_strided_slice %575 {offsets = [0, 1], sizes = [16, 16], strides = [1, 1]} : vector<16x22xf32> to vector<16x16xf32>
    %583 = vector.broadcast %581 : f32 to vector<16x16xf32>
    %584 = arith.mulf %582, %583 : vector<16x16xf32>
    %585 = arith.addf %563, %584 : vector<16x16xf32>
    %c72 = arith.constant 72 : index
    %586 = memref.load %arg2[%c72] : memref<98xf32, #tpu.memory_space<smem>>
    %587 = vector.extract_strided_slice %575 {offsets = [0, 2], sizes = [16, 16], strides = [1, 1]} : vector<16x22xf32> to vector<16x16xf32>
    %588 = vector.broadcast %586 : f32 to vector<16x16xf32>
    %589 = arith.mulf %587, %588 : vector<16x16xf32>
    %590 = arith.addf %568, %589 : vector<16x16xf32>
    %c73 = arith.constant 73 : index
    %591 = memref.load %arg2[%c73] : memref<98xf32, #tpu.memory_space<smem>>
    %592 = vector.extract_strided_slice %575 {offsets = [0, 3], sizes = [16, 16], strides = [1, 1]} : vector<16x22xf32> to vector<16x16xf32>
    %593 = vector.broadcast %591 : f32 to vector<16x16xf32>
    %594 = arith.mulf %592, %593 : vector<16x16xf32>
    %595 = arith.addf %573, %594 : vector<16x16xf32>
    %c74 = arith.constant 74 : index
    %596 = memref.load %arg2[%c74] : memref<98xf32, #tpu.memory_space<smem>>
    %597 = vector.extract_strided_slice %575 {offsets = [0, 4], sizes = [16, 16], strides = [1, 1]} : vector<16x22xf32> to vector<16x16xf32>
    %598 = vector.broadcast %596 : f32 to vector<16x16xf32>
    %599 = arith.mulf %597, %598 : vector<16x16xf32>
    %600 = arith.addf %580, %599 : vector<16x16xf32>
    %c75 = arith.constant 75 : index
    %601 = memref.load %arg2[%c75] : memref<98xf32, #tpu.memory_space<smem>>
    %602 = vector.extract_strided_slice %575 {offsets = [0, 5], sizes = [16, 16], strides = [1, 1]} : vector<16x22xf32> to vector<16x16xf32>
    %603 = vector.broadcast %601 : f32 to vector<16x16xf32>
    %604 = arith.mulf %602, %603 : vector<16x16xf32>
    %605 = arith.addf %585, %604 : vector<16x16xf32>
    %c76 = arith.constant 76 : index
    %606 = memref.load %arg2[%c76] : memref<98xf32, #tpu.memory_space<smem>>
    %607 = vector.extract_strided_slice %575 {offsets = [0, 6], sizes = [16, 16], strides = [1, 1]} : vector<16x22xf32> to vector<16x16xf32>
    %608 = vector.broadcast %606 : f32 to vector<16x16xf32>
    %609 = arith.mulf %607, %608 : vector<16x16xf32>
    %610 = arith.addf %590, %609 : vector<16x16xf32>
    %c1_223 = arith.constant 1 : index
    %c4_224 = arith.constant 4 : index
    %c0_225 = arith.constant 0 : index
    %611 = vector.load %arg4[%c1_223, %c4_224, %c0_225] : memref<2x22x22xf32, #tpu.memory_space<vmem>>, vector<1x16x22xf32>
    %612 = vector.shape_cast %611 : vector<1x16x22xf32> to vector<16x22xf32>
    %c77 = arith.constant 77 : index
    %613 = memref.load %arg2[%c77] : memref<98xf32, #tpu.memory_space<smem>>
    %614 = vector.extract_strided_slice %612 {offsets = [0, 0], sizes = [16, 16], strides = [1, 1]} : vector<16x22xf32> to vector<16x16xf32>
    %615 = vector.broadcast %613 : f32 to vector<16x16xf32>
    %616 = arith.mulf %614, %615 : vector<16x16xf32>
    %617 = arith.addf %595, %616 : vector<16x16xf32>
    %c78 = arith.constant 78 : index
    %618 = memref.load %arg2[%c78] : memref<98xf32, #tpu.memory_space<smem>>
    %619 = vector.extract_strided_slice %612 {offsets = [0, 1], sizes = [16, 16], strides = [1, 1]} : vector<16x22xf32> to vector<16x16xf32>
    %620 = vector.broadcast %618 : f32 to vector<16x16xf32>
    %621 = arith.mulf %619, %620 : vector<16x16xf32>
    %622 = arith.addf %600, %621 : vector<16x16xf32>
    %c79 = arith.constant 79 : index
    %623 = memref.load %arg2[%c79] : memref<98xf32, #tpu.memory_space<smem>>
    %624 = vector.extract_strided_slice %612 {offsets = [0, 2], sizes = [16, 16], strides = [1, 1]} : vector<16x22xf32> to vector<16x16xf32>
    %625 = vector.broadcast %623 : f32 to vector<16x16xf32>
    %626 = arith.mulf %624, %625 : vector<16x16xf32>
    %627 = arith.addf %605, %626 : vector<16x16xf32>
    %c80_226 = arith.constant 80 : index
    %628 = memref.load %arg2[%c80_226] : memref<98xf32, #tpu.memory_space<smem>>
    %629 = vector.extract_strided_slice %612 {offsets = [0, 3], sizes = [16, 16], strides = [1, 1]} : vector<16x22xf32> to vector<16x16xf32>
    %630 = vector.broadcast %628 : f32 to vector<16x16xf32>
    %631 = arith.mulf %629, %630 : vector<16x16xf32>
    %632 = arith.addf %610, %631 : vector<16x16xf32>
    %c81 = arith.constant 81 : index
    %633 = memref.load %arg2[%c81] : memref<98xf32, #tpu.memory_space<smem>>
    %634 = vector.extract_strided_slice %612 {offsets = [0, 4], sizes = [16, 16], strides = [1, 1]} : vector<16x22xf32> to vector<16x16xf32>
    %635 = vector.broadcast %633 : f32 to vector<16x16xf32>
    %636 = arith.mulf %634, %635 : vector<16x16xf32>
    %637 = arith.addf %617, %636 : vector<16x16xf32>
    %c82 = arith.constant 82 : index
    %638 = memref.load %arg2[%c82] : memref<98xf32, #tpu.memory_space<smem>>
    %639 = vector.extract_strided_slice %612 {offsets = [0, 5], sizes = [16, 16], strides = [1, 1]} : vector<16x22xf32> to vector<16x16xf32>
    %640 = vector.broadcast %638 : f32 to vector<16x16xf32>
    %641 = arith.mulf %639, %640 : vector<16x16xf32>
    %642 = arith.addf %622, %641 : vector<16x16xf32>
    %c83 = arith.constant 83 : index
    %643 = memref.load %arg2[%c83] : memref<98xf32, #tpu.memory_space<smem>>
    %644 = vector.extract_strided_slice %612 {offsets = [0, 6], sizes = [16, 16], strides = [1, 1]} : vector<16x22xf32> to vector<16x16xf32>
    %645 = vector.broadcast %643 : f32 to vector<16x16xf32>
    %646 = arith.mulf %644, %645 : vector<16x16xf32>
    %647 = arith.addf %627, %646 : vector<16x16xf32>
    %c1_227 = arith.constant 1 : index
    %c5_228 = arith.constant 5 : index
    %c0_229 = arith.constant 0 : index
    %648 = vector.load %arg4[%c1_227, %c5_228, %c0_229] : memref<2x22x22xf32, #tpu.memory_space<vmem>>, vector<1x16x22xf32>
    %649 = vector.shape_cast %648 : vector<1x16x22xf32> to vector<16x22xf32>
    %c84 = arith.constant 84 : index
    %650 = memref.load %arg2[%c84] : memref<98xf32, #tpu.memory_space<smem>>
    %651 = vector.extract_strided_slice %649 {offsets = [0, 0], sizes = [16, 16], strides = [1, 1]} : vector<16x22xf32> to vector<16x16xf32>
    %652 = vector.broadcast %650 : f32 to vector<16x16xf32>
    %653 = arith.mulf %651, %652 : vector<16x16xf32>
    %654 = arith.addf %632, %653 : vector<16x16xf32>
    %c85 = arith.constant 85 : index
    %655 = memref.load %arg2[%c85] : memref<98xf32, #tpu.memory_space<smem>>
    %656 = vector.extract_strided_slice %649 {offsets = [0, 1], sizes = [16, 16], strides = [1, 1]} : vector<16x22xf32> to vector<16x16xf32>
    %657 = vector.broadcast %655 : f32 to vector<16x16xf32>
    %658 = arith.mulf %656, %657 : vector<16x16xf32>
    %659 = arith.addf %637, %658 : vector<16x16xf32>
    %c86 = arith.constant 86 : index
    %660 = memref.load %arg2[%c86] : memref<98xf32, #tpu.memory_space<smem>>
    %661 = vector.extract_strided_slice %649 {offsets = [0, 2], sizes = [16, 16], strides = [1, 1]} : vector<16x22xf32> to vector<16x16xf32>
    %662 = vector.broadcast %660 : f32 to vector<16x16xf32>
    %663 = arith.mulf %661, %662 : vector<16x16xf32>
    %664 = arith.addf %642, %663 : vector<16x16xf32>
    %c87 = arith.constant 87 : index
    %665 = memref.load %arg2[%c87] : memref<98xf32, #tpu.memory_space<smem>>
    %666 = vector.extract_strided_slice %649 {offsets = [0, 3], sizes = [16, 16], strides = [1, 1]} : vector<16x22xf32> to vector<16x16xf32>
    %667 = vector.broadcast %665 : f32 to vector<16x16xf32>
    %668 = arith.mulf %666, %667 : vector<16x16xf32>
    %669 = arith.addf %647, %668 : vector<16x16xf32>
    %c88 = arith.constant 88 : index
    %670 = memref.load %arg2[%c88] : memref<98xf32, #tpu.memory_space<smem>>
    %671 = vector.extract_strided_slice %649 {offsets = [0, 4], sizes = [16, 16], strides = [1, 1]} : vector<16x22xf32> to vector<16x16xf32>
    %672 = vector.broadcast %670 : f32 to vector<16x16xf32>
    %673 = arith.mulf %671, %672 : vector<16x16xf32>
    %674 = arith.addf %654, %673 : vector<16x16xf32>
    %c89 = arith.constant 89 : index
    %675 = memref.load %arg2[%c89] : memref<98xf32, #tpu.memory_space<smem>>
    %676 = vector.extract_strided_slice %649 {offsets = [0, 5], sizes = [16, 16], strides = [1, 1]} : vector<16x22xf32> to vector<16x16xf32>
    %677 = vector.broadcast %675 : f32 to vector<16x16xf32>
    %678 = arith.mulf %676, %677 : vector<16x16xf32>
    %679 = arith.addf %659, %678 : vector<16x16xf32>
    %c90 = arith.constant 90 : index
    %680 = memref.load %arg2[%c90] : memref<98xf32, #tpu.memory_space<smem>>
    %681 = vector.extract_strided_slice %649 {offsets = [0, 6], sizes = [16, 16], strides = [1, 1]} : vector<16x22xf32> to vector<16x16xf32>
    %682 = vector.broadcast %680 : f32 to vector<16x16xf32>
    %683 = arith.mulf %681, %682 : vector<16x16xf32>
    %684 = arith.addf %664, %683 : vector<16x16xf32>
    %c1_230 = arith.constant 1 : index
    %c6_231 = arith.constant 6 : index
    %c0_232 = arith.constant 0 : index
    %685 = vector.load %arg4[%c1_230, %c6_231, %c0_232] : memref<2x22x22xf32, #tpu.memory_space<vmem>>, vector<1x16x22xf32>
    %686 = vector.shape_cast %685 : vector<1x16x22xf32> to vector<16x22xf32>
    %c91 = arith.constant 91 : index
    %687 = memref.load %arg2[%c91] : memref<98xf32, #tpu.memory_space<smem>>
    %688 = vector.extract_strided_slice %686 {offsets = [0, 0], sizes = [16, 16], strides = [1, 1]} : vector<16x22xf32> to vector<16x16xf32>
    %689 = vector.broadcast %687 : f32 to vector<16x16xf32>
    %690 = arith.mulf %688, %689 : vector<16x16xf32>
    %691 = arith.addf %669, %690 : vector<16x16xf32>
    %c92 = arith.constant 92 : index
    %692 = memref.load %arg2[%c92] : memref<98xf32, #tpu.memory_space<smem>>
    %693 = vector.extract_strided_slice %686 {offsets = [0, 1], sizes = [16, 16], strides = [1, 1]} : vector<16x22xf32> to vector<16x16xf32>
    %694 = vector.broadcast %692 : f32 to vector<16x16xf32>
    %695 = arith.mulf %693, %694 : vector<16x16xf32>
    %696 = arith.addf %674, %695 : vector<16x16xf32>
    %c93 = arith.constant 93 : index
    %697 = memref.load %arg2[%c93] : memref<98xf32, #tpu.memory_space<smem>>
    %698 = vector.extract_strided_slice %686 {offsets = [0, 2], sizes = [16, 16], strides = [1, 1]} : vector<16x22xf32> to vector<16x16xf32>
    %699 = vector.broadcast %697 : f32 to vector<16x16xf32>
    %700 = arith.mulf %698, %699 : vector<16x16xf32>
    %701 = arith.addf %679, %700 : vector<16x16xf32>
    %c94 = arith.constant 94 : index
    %702 = memref.load %arg2[%c94] : memref<98xf32, #tpu.memory_space<smem>>
    %703 = vector.extract_strided_slice %686 {offsets = [0, 3], sizes = [16, 16], strides = [1, 1]} : vector<16x22xf32> to vector<16x16xf32>
    %704 = vector.broadcast %702 : f32 to vector<16x16xf32>
    %705 = arith.mulf %703, %704 : vector<16x16xf32>
    %706 = arith.addf %684, %705 : vector<16x16xf32>
    %c95 = arith.constant 95 : index
    %707 = memref.load %arg2[%c95] : memref<98xf32, #tpu.memory_space<smem>>
    %708 = vector.extract_strided_slice %686 {offsets = [0, 4], sizes = [16, 16], strides = [1, 1]} : vector<16x22xf32> to vector<16x16xf32>
    %709 = vector.broadcast %707 : f32 to vector<16x16xf32>
    %710 = arith.mulf %708, %709 : vector<16x16xf32>
    %711 = arith.addf %691, %710 : vector<16x16xf32>
    %c96_233 = arith.constant 96 : index
    %712 = memref.load %arg2[%c96_233] : memref<98xf32, #tpu.memory_space<smem>>
    %713 = vector.extract_strided_slice %686 {offsets = [0, 5], sizes = [16, 16], strides = [1, 1]} : vector<16x22xf32> to vector<16x16xf32>
    %714 = vector.broadcast %712 : f32 to vector<16x16xf32>
    %715 = arith.mulf %713, %714 : vector<16x16xf32>
    %716 = arith.addf %696, %715 : vector<16x16xf32>
    %c97 = arith.constant 97 : index
    %717 = memref.load %arg2[%c97] : memref<98xf32, #tpu.memory_space<smem>>
    %718 = vector.extract_strided_slice %686 {offsets = [0, 6], sizes = [16, 16], strides = [1, 1]} : vector<16x22xf32> to vector<16x16xf32>
    %719 = vector.broadcast %717 : f32 to vector<16x16xf32>
    %720 = arith.mulf %718, %719 : vector<16x16xf32>
    %721 = arith.addf %701, %720 : vector<16x16xf32>
    %722 = arith.addf %716, %721 : vector<16x16xf32>
    %723 = arith.addf %706, %711 : vector<16x16xf32>
    %724 = arith.addf %722, %723 : vector<16x16xf32>
    %725 = arith.negf %724 : vector<16x16xf32>
    %726 = math.exp %725 : vector<16x16xf32>
    %cst_234 = arith.constant 1.000000e+00 : f32
    %727 = vector.broadcast %cst_234 : f32 to vector<16x16xf32>
    %728 = arith.addf %727, %726 : vector<16x16xf32>
    %729 = arith.divf %727, %728 : vector<16x16xf32>
    %c0_235 = arith.constant 0 : index
    %c3_236 = arith.constant 3 : index
    %c3_237 = arith.constant 3 : index
    %730 = vector.load %arg4[%c0_235, %c3_236, %c3_237] : memref<2x22x22xf32, #tpu.memory_space<vmem>>, vector<1x16x16xf32>
    %731 = vector.shape_cast %730 : vector<1x16x16xf32> to vector<16x16xf32>
    %732 = vector.shape_cast %729 : vector<16x16xf32> to vector<1x16x16xf32>
    tpu.vector_store %arg4[%c0_235, %c3_236, %c3_237], %732 {strides = array<i32>} : memref<2x22x22xf32, #tpu.memory_space<vmem>>, vector<1x16x16xf32>,
    %c0_238 = arith.constant 0 : index
    %c3_239 = arith.constant 3 : index
    %c3_240 = arith.constant 3 : index
    %733 = vector.load %arg4[%c0_238, %c3_239, %c3_240] : memref<2x22x22xf32, #tpu.memory_space<vmem>>, vector<1x1x16xf32>
    %734 = vector.shape_cast %733 : vector<1x1x16xf32> to vector<16xf32>
    %c0_241 = arith.constant 0 : index
    %c0_242 = arith.constant 0 : index
    %735 = vector.load %arg5[%c0_241, %c0_242] : memref<2x256xf32, #tpu.memory_space<vmem>>, vector<1x16xf32>
    %736 = vector.shape_cast %735 : vector<1x16xf32> to vector<16xf32>
    %737 = vector.shape_cast %734 : vector<16xf32> to vector<1x16xf32>
    tpu.vector_store %arg5[%c0_241, %c0_242], %737 {strides = array<i32>} : memref<2x256xf32, #tpu.memory_space<vmem>>, vector<1x16xf32>,
    %c0_243 = arith.constant 0 : index
    %c4_244 = arith.constant 4 : index
    %c3_245 = arith.constant 3 : index
    %738 = vector.load %arg4[%c0_243, %c4_244, %c3_245] : memref<2x22x22xf32, #tpu.memory_space<vmem>>, vector<1x1x16xf32>
    %739 = vector.shape_cast %738 : vector<1x1x16xf32> to vector<16xf32>
    %c0_246 = arith.constant 0 : index
    %c16_247 = arith.constant 16 : index
    %740 = vector.load %arg5[%c0_246, %c16_247] : memref<2x256xf32, #tpu.memory_space<vmem>>, vector<1x16xf32>
    %741 = vector.shape_cast %740 : vector<1x16xf32> to vector<16xf32>
    %742 = vector.shape_cast %739 : vector<16xf32> to vector<1x16xf32>
    tpu.vector_store %arg5[%c0_246, %c16_247], %742 {strides = array<i32>} : memref<2x256xf32, #tpu.memory_space<vmem>>, vector<1x16xf32>,
    %c0_248 = arith.constant 0 : index
    %c5_249 = arith.constant 5 : index
    %c3_250 = arith.constant 3 : index
    %743 = vector.load %arg4[%c0_248, %c5_249, %c3_250] : memref<2x22x22xf32, #tpu.memory_space<vmem>>, vector<1x1x16xf32>
    %744 = vector.shape_cast %743 : vector<1x1x16xf32> to vector<16xf32>
    %c0_251 = arith.constant 0 : index
    %c32_252 = arith.constant 32 : index
    %745 = vector.load %arg5[%c0_251, %c32_252] : memref<2x256xf32, #tpu.memory_space<vmem>>, vector<1x16xf32>
    %746 = vector.shape_cast %745 : vector<1x16xf32> to vector<16xf32>
    %747 = vector.shape_cast %744 : vector<16xf32> to vector<1x16xf32>
    tpu.vector_store %arg5[%c0_251, %c32_252], %747 {strides = array<i32>} : memref<2x256xf32, #tpu.memory_space<vmem>>, vector<1x16xf32>,
    %c0_253 = arith.constant 0 : index
    %c6_254 = arith.constant 6 : index
    %c3_255 = arith.constant 3 : index
    %748 = vector.load %arg4[%c0_253, %c6_254, %c3_255] : memref<2x22x22xf32, #tpu.memory_space<vmem>>, vector<1x1x16xf32>
    %749 = vector.shape_cast %748 : vector<1x1x16xf32> to vector<16xf32>
    %c0_256 = arith.constant 0 : index
    %c48_257 = arith.constant 48 : index
    %750 = vector.load %arg5[%c0_256, %c48_257] : memref<2x256xf32, #tpu.memory_space<vmem>>, vector<1x16xf32>
    %751 = vector.shape_cast %750 : vector<1x16xf32> to vector<16xf32>
    %752 = vector.shape_cast %749 : vector<16xf32> to vector<1x16xf32>
    tpu.vector_store %arg5[%c0_256, %c48_257], %752 {strides = array<i32>} : memref<2x256xf32, #tpu.memory_space<vmem>>, vector<1x16xf32>,
    %c0_258 = arith.constant 0 : index
    %c7_259 = arith.constant 7 : index
    %c3_260 = arith.constant 3 : index
    %753 = vector.load %arg4[%c0_258, %c7_259, %c3_260] : memref<2x22x22xf32, #tpu.memory_space<vmem>>, vector<1x1x16xf32>
    %754 = vector.shape_cast %753 : vector<1x1x16xf32> to vector<16xf32>
    %c0_261 = arith.constant 0 : index
    %c64_262 = arith.constant 64 : index
    %755 = vector.load %arg5[%c0_261, %c64_262] : memref<2x256xf32, #tpu.memory_space<vmem>>, vector<1x16xf32>
    %756 = vector.shape_cast %755 : vector<1x16xf32> to vector<16xf32>
    %757 = vector.shape_cast %754 : vector<16xf32> to vector<1x16xf32>
    tpu.vector_store %arg5[%c0_261, %c64_262], %757 {strides = array<i32>} : memref<2x256xf32, #tpu.memory_space<vmem>>, vector<1x16xf32>,
    %c0_263 = arith.constant 0 : index
    %c8_264 = arith.constant 8 : index
    %c3_265 = arith.constant 3 : index
    %758 = vector.load %arg4[%c0_263, %c8_264, %c3_265] : memref<2x22x22xf32, #tpu.memory_space<vmem>>, vector<1x1x16xf32>
    %759 = vector.shape_cast %758 : vector<1x1x16xf32> to vector<16xf32>
    %c0_266 = arith.constant 0 : index
    %c80_267 = arith.constant 80 : index
    %760 = vector.load %arg5[%c0_266, %c80_267] : memref<2x256xf32, #tpu.memory_space<vmem>>, vector<1x16xf32>
    %761 = vector.shape_cast %760 : vector<1x16xf32> to vector<16xf32>
    %762 = vector.shape_cast %759 : vector<16xf32> to vector<1x16xf32>
    tpu.vector_store %arg5[%c0_266, %c80_267], %762 {strides = array<i32>} : memref<2x256xf32, #tpu.memory_space<vmem>>, vector<1x16xf32>,
    %c0_268 = arith.constant 0 : index
    %c9_269 = arith.constant 9 : index
    %c3_270 = arith.constant 3 : index
    %763 = vector.load %arg4[%c0_268, %c9_269, %c3_270] : memref<2x22x22xf32, #tpu.memory_space<vmem>>, vector<1x1x16xf32>
    %764 = vector.shape_cast %763 : vector<1x1x16xf32> to vector<16xf32>
    %c0_271 = arith.constant 0 : index
    %c96_272 = arith.constant 96 : index
    %765 = vector.load %arg5[%c0_271, %c96_272] : memref<2x256xf32, #tpu.memory_space<vmem>>, vector<1x16xf32>
    %766 = vector.shape_cast %765 : vector<1x16xf32> to vector<16xf32>
    %767 = vector.shape_cast %764 : vector<16xf32> to vector<1x16xf32>
    tpu.vector_store %arg5[%c0_271, %c96_272], %767 {strides = array<i32>} : memref<2x256xf32, #tpu.memory_space<vmem>>, vector<1x16xf32>,
    %c0_273 = arith.constant 0 : index
    %c10_274 = arith.constant 10 : index
    %c3_275 = arith.constant 3 : index
    %768 = vector.load %arg4[%c0_273, %c10_274, %c3_275] : memref<2x22x22xf32, #tpu.memory_space<vmem>>, vector<1x1x16xf32>
    %769 = vector.shape_cast %768 : vector<1x1x16xf32> to vector<16xf32>
    %c0_276 = arith.constant 0 : index
    %c112_277 = arith.constant 112 : index
    %770 = vector.load %arg5[%c0_276, %c112_277] : memref<2x256xf32, #tpu.memory_space<vmem>>, vector<1x16xf32>
    %771 = vector.shape_cast %770 : vector<1x16xf32> to vector<16xf32>
    %772 = vector.shape_cast %769 : vector<16xf32> to vector<1x16xf32>
    tpu.vector_store %arg5[%c0_276, %c112_277], %772 {strides = array<i32>} : memref<2x256xf32, #tpu.memory_space<vmem>>, vector<1x16xf32>,
    %c0_278 = arith.constant 0 : index
    %c11_279 = arith.constant 11 : index
    %c3_280 = arith.constant 3 : index
    %773 = vector.load %arg4[%c0_278, %c11_279, %c3_280] : memref<2x22x22xf32, #tpu.memory_space<vmem>>, vector<1x1x16xf32>
    %774 = vector.shape_cast %773 : vector<1x1x16xf32> to vector<16xf32>
    %c0_281 = arith.constant 0 : index
    %c128_282 = arith.constant 128 : index
    %775 = vector.load %arg5[%c0_281, %c128_282] : memref<2x256xf32, #tpu.memory_space<vmem>>, vector<1x16xf32>
    %776 = vector.shape_cast %775 : vector<1x16xf32> to vector<16xf32>
    %777 = vector.shape_cast %774 : vector<16xf32> to vector<1x16xf32>
    tpu.vector_store %arg5[%c0_281, %c128_282], %777 {strides = array<i32>} : memref<2x256xf32, #tpu.memory_space<vmem>>, vector<1x16xf32>,
    %c0_283 = arith.constant 0 : index
    %c12_284 = arith.constant 12 : index
    %c3_285 = arith.constant 3 : index
    %778 = vector.load %arg4[%c0_283, %c12_284, %c3_285] : memref<2x22x22xf32, #tpu.memory_space<vmem>>, vector<1x1x16xf32>
    %779 = vector.shape_cast %778 : vector<1x1x16xf32> to vector<16xf32>
    %c0_286 = arith.constant 0 : index
    %c144_287 = arith.constant 144 : index
    %780 = vector.load %arg5[%c0_286, %c144_287] : memref<2x256xf32, #tpu.memory_space<vmem>>, vector<1x16xf32>
    %781 = vector.shape_cast %780 : vector<1x16xf32> to vector<16xf32>
    %782 = vector.shape_cast %779 : vector<16xf32> to vector<1x16xf32>
    tpu.vector_store %arg5[%c0_286, %c144_287], %782 {strides = array<i32>} : memref<2x256xf32, #tpu.memory_space<vmem>>, vector<1x16xf32>,
    %c0_288 = arith.constant 0 : index
    %c13_289 = arith.constant 13 : index
    %c3_290 = arith.constant 3 : index
    %783 = vector.load %arg4[%c0_288, %c13_289, %c3_290] : memref<2x22x22xf32, #tpu.memory_space<vmem>>, vector<1x1x16xf32>
    %784 = vector.shape_cast %783 : vector<1x1x16xf32> to vector<16xf32>
    %c0_291 = arith.constant 0 : index
    %c160_292 = arith.constant 160 : index
    %785 = vector.load %arg5[%c0_291, %c160_292] : memref<2x256xf32, #tpu.memory_space<vmem>>, vector<1x16xf32>
    %786 = vector.shape_cast %785 : vector<1x16xf32> to vector<16xf32>
    %787 = vector.shape_cast %784 : vector<16xf32> to vector<1x16xf32>
    tpu.vector_store %arg5[%c0_291, %c160_292], %787 {strides = array<i32>} : memref<2x256xf32, #tpu.memory_space<vmem>>, vector<1x16xf32>,
    %c0_293 = arith.constant 0 : index
    %c14_294 = arith.constant 14 : index
    %c3_295 = arith.constant 3 : index
    %788 = vector.load %arg4[%c0_293, %c14_294, %c3_295] : memref<2x22x22xf32, #tpu.memory_space<vmem>>, vector<1x1x16xf32>
    %789 = vector.shape_cast %788 : vector<1x1x16xf32> to vector<16xf32>
    %c0_296 = arith.constant 0 : index
    %c176_297 = arith.constant 176 : index
    %790 = vector.load %arg5[%c0_296, %c176_297] : memref<2x256xf32, #tpu.memory_space<vmem>>, vector<1x16xf32>
    %791 = vector.shape_cast %790 : vector<1x16xf32> to vector<16xf32>
    %792 = vector.shape_cast %789 : vector<16xf32> to vector<1x16xf32>
    tpu.vector_store %arg5[%c0_296, %c176_297], %792 {strides = array<i32>} : memref<2x256xf32, #tpu.memory_space<vmem>>, vector<1x16xf32>,
    %c0_298 = arith.constant 0 : index
    %c15_299 = arith.constant 15 : index
    %c3_300 = arith.constant 3 : index
    %793 = vector.load %arg4[%c0_298, %c15_299, %c3_300] : memref<2x22x22xf32, #tpu.memory_space<vmem>>, vector<1x1x16xf32>
    %794 = vector.shape_cast %793 : vector<1x1x16xf32> to vector<16xf32>
    %c0_301 = arith.constant 0 : index
    %c192_302 = arith.constant 192 : index
    %795 = vector.load %arg5[%c0_301, %c192_302] : memref<2x256xf32, #tpu.memory_space<vmem>>, vector<1x16xf32>
    %796 = vector.shape_cast %795 : vector<1x16xf32> to vector<16xf32>
    %797 = vector.shape_cast %794 : vector<16xf32> to vector<1x16xf32>
    tpu.vector_store %arg5[%c0_301, %c192_302], %797 {strides = array<i32>} : memref<2x256xf32, #tpu.memory_space<vmem>>, vector<1x16xf32>,
    %c0_303 = arith.constant 0 : index
    %c16_304 = arith.constant 16 : index
    %c3_305 = arith.constant 3 : index
    %798 = vector.load %arg4[%c0_303, %c16_304, %c3_305] : memref<2x22x22xf32, #tpu.memory_space<vmem>>, vector<1x1x16xf32>
    %799 = vector.shape_cast %798 : vector<1x1x16xf32> to vector<16xf32>
    %c0_306 = arith.constant 0 : index
    %c208_307 = arith.constant 208 : index
    %800 = vector.load %arg5[%c0_306, %c208_307] : memref<2x256xf32, #tpu.memory_space<vmem>>, vector<1x16xf32>
    %801 = vector.shape_cast %800 : vector<1x16xf32> to vector<16xf32>
    %802 = vector.shape_cast %799 : vector<16xf32> to vector<1x16xf32>
    tpu.vector_store %arg5[%c0_306, %c208_307], %802 {strides = array<i32>} : memref<2x256xf32, #tpu.memory_space<vmem>>, vector<1x16xf32>,
    %c0_308 = arith.constant 0 : index
    %c17_309 = arith.constant 17 : index
    %c3_310 = arith.constant 3 : index
    %803 = vector.load %arg4[%c0_308, %c17_309, %c3_310] : memref<2x22x22xf32, #tpu.memory_space<vmem>>, vector<1x1x16xf32>
    %804 = vector.shape_cast %803 : vector<1x1x16xf32> to vector<16xf32>
    %c0_311 = arith.constant 0 : index
    %c224_312 = arith.constant 224 : index
    %805 = vector.load %arg5[%c0_311, %c224_312] : memref<2x256xf32, #tpu.memory_space<vmem>>, vector<1x16xf32>
    %806 = vector.shape_cast %805 : vector<1x16xf32> to vector<16xf32>
    %807 = vector.shape_cast %804 : vector<16xf32> to vector<1x16xf32>
    tpu.vector_store %arg5[%c0_311, %c224_312], %807 {strides = array<i32>} : memref<2x256xf32, #tpu.memory_space<vmem>>, vector<1x16xf32>,
    %c0_313 = arith.constant 0 : index
    %c18_314 = arith.constant 18 : index
    %c3_315 = arith.constant 3 : index
    %808 = vector.load %arg4[%c0_313, %c18_314, %c3_315] : memref<2x22x22xf32, #tpu.memory_space<vmem>>, vector<1x1x16xf32>
    %809 = vector.shape_cast %808 : vector<1x1x16xf32> to vector<16xf32>
    %c0_316 = arith.constant 0 : index
    %c240_317 = arith.constant 240 : index
    %810 = vector.load %arg5[%c0_316, %c240_317] : memref<2x256xf32, #tpu.memory_space<vmem>>, vector<1x16xf32>
    %811 = vector.shape_cast %810 : vector<1x16xf32> to vector<16xf32>
    %812 = vector.shape_cast %809 : vector<16xf32> to vector<1x16xf32>
    tpu.vector_store %arg5[%c0_316, %c240_317], %812 {strides = array<i32>} : memref<2x256xf32, #tpu.memory_space<vmem>>, vector<1x16xf32>,
    %c0_318 = arith.constant 0 : index
    %c0_319 = arith.constant 0 : index
    %813 = vector.load %arg5[%c0_318, %c0_319] : memref<2x256xf32, #tpu.memory_space<vmem>>, vector<1x256xf32>
    %c0_320 = arith.constant 0 : index
    %c0_321 = arith.constant 0 : index
    %c0_322 = arith.constant 0 : index
    %814 = vector.load %arg1[%c0_320, %c0_321, %c0_322] : memref<1x4x256xf32, #tpu.memory_space<vmem>>, vector<1x4x256xf32>
    %815 = vector.shape_cast %814 : vector<1x4x256xf32> to vector<4x256xf32>
    %816 = vector.broadcast %813 : vector<1x256xf32> to vector<4x256xf32>
    %817 = arith.mulf %815, %816 : vector<4x256xf32>
    %c0_323 = arith.constant 0 : index
    %c0_324 = arith.constant 0 : index
    %c0_325 = arith.constant 0 : index
    %818 = vector.load %arg3[%c0_323, %c0_324, %c0_325] : memref<1x4x256xf32, #tpu.memory_space<vmem>>, vector<1x4x256xf32>
    %819 = vector.shape_cast %818 : vector<1x4x256xf32> to vector<4x256xf32>
    %820 = vector.shape_cast %817 : vector<4x256xf32> to vector<1x4x256xf32>
    tpu.vector_store %arg3[%c0_323, %c0_324, %c0_325], %820 {strides = array<i32>} : memref<1x4x256xf32, #tpu.memory_space<vmem>>, vector<1x4x256xf32>,
    return
  }
  func.func @transform_0(%arg0: i32) -> (i32, i32, i32) {
    %c0_i32 = arith.constant 0 : i32
    %c0_i32_0 = arith.constant 0 : i32
    %c0_i32_1 = arith.constant 0 : i32
    return %arg0, %c0_i32, %c0_i32_0 : i32, i32, i32
  }
  func.func @transform_1(%arg0: i32) -> i32 {
    %c0_i32 = arith.constant 0 : i32
    %c0_i32_0 = arith.constant 0 : i32
    return %c0_i32 : i32
  }
  func.func @transform_2(%arg0: i32) -> (i32, i32, i32) {
    %c0_i32 = arith.constant 0 : i32
    %c0_i32_0 = arith.constant 0 : i32
    %c0_i32_1 = arith.constant 0 : i32
    return %arg0, %c0_i32, %c0_i32_0 : i32, i32, i32
  }
}

</mosaic_0001>

<bundles_post_ra>
// kernel: squeeze.1
= control target key start
LH: loop header
LB: loop body
LE: loop exit
PB: predicated region body
PF: predicated region fallthrough
CT: control target
= control target key end

     0   :  { %s115_s10 = smov 91   ;;  %s116_s11 = smov 77   ;;  %vm3_vm0 = vcmask 56320   ;;  %vm9_vm1 = vcmask 802520   ;;  %vm15_vm2 = vcmask 745120   ;;  %vm21_vm3 = vcmask 687720   ;;  %s183_s0 = inlined_call_operand.vmem [shape: f32[1,2,7,7], index: 0, kind: input, shape index: {}]   ;;  %s184_s1 = inlined_call_operand.vmem [shape: f32[98], index: 1, kind: output, shape index: {}]  }
   0x1   :  { %v89_v0 = vld [vmem:[%s183_s0 + $0xe] sm:$0x1]   ;;  %v91_v1 = vld [vmem:[%s183_s0 + $0xc] sm:$0x1]   ;;  %v90_v2 = vld [vmem:[%s183_s0 + $0xd] sm:$0x1]  }
   0x2   :  { %7 = vrot.lane.b32.xlu0 %v89_v0, %s115_s10  ;;  %19 = vrot.lane.b32.xlu1 %v91_v1, %s116_s11  ;;  %v92_v3 = vld [vmem:[%s183_s0 + $0xb] sm:$0x1]   ;;  %s117_s16 = smov 84   ;;  %s118_s17 = smov 70   ;;  %v93_v4 = vld [vmem:[%s183_s0 + $0xa] sm:$0x1]  }
   0x3   :  { %v94_v5 = vld [vmem:[%s183_s0 + $0x9] sm:$0x1]   ;;  %v2_v6 = vld [vmem:[%s183_s0] sm:$0x1]   ;;  %s119_s24 = smov 63   ;;  %s120_s25 = smov 56  }
   0x4   :  { %4 = vst.msk [vmem:[#allocation0] sm:$0x1] %vm3_vm0, %v2_v6   ;;  %v95_v7 = vld [vmem:[%s183_s0 + $0x8] sm:$0x1]   ;;  %v96_v8 = vld [vmem:[%s183_s0 + $0x6] sm:$0x1]  }
   0x5   :  { %s121_s30 = smov 49   ;;  %s122_s2 = smov 42   ;;  %v97_v9 = vld [vmem:[%s183_s0 + $0x5] sm:$0x1]   ;;  %v98_v10 = vld [vmem:[%s183_s0 + $0x4] sm:$0x1]  }
   0x6   :  { %13 = vrot.lane.b32.xlu0 %v90_v2, %s117_s16  ;;  %25 = vrot.lane.b32.xlu1 %v92_v3, %s118_s17  ;;  %s123_s7 = smov 35   ;;  %s124_s8 = smov 28   ;;  %v99_v11 = vld [vmem:[%s183_s0 + $0x3] sm:$0x1]   ;;  %v100_v12 = vld [vmem:[%s183_s0 + $0x2] sm:$0x1]  }
   0x7   :  { %s125_s13 = smov 21   ;;  %s126_s14 = smov 14   ;;  %v101_v13 = vld [vmem:[%s183_s0 + $0x1] sm:$0x1]   ;;  %vm27_vm4 = vcmask 630320   ;;  %vm33_vm5 = vcmask 572920  }
   0x8   :  { %s127_s0 = smov 7   ;;  %vm39_vm6 = vcmask 515520   ;;  %vm45_vm7 = vcmask 458120   ;;  %vm51_vm8 = vcmask 400720   ;;  %vm57_vm9 = vcmask 343320  }
   0x9   :  { %vm63_vm10 = vcmask 285920   ;;  %vm69_vm11 = vcmask 228520   ;;  %vm75_vm12 = vcmask 171120   ;;  %vm81_vm13 = vcmask 113720  }
   0xa   :  { %31 = vrot.lane.b32.xlu0 %v93_v4, %s119_s24  ;;  %37 = vrot.lane.b32.xlu1 %v94_v5, %s120_s25 }
   0xe   :  { %43 = vrot.lane.b32.xlu0 %v95_v7, %s121_s30  ;;  %49 = vrot.lane.b32.xlu1 %v96_v8, %s122_s2 }
  0x12   :  { %55 = vrot.lane.b32.xlu0 %v97_v9, %s123_s7  ;;  %61 = vrot.lane.b32.xlu1 %v98_v10, %s124_s8 }
  0x16   :  { %67 = vrot.lane.b32.xlu0 %v99_v11, %s125_s13  ;;  %73 = vrot.lane.b32.xlu1 %v100_v12, %s126_s14 }
  0x1a   :  { %79 = vrot.lane.b32.xlu0 %v101_v13, %s127_s0 }
  0x74   :  { %v8_v14 = vpop.permute.xlu0 %7   ;;  %v20_v15 = vpop.permute.xlu1 %19  }
  0x75   :  { %10 = vst.msk [vmem:[#allocation0] sm:$0x1] %vm9_vm1, %v8_v14  }
  0x78   :  { %v14_v16 = vpop.permute.xlu0 %13   ;;  %v26_v17 = vpop.permute.xlu1 %25  }
  0x79   :  { %16 = vst.msk [vmem:[#allocation0] sm:$0x1] %vm15_vm2, %v14_v16  }
  0x7a   :  { %22 = vst.msk [vmem:[#allocation0] sm:$0x1] %vm21_vm3, %v20_v15  }
  0x7b   :  { %28 = vst.msk [vmem:[#allocation0] sm:$0x1] %vm27_vm4, %v26_v17  }
  0x7c   :  { %v32_v18 = vpop.permute.xlu0 %31   ;;  %v38_v19 = vpop.permute.xlu1 %37  }
  0x7d   :  { %34 = vst.msk [vmem:[#allocation0] sm:$0x1] %vm33_vm5, %v32_v18  }
  0x7e   :  { %40 = vst.msk [vmem:[#allocation0] sm:$0x1] %vm39_vm6, %v38_v19  }
  0x80   :  { %v44_v20 = vpop.permute.xlu0 %43   ;;  %v50_v21 = vpop.permute.xlu1 %49  }
  0x81   :  { %46 = vst.msk [vmem:[#allocation0] sm:$0x1] %vm45_vm7, %v44_v20  }
  0x82   :  { %52 = vst.msk [vmem:[#allocation0] sm:$0x1] %vm51_vm8, %v50_v21  }
  0x84   :  { %v56_v22 = vpop.permute.xlu0 %55   ;;  %v62_v23 = vpop.permute.xlu1 %61  }
  0x85   :  { %58 = vst.msk [vmem:[#allocation0] sm:$0x1] %vm57_vm9, %v56_v22  }
  0x86   :  { %64 = vst.msk [vmem:[#allocation0] sm:$0x1] %vm63_vm10, %v62_v23  }
  0x88   :  { %v68_v24 = vpop.permute.xlu0 %67   ;;  %v74_v25 = vpop.permute.xlu1 %73  }
  0x89   :  { %70 = vst.msk [vmem:[#allocation0] sm:$0x1] %vm69_vm11, %v68_v24  }
  0x8a   :  { %76 = vst.msk [vmem:[#allocation0] sm:$0x1] %vm75_vm12, %v74_v25  }
  0x8c   :  { %v80_v26 = vpop.permute.xlu0 %79  }
  0x8d   :  { %82 = vst.msk [vmem:[#allocation0] sm:$0x1] %vm81_vm13, %v80_v26  }
  0x94   :  { %v86_v27 = vld [vmem:[#allocation0] sm:$0x1] }
  0x95   :  { %88 = vst [vmem:[%s184_s1] sm:$0x1] %v86_v27 }

// kernel: sa_forward.1
= control target key start
LH: loop header
LB: loop body
LE: loop exit
PB: predicated region body
PF: predicated region fallthrough
CT: control target
= control target key end

     0   :  { %7 = vsyncpa [#allocation5], 0  ;;  %s2498_s9 = smov 0   ;;  %s3655_s0 = inlined_call_operand.vmem [shape: f32[2,4,256], index: 0, kind: input, shape index: {}]   ;;  %s3656_s1 = inlined_call_operand.vmem [shape: f32[98], index: 1, kind: input, shape index: {}]   ;;  %s3657_s2 = inlined_call_operand.vmem [shape: f32[2,4,256], index: 2, kind: output, shape index: {}]  }
   0x1 LB: > { %s2198_s10 = sadd.s32 4294967295, %s2455_s9   ;;  %p2200_p0 = scmp.ge.s32.totalorder %s2455_s9, 1  ;;  %s2455_s9 = sphi %s2498_s9, %s13_s9  }
   0x2   : > { %p91_p1 = scmp.lt.s32.totalorder %s2455_s9, 3  ;;  %s104_s13 = sshll.u32 %s3656_s1, 4  ;;  %s105_s13 = int_to_ptr.vmem [resolvable:$true] %s104_s13 }
   0x3   : > { %p2368_p3 = scmp.eq.s32.totalorder %s2198_s10, 0  ;;  %s2430_s15 = scalar_lea.vmem %s105_s13, 16 }
   0x4   : > { %p2509_p2 = pnand %p2200_p0, %p91_p1  ;;  %p2431_p6 = scmp.ne.s32.totalorder %s105_s13, %s2430_s15 }
   0x5   : > { %p2438_p10 = scmp.lt.s32.totalorder %s105_s13, %s105_s13  ;;  %p2439_p11 = scmp.lt.s32.totalorder %s2430_s15, %s2430_s15 }
   0x6   : > { %p2364_p4 = pneg %p2509_p2 }
   0x7   : > { %p2440_p12 = por %p2439_p11, %p2438_p10 }
   0x8   : > { %p2365_p5 = pnand %p2368_p3, %p2364_p4 }
   0xa   : > { %p2432_p7 = pneg %p2365_p5 }
   0xc   : > { %p2433_p8 = pnand %p2432_p7, %p2431_p6 }
   0xe   : > { %p2434_p9 = pneg %p2433_p8 }
  0x10   : > { %p2441_p13 = pnand %p2440_p12, %p2434_p9 }
  0x12   : > { %2444 = shalt.err (!%p2441_p13)
}
  0x13   : > { %s2457_s16 = smov [#allocation4]   ;;  %125 = sbr.rel (%p2509_p2) target bundleno = 1046 (0x416), region = 28 }
  0x14   : > { %2367 = dma.vmem_to_smem (!%p2365_p5), %s105_s13, 16, %s2457_s16, [#allocation5]  }
  0x1a   : > { %2450 = dma.done.wait (%p2368_p3), [#allocation5], 16  }
  0x1b   : > { %2452 = vsyncadd (%p2368_p3), [#allocation5], 4294967280 }
  0x1c   : > { %131 = sfence }
  0x1d   : > { %p148_p0 = scmp.lt.s32.totalorder %s2198_s10, 1  ;;  %vm241_vm0 = vcmask 23552   ;;  %vm244_vm1 = vcmask 179352   ;;  %v2458_v0 = vmov 0.0   ;;  %vm162_vm2 = vcmask 1043456   ;;  %s2460_s21 = smov 115  }
  0x1e   : > { %411 = vst.msk [vmem:[#allocation2 + $0x1b] sm:$0xff] %vm241_vm0, %v2458_v0  ;;  %242 = vst.msk [vmem:[#allocation2 + $0x3] sm:$0xff] %vm241_vm0, %v2458_v0  ;;  %v2459_v13 = vmov 1966171168   ;;  %v201_v15 = vlaneseq  ;;  %s2461_s22 = smov 3   ;;  %vm238_vm4 = vcmask 174080  }
  0x1f   : > { %s3714_s10 = smov (!%p148_p0, %s2198_s10), 1  ;;  %243 = vst.msk [vmem:[#allocation2 + $0xb] sm:$0xff] %vm241_vm0, %v2458_v0  ;;  %412 = vst.msk [vmem:[#allocation2 + $0x23] sm:$0xff] %vm241_vm0, %v2458_v0  ;;  %v199_v14 = vunpack.c.l.s4 %v2459_v13  ;;  %s2462_s23 = smov 83   ;;  %vm256_vm5 = vcmask 147480   ;;  %vm1897_vm6 = vcmask 154648  }
  0x20   : > { %413 = vst.msk [vmem:[#allocation2 + $0x1b] sm:$0xff] %vm244_vm1, %v2458_v0  ;;  %245 = vst.msk [vmem:[#allocation2 + $0x3] sm:$0xff] %vm244_vm1, %v2458_v0  ;;  %s2358_s17 = sshll.u32 %s3714_s10, 3  ;;  %v2539_v25 = vshrl.u32 %v201_v15, 7  ;;  %vm215_vm3 = vcmp.lt.s32.totalorder %v201_v15, 256  ;;  %s2463_s24 = smov 99  }
  0x21   : > { %246 = vst.msk [vmem:[#allocation2 + $0xb] sm:$0xff] %vm244_vm1, %v2458_v0  ;;  %414 = vst.msk [vmem:[#allocation2 + $0x23] sm:$0xff] %vm244_vm1, %v2458_v0  ;;  %s2536_s20 = scalar_lea.vmem %s3655_s0, %s2358_s17  ;;  %v200_v24 = vunpack.c.0.s8 %v199_v14  ;;  %s2464_s25 = smov 51   ;;  %vm1912_vm7 = vcmask 122880   ;;  %vm1926_vm8 = vcmask 254080   ;;  %vm1940_vm9 = vcmask 385280  }
  0x22   : > { %v158_v1 = vld [vmem:[%s2536_s20] sm:$0xff]  ;;  %3676 = vst [vmem:[#allocation7_spill] sm:$0xff] %v2539_v25  ;;  %409 = vst.msk [vmem:[#allocation2 + $0x18] sm:$0x7] %vm238_vm4, %v2458_v0  ;;  %s2465_s26 = smov 67   ;;  %s2466_s27 = smov 19  }
  0x23   : > { %v160_v2 = vcombine.high %v158_v1, %v158_v1  ;;  %v163_v3 = vsel %vm162_vm2, %v158_v1, 0.0  ;;  %v179_v4 = vsel %vm162_vm2, %v158_v1, -inf  ;;  %v203_v36 = vsub.s32 %v200_v24, %v2539_v25  ;;  %239 = vst.msk [vmem:[#allocation2] sm:$0x7] %vm238_vm4, %v2458_v0  ;;  %240 = vst.msk [vmem:[#allocation2 + $0x13] sm:$0x7] %vm238_vm4, %v2458_v0 }
  0x24   : > { %v164_v5 = vrot.slane %v163_v3, 4  ;;  %v180_v6 = vrot.slane %v179_v4, 4  ;;  %410 = vst.msk [vmem:[#allocation2 + $0x2b] sm:$0x7] %vm238_vm4, %v2458_v0  ;;  %s2467_s28 = smov 35   ;;  %s2582_s29 = sld [smem:[#allocation4 + $0x33]] }
  0x25   : > { %v186_v7 = vsel %vm162_vm2, %v160_v2, -inf  ;;  %v170_v8 = vsel %vm162_vm2, %v160_v2, 0.0  ;;  %s2586_s30 = sld [smem:[#allocation4 + $0x37]]  ;;  %s2599_s4 = sld [smem:[#allocation4 + $0x43]]  ;;  %vm1954_vm10 = vcmask 516480   ;;  %vm1968_vm11 = vcmask 647680  }
  0x26   : > { %v165_v9 = vadd.f32 %v164_v5, %v163_v3  ;;  %v181_v10 = vmax.f32 %v179_v4, %v180_v6  ;;  %v187_v11 = vrot.slane %v186_v7, 4  ;;  %v171_v12 = vrot.slane %v170_v8, 4  ;;  %s2591_s3 = sld [smem:[#allocation4 + $0x3f]]  ;;  %s2468_s5 = smov 1  }
  0x27   : > { %s2608_s6 = sld [smem:[#allocation4 + $0x47]]  ;;  %s2469_s7 = smov 125   ;;  %vm1982_vm12 = vcmask 778880   ;;  %vm1996_vm13 = vcmask 910080   ;;  %vm2010_vm14 = vcmask 1041280  }
  0x28   : > { %v166_v16 = vrot.slane %v165_v9, 2  ;;  %v182_v17 = vrot.slane %v181_v10, 2  ;;  %v188_v18 = vmax.f32 %v186_v7, %v187_v11  ;;  %v172_v19 = vadd.f32 %v171_v12, %v170_v8  ;;  %s2615_s8 = sld [smem:[#allocation4 + $0x4b]]  ;;  %s2624_s11 = sld [smem:[#allocation4 + $0x4f]] }
  0x29   : > { %s2470_s12 = smov 127   ;;  %s2632_s13 = sld [smem:[#allocation4 + $0x53]] }
  0x2a   : > { %v167_v20 = vadd.f32 %v166_v16, %v165_v9  ;;  %v183_v21 = vmax.f32 %v181_v10, %v182_v17  ;;  %v189_v22 = vrot.slane %v188_v18, 2  ;;  %v173_v23 = vrot.slane %v172_v19, 2  ;;  %s2471_s14 = smov 2   ;;  %s2643_s15 = sld [smem:[#allocation4 + $0x5b]] }
  0x2b   : > { %v1242_v9 = vstv %s2582_s29  ;;  %v1298_v14 = vstv %s2586_s30  ;;  %s2472_s16 = smov 126   ;;  %s2650_s18 = sld [smem:[#allocation4 + $0x5f]] }
  0x2c   : > { %v168_v26 = vrot.slane %v167_v20, 1  ;;  %v184_v27 = vrot.slane %v183_v21, 1  ;;  %v190_v28 = vmax.f32 %v188_v18, %v189_v22  ;;  %v174_v29 = vadd.f32 %v173_v23, %v172_v19  ;;  %s2661_s19 = sld [smem:[#allocation4 + $0x7]]  ;;  %s2733_s29 = sld [smem:[#allocation4 + $0x2b]] }
  0x2d   : > { %v1382_v19 = vstv %s2591_s3  ;;  %v1438_v23 = vstv %s2599_s4  ;;  %s2740_s30 = sld [smem:[#allocation4 + $0x2f]]  ;;  %s2751_s3 = sld [smem:[#allocation4 + $0x5]] }
  0x2e   : > { %v169_v30 = vadd.f32 %v168_v26, %v167_v20  ;;  %v185_v31 = vmax.f32 %v183_v21, %v184_v27  ;;  %v191_v32 = vrot.slane %v190_v28, 1  ;;  %v175_v33 = vrot.slane %v174_v29, 1  ;;  %s2758_s4 = sld [smem:[#allocation4 + $0x6]] }
  0x30   : > { %v192_v34 = vmax.f32 %v190_v28, %v191_v32  ;;  %v193_v35 = vmul.f32 0.25, %v169_v30  ;;  %v176_v37 = vadd.f32 %v175_v33, %v174_v29  ;;  %v1496_v29 = vstv %s2608_s6  ;;  %s2769_s6 = sld [smem:[#allocation4 + $0x9]] }
  0x31   : > { %v1552_v33 = vstv %s2615_s8  ;;  %s2776_s8 = sld [smem:[#allocation4 + $0xa]] }
  0x32   : > { %v220_v38 = vcombine.low %v185_v31, %v192_v34  ;;  %v194_v39 = vmul.f32 0.25, %v176_v37  ;;  %v1610_v37 = vstv %s2624_s11  ;;  %s2473_s11 = smov 124  }
  0x34   : > { %v227_v40 = vrot.slane %v220_v38, %v203_v36  ;;  %v197_v41 = vcombine.low %v193_v35, %v194_v39 }
  0x36   : > { %v234_v42 = vrot.slane %v227_v40, %v203_v36  ;;  %v204_v43 = vrot.slane %v197_v41, %v203_v36  ;;  %v1666_v41 = vstv %s2632_s13  ;;  %s2785_s13 = sld [smem:[#allocation4 + $0xd]] }
  0x38   : > { %237 = vst.msk [vmem:[#allocation3 + $0x1] ss:$2 sm:$0x3] %vm215_vm3, %v234_v42  ;;  %v211_v44 = vrot.slane %v204_v43, %v203_v36 }
  0x3a   : > { %217 = vst.msk [vmem:[#allocation3] ss:$2 sm:$0x3] %vm215_vm3, %v211_v44 }
  0x3f   : > { %v2226_v45 = vld [vmem:[#allocation3 + $0x1] ss:$0 sm:$0xff]  ;;  %v2234_v48 = vld [vmem:[#allocation3 + $0x3] ss:$0 sm:$0xff] }
  0x40   : > { %431 = vrot.lane.b32.xlu1 %v2226_v45, %s2460_s21  ;;  %421 = vrot.lane.b32.xlu0 %v2226_v45, %s2461_s22 }
  0x41   : > { %v2211_v46 = vld [vmem:[#allocation3] ss:$0 sm:$0xff]  ;;  %v2218_v47 = vld [vmem:[#allocation3 + $0x2] ss:$0 sm:$0xff] }
  0x44   : > { %451 = vrot.lane.b32.xlu1 %v2226_v45, %s2462_s23  ;;  %441 = vrot.lane.b32.xlu0 %v2226_v45, %s2463_s24 }
  0x48   : > { %274 = vrot.lane.b32.xlu1 %v2211_v46, %s2463_s24  ;;  %253 = vrot.lane.b32.xlu0 %v2211_v46, %s2461_s22 }
  0x4c   : > { %284 = vrot.lane.b32.xlu1 %v2211_v46, %s2462_s23  ;;  %264 = vrot.lane.b32.xlu0 %v2211_v46, %s2460_s21 }
  0x50   : > { %304 = vrot.lane.b32.xlu1 %v2211_v46, %s2464_s25  ;;  %294 = vrot.lane.b32.xlu0 %v2211_v46, %s2465_s26 }
  0x54   : > { %324 = vrot.lane.b32.xlu1 %v2211_v46, %s2466_s27  ;;  %314 = vrot.lane.b32.xlu0 %v2211_v46, %s2467_s28 }
  0x58   : > { %344 = vrot.lane.b32.xlu1 %v2218_v47, %s2460_s21  ;;  %334 = vrot.lane.b32.xlu0 %v2218_v47, %s2461_s22 }
  0x5c   : > { %364 = vrot.lane.b32.xlu1 %v2218_v47, %s2462_s23  ;;  %354 = vrot.lane.b32.xlu0 %v2218_v47, %s2463_s24 }
  0x60   : > { %384 = vrot.lane.b32.xlu1 %v2218_v47, %s2464_s25  ;;  %374 = vrot.lane.b32.xlu0 %v2218_v47, %s2465_s26 }
  0x64   : > { %404 = vrot.lane.b32.xlu1 %v2218_v47, %s2466_s27  ;;  %394 = vrot.lane.b32.xlu0 %v2218_v47, %s2467_s28 }
  0x68   : > { %471 = vrot.lane.b32.xlu1 %v2226_v45, %s2464_s25  ;;  %461 = vrot.lane.b32.xlu0 %v2226_v45, %s2465_s26 }
  0x6c   : > { %491 = vrot.lane.b32.xlu1 %v2226_v45, %s2466_s27  ;;  %481 = vrot.lane.b32.xlu0 %v2226_v45, %s2467_s28  ;;  %v1750_v45 = vstv %s2643_s15  ;;  %s2792_s15 = sld [smem:[#allocation4 + $0xe]] }
  0x70   : > { %511 = vrot.lane.b32.xlu1 %v2234_v48, %s2460_s21  ;;  %501 = vrot.lane.b32.xlu0 %v2234_v48, %s2461_s22  ;;  %s2668_s21 = sld [smem:[#allocation4 + $0xb]] }
  0x74   : > { %531 = vrot.lane.b32.xlu1 %v2234_v48, %s2462_s23  ;;  %521 = vrot.lane.b32.xlu0 %v2234_v48, %s2463_s24  ;;  %s2679_s23 = sld [smem:[#allocation4 + $0xf]]  ;;  %s2686_s24 = sld [smem:[#allocation4 + $0x13]] }
  0x78   : > { %551 = vrot.lane.b32.xlu1 %v2234_v48, %s2464_s25  ;;  %541 = vrot.lane.b32.xlu0 %v2234_v48, %s2465_s26  ;;  %s2697_s25 = sld [smem:[#allocation4 + $0x17]]  ;;  %s2704_s26 = sld [smem:[#allocation4 + $0x1b]] }
  0x7c   : > { %571 = vrot.lane.b32.xlu1 %v2234_v48, %s2466_s27  ;;  %561 = vrot.lane.b32.xlu0 %v2234_v48, %s2467_s28  ;;  %s2715_s27 = sld [smem:[#allocation4 + $0x23]]  ;;  %s2722_s28 = sld [smem:[#allocation4 + $0x27]] }
  0xb2   : > { %v432_v49 = vpop.permute.xlu1 %431  ;;  %v422_v50 = vpop.permute.xlu0 %421 }
  0xb3   : > { %434 = vst.msk [vmem:[#allocation2 + $0x1c] sm:$0x1] %vm256_vm5, %v432_v49  ;;  %424 = vst.msk [vmem:[#allocation2 + $0x1b] sm:$0x1] %vm256_vm5, %v422_v50  ;;  %v1806_v49 = vstv %s2650_s18  ;;  %s2801_s18 = sld [smem:[#allocation4 + $0x11]] }
  0xb6   : > { %v452_v51 = vpop.permute.xlu1 %451  ;;  %v442_v52 = vpop.permute.xlu0 %441 }
  0xb7   : > { %454 = vst.msk [vmem:[#allocation2 + $0x1e] sm:$0x1] %vm256_vm5, %v452_v51  ;;  %444 = vst.msk [vmem:[#allocation2 + $0x1d] sm:$0x1] %vm256_vm5, %v442_v52 }
  0xba   : > { %v275_v53 = vpop.permute.xlu1 %274  ;;  %v254_v54 = vpop.permute.xlu0 %253 }
  0xbb   : > { %277 = vst.msk [vmem:[#allocation2 + $0x5] sm:$0x1] %vm256_vm5, %v275_v53  ;;  %257 = vst.msk [vmem:[#allocation2 + $0x3] sm:$0x1] %vm256_vm5, %v254_v54  ;;  %v646_v53 = vstv %s2661_s19  ;;  %s2808_s19 = sld [smem:[#allocation4 + $0x12]] }
  0xbe   : > { %v285_v55 = vpop.permute.xlu1 %284  ;;  %v265_v56 = vpop.permute.xlu0 %264 }
  0xbf   : > { %287 = vst.msk [vmem:[#allocation2 + $0x6] sm:$0x1] %vm256_vm5, %v285_v55  ;;  %267 = vst.msk [vmem:[#allocation2 + $0x4] sm:$0x1] %vm256_vm5, %v265_v56 }
  0xc2   : > { %v305_v57 = vpop.permute.xlu1 %304  ;;  %v295_v58 = vpop.permute.xlu0 %294 }
  0xc3   : > { %307 = vst.msk [vmem:[#allocation2 + $0x8] sm:$0x1] %vm256_vm5, %v305_v57  ;;  %297 = vst.msk [vmem:[#allocation2 + $0x7] sm:$0x1] %vm256_vm5, %v295_v58  ;;  %v702_v57 = vstv %s2668_s21  ;;  %s2474_s21 = smov 123  }
  0xc6   : > { %v325_v59 = vpop.permute.xlu1 %324  ;;  %v315_v60 = vpop.permute.xlu0 %314 }
  0xc7   : > { %327 = vst.msk [vmem:[#allocation2 + $0xa] sm:$0x1] %vm256_vm5, %v325_v59  ;;  %317 = vst.msk [vmem:[#allocation2 + $0x9] sm:$0x1] %vm256_vm5, %v315_v60 }
  0xca   : > { %v345_v61 = vpop.permute.xlu1 %344  ;;  %v335_v62 = vpop.permute.xlu0 %334  ;;  %v2674_v52 = vld [vmem:[#allocation2 + $0x1] sm:$0xff] }
  0xcb   : > { %347 = vst.msk [vmem:[#allocation2 + $0xc] sm:$0x1] %vm256_vm5, %v345_v61  ;;  %337 = vst.msk [vmem:[#allocation2 + $0xb] sm:$0x1] %vm256_vm5, %v335_v62  ;;  %v647_v55 = vmul.f32 %v646_v53, %v2674_v52  ;;  %v703_v58 = vmul.f32 %v702_v57, %v2674_v52  ;;  %v760_v61 = vstv %s2679_s23  ;;  %s2815_s23 = sld [smem:[#allocation4 + $0x15]] }
  0xce   : > { %v365_v63 = vpop.permute.xlu1 %364  ;;  %v355_v0 = vpop.permute.xlu0 %354  ;;  %v2692_v60 = vld [vmem:[#allocation2 + $0x2] sm:$0xff] }
  0xcf   : > { %367 = vst.msk [vmem:[#allocation2 + $0xe] sm:$0x1] %vm256_vm5, %v365_v63  ;;  %357 = vst.msk [vmem:[#allocation2 + $0xd] sm:$0x1] %vm256_vm5, %v355_v0  ;;  %v761_v63 = vmul.f32 %v760_v61, %v2692_v60 }
  0xd2   : > { %v385_v1 = vpop.permute.xlu1 %384  ;;  %v375_v2 = vpop.permute.xlu0 %374 }
  0xd3   : > { %387 = vst.msk [vmem:[#allocation2 + $0x10] sm:$0x1] %vm256_vm5, %v385_v1  ;;  %377 = vst.msk [vmem:[#allocation2 + $0xf] sm:$0x1] %vm256_vm5, %v375_v2  ;;  %v816_v1 = vstv %s2686_s24  ;;  %s2822_s24 = sld [smem:[#allocation4 + $0x16]] }
  0xd4   : > { %v817_v2 = vmul.f32 %v816_v1, %v2692_v60 }
  0xd6   : > { %v405_v3 = vpop.permute.xlu1 %404  ;;  %v395_v4 = vpop.permute.xlu0 %394 }
  0xd7   : > { %407 = vst.msk [vmem:[#allocation2 + $0x12] sm:$0x1] %vm256_vm5, %v405_v3  ;;  %397 = vst.msk [vmem:[#allocation2 + $0x11] sm:$0x1] %vm256_vm5, %v395_v4  ;;  %v2710_v4 = vld [vmem:[#allocation2 + $0x3] sm:$0xff] }
  0xd8   : > { %3677 = vst [vmem:[#allocation8_spill] sm:$0xff] %v2710_v4 }
  0xda   : > { %v472_v5 = vpop.permute.xlu1 %471  ;;  %v462_v6 = vpop.permute.xlu0 %461 }
  0xdb   : > { %474 = vst.msk [vmem:[#allocation2 + $0x20] sm:$0x1] %vm256_vm5, %v472_v5  ;;  %464 = vst.msk [vmem:[#allocation2 + $0x1f] sm:$0x1] %vm256_vm5, %v462_v6  ;;  %v874_v5 = vstv %s2697_s25  ;;  %v2713_v6 = vld [vmem:[#allocation2 + $0x9] sm:$0xff]  ;;  %s2829_s25 = sld [smem:[#allocation4 + $0x19]] }
  0xde   : > { %v492_v7 = vpop.permute.xlu1 %491  ;;  %v482_v8 = vpop.permute.xlu0 %481 }
  0xdf   : > { %494 = vst.msk [vmem:[#allocation2 + $0x22] sm:$0x1] %vm256_vm5, %v492_v7  ;;  %484 = vst.msk [vmem:[#allocation2 + $0x21] sm:$0x1] %vm256_vm5, %v482_v8  ;;  %v875_v7 = vmul.f32 %v874_v5, %v2710_v4  ;;  %v648_v8 = vmul.f32 %v646_v53, %v2713_v6  ;;  %v730_v53 = vstv %s2785_s13  ;;  %s2931_s13 = sld [smem:[#allocation4 + $0x31]] }
  0xe2   : > { %v512_v10 = vpop.permute.xlu1 %511  ;;  %v502_v11 = vpop.permute.xlu0 %501  ;;  %v2593_v12 = vld [vmem:[#allocation2 + $0x18] sm:$0xff] }
  0xe3   : > { %514 = vst.msk [vmem:[#allocation2 + $0x24] sm:$0x1] %vm256_vm5, %v512_v10  ;;  %504 = vst.msk [vmem:[#allocation2 + $0x23] sm:$0x1] %vm256_vm5, %v502_v11  ;;  %v1243_v13 = vmul.f32 %v1242_v9, %v2593_v12  ;;  %v1299_v17 = vmul.f32 %v1298_v14, %v2593_v12  ;;  %v704_v11 = vmul.f32 %v702_v57, %v2713_v6 }
  0xe5   : > { %1247 = vrot.lane.b32.xlu0 %v1243_v13, %s2468_s5  ;;  %v2728_v13 = vld [vmem:[#allocation2 + $0x5] sm:$0xff] }
  0xe6   : > { %v532_v15 = vpop.permute.xlu1 %531  ;;  %v522_v16 = vpop.permute.xlu0 %521  ;;  %v2605_v18 = vld [vmem:[#allocation2 + $0x1a] sm:$0xff]  ;;  %3678 = vst [vmem:[#allocation9_spill] sm:$0xff] %v2728_v13 }
  0xe7   : > { %534 = vst.msk [vmem:[#allocation2 + $0x26] sm:$0x1] %vm256_vm5, %v532_v15  ;;  %524 = vst.msk [vmem:[#allocation2 + $0x25] sm:$0x1] %vm256_vm5, %v522_v16  ;;  %v1383_v22 = vmul.f32 %v1382_v19, %v2605_v18  ;;  %v1439_v27 = vmul.f32 %v1438_v23, %v2605_v18  ;;  %v2621_v28 = vld [vmem:[#allocation2 + $0x1b] sm:$0xff]  ;;  %v2731_v15 = vld [vmem:[#allocation2 + $0xa] sm:$0xff] }
  0xe8   : > { %v1497_v31 = vmul.f32 %v1496_v29, %v2621_v28  ;;  %v1553_v34 = vmul.f32 %v1552_v33, %v2621_v28  ;;  %3679 = vst [vmem:[#allocation10_spill] sm:$0xff] %v2731_v15 }
  0xe9   : > { %1303 = vrot.lane.b32.xlu0 %v1299_v17, %s2469_s7  ;;  %v762_v17 = vmul.f32 %v760_v61, %v2731_v15 }
  0xea   : > { %v552_v20 = vpop.permute.xlu1 %551  ;;  %v542_v21 = vpop.permute.xlu0 %541  ;;  %v2638_v36 = vld [vmem:[#allocation2 + $0x1c] sm:$0xff] }
  0xeb   : > { %554 = vst.msk [vmem:[#allocation2 + $0x28] sm:$0x1] %vm256_vm5, %v552_v20  ;;  %544 = vst.msk [vmem:[#allocation2 + $0x27] sm:$0x1] %vm256_vm5, %v542_v21  ;;  %v1611_v39 = vmul.f32 %v1610_v37, %v2638_v36  ;;  %v1667_v42 = vmul.f32 %v1666_v41, %v2638_v36  ;;  %v818_v21 = vmul.f32 %v816_v1, %v2731_v15 }
  0xed   : > { %1387 = vrot.lane.b32.xlu0 %v1383_v22, %s2461_s22  ;;  %v2746_v22 = vld [vmem:[#allocation2 + $0x6] sm:$0xff] }
  0xee   : > { %v572_v24 = vpop.permute.xlu1 %571  ;;  %v562_v26 = vpop.permute.xlu0 %561  ;;  %v2656_v44 = vld [vmem:[#allocation2 + $0x1e] sm:$0xff]  ;;  %3680 = vst [vmem:[#allocation11_spill] sm:$0xff] %v2746_v22 }
  0xef   : > { %574 = vst.msk [vmem:[#allocation2 + $0x2a] sm:$0x1] %vm256_vm5, %v572_v24  ;;  %564 = vst.msk [vmem:[#allocation2 + $0x29] sm:$0x1] %vm256_vm5, %v562_v26  ;;  %v1751_v47 = vmul.f32 %v1750_v45, %v2656_v44  ;;  %v1807_v50 = vmul.f32 %v1806_v49, %v2656_v44  ;;  %v2749_v24 = vld [vmem:[#allocation2 + $0xb] sm:$0xff] }
  0xf0   : > { %3681 = vst [vmem:[#allocation12_spill] sm:$0xff] %v2749_v24 }
  0xf1   : > { %1443 = vrot.lane.b32.xlu0 %v1439_v27, %s2470_s12  ;;  %v876_v27 = vmul.f32 %v874_v5, %v2749_v24 }
  0xf2   : > { %v2627_v30 = vld [vmem:[#allocation2 + $0x20] sm:$0xff] }
  0xf3   : > { %v1244_v32 = vmul.f32 %v1242_v9, %v2627_v30  ;;  %v1300_v35 = vmul.f32 %v1298_v14, %v2627_v30  ;;  %v930_v9 = vstv %s2704_s26  ;;  %v1014_v14 = vstv %s2715_s27  ;;  %s2836_s26 = sld [smem:[#allocation4 + $0x1a]]  ;;  %s2845_s27 = sld [smem:[#allocation4 + $0x21]] }
  0xf4   : > { %v931_v10 = vmul.f32 %v930_v9, %v2710_v4  ;;  %v1015_v16 = vmul.f32 %v1014_v14, %v2728_v13 }
  0xf5   : > { %1501 = vrot.lane.b32.xlu0 %v1497_v31, %s2471_s14  ;;  %1249 = vrot.lane.b32.xlu1 %v1244_v32, %s2468_s5  ;;  %v932_v32 = vmul.f32 %v930_v9, %v2749_v24  ;;  %v732_v9 = vmul.f32 %v730_v53, %v2713_v6 }
  0xf6   : > { %v2641_v38 = vld [vmem:[#allocation2 + $0x22] sm:$0xff] }
  0xf7   : > { %v1384_v40 = vmul.f32 %v1382_v19, %v2641_v38  ;;  %v1440_v43 = vmul.f32 %v1438_v23, %v2641_v38  ;;  %v2659_v46 = vld [vmem:[#allocation2 + $0x23] sm:$0xff]  ;;  %v1070_v19 = vstv %s2722_s28  ;;  %v1128_v23 = vstv %s2733_s29  ;;  %s2854_s28 = sld [smem:[#allocation4 + $0x22]]  ;;  %s2865_s29 = sld [smem:[#allocation4 + $0x25]] }
  0xf8   : > { %v1498_v48 = vmul.f32 %v1496_v29, %v2659_v46  ;;  %v1554_v51 = vmul.f32 %v1552_v33, %v2659_v46  ;;  %v2677_v54 = vld [vmem:[#allocation2 + $0x24] sm:$0xff]  ;;  %v1071_v20 = vmul.f32 %v1070_v19, %v2728_v13  ;;  %v1129_v26 = vmul.f32 %v1128_v23, %v2746_v22 }
  0xf9   : > { %1557 = vrot.lane.b32.xlu0 %v1553_v34, %s2472_s16  ;;  %1305 = vrot.lane.b32.xlu1 %v1300_v35, %s2469_s7  ;;  %v1612_v56 = vmul.f32 %v1610_v37, %v2677_v54  ;;  %v1668_v59 = vmul.f32 %v1666_v41, %v2677_v54  ;;  %v2695_v62 = vld [vmem:[#allocation2 + $0x26] sm:$0xff]  ;;  %v1184_v29 = vstv %s2740_s30  ;;  %v616_v34 = vstv %s2751_s3  ;;  %s2874_s30 = sld [smem:[#allocation4 + $0x26]]  ;;  %s2885_s3 = sld [smem:[#allocation4 + $0x29]] }
  0xfa   : > { %v1752_v0 = vmul.f32 %v1750_v45, %v2695_v62  ;;  %v1808_v3 = vmul.f32 %v1806_v49, %v2695_v62  ;;  %v1185_v31 = vmul.f32 %v1184_v29, %v2746_v22  ;;  %v2764_v33 = vld [vmem:[#allocation2] sm:$0xff]  ;;  %v2767_v35 = vld [vmem:[#allocation2 + $0xd] sm:$0xff]  ;;  %v688_v49 = vstv %s2776_s8  ;;  %s2920_s8 = sld [smem:[#allocation4 + $0x2e]] }
  0xfb   : > { %3682 = vst [vmem:[#allocation13_spill] sm:$0xff] %v2767_v35  ;;  %v617_v37 = vmul.f32 %v616_v34, %v2764_v33  ;;  %v2783_v45 = vld [vmem:[#allocation2 + $0xe] sm:$0xff]  ;;  %v690_v5 = vmul.f32 %v688_v49, %v2713_v6 }
  0xfc   : > { %3683 = vst [vmem:[#allocation14_spill] sm:$0xff] %v2783_v45 }
  0xfd   : > { %1615 = vrot.lane.b32.xlu0 %v1611_v39, %s2468_s5  ;;  %1389 = vrot.lane.b32.xlu1 %v1384_v40, %s2461_s22  ;;  %v1016_v39 = vmul.f32 %v1014_v14, %v2767_v35  ;;  %v630_v40 = vstv %s2758_s4  ;;  %s2896_s4 = sld [smem:[#allocation4 + $0x2a]] }
  0xfe   : > { %v631_v41 = vmul.f32 %v630_v40, %v2764_v33 }
 0x101   : > { %1671 = vrot.lane.b32.xlu0 %v1667_v42, %s2469_s7  ;;  %1445 = vrot.lane.b32.xlu1 %v1440_v43, %s2470_s12  ;;  %v1072_v42 = vmul.f32 %v1070_v19, %v2767_v35  ;;  %v674_v43 = vstv %s2769_s6  ;;  %s2909_s6 = sld [smem:[#allocation4 + $0x2d]] }
 0x102   : > { %v676_v1 = vmul.f32 %v674_v43, %v2713_v6 }
 0x105   : > { %1755 = vrot.lane.b32.xlu0 %v1751_v47, %s2461_s22  ;;  %1503 = vrot.lane.b32.xlu1 %v1498_v48, %s2471_s14  ;;  %v675_v47 = vmul.f32 %v674_v43, %v2674_v52  ;;  %v1130_v48 = vmul.f32 %v1128_v23, %v2783_v45  ;;  %v916_v23 = vstv %s2836_s26  ;;  %s2999_s26 = sld [smem:[#allocation4 + $0x3]] }
 0x109   : > { %1811 = vrot.lane.b32.xlu0 %v1807_v50, %s2470_s12  ;;  %1559 = vrot.lane.b32.xlu1 %v1554_v51, %s2472_s16  ;;  %v689_v50 = vmul.f32 %v688_v49, %v2674_v52  ;;  %v1186_v51 = vmul.f32 %v1184_v29, %v2783_v45 }
 0x10d   : > { %651 = vrot.lane.b32.xlu0 %v647_v55, %s2461_s22  ;;  %1617 = vrot.lane.b32.xlu1 %v1612_v56, %s2468_s5  ;;  %v2799_v55 = vld [vmem:[#allocation2 + $0x8] sm:$0xff]  ;;  %v731_v56 = vmul.f32 %v730_v53, %v2674_v52 }
 0x10e   : > { %v618_v57 = vmul.f32 %v616_v34, %v2799_v55  ;;  %v632_v61 = vmul.f32 %v630_v40, %v2799_v55  ;;  %v998_v40 = vstv %s2854_s28  ;;  %s3017_s28 = sld [smem:[#allocation4 + $0x45]] }
 0x111   : > { %707 = vrot.lane.b32.xlu0 %v703_v58, %s2470_s12  ;;  %1673 = vrot.lane.b32.xlu1 %v1668_v59, %s2469_s7  ;;  %v746_v58 = vstv %s2792_s15  ;;  %s2942_s15 = sld [smem:[#allocation4 + $0x32]] }
 0x112   : > { %v747_v59 = vmul.f32 %v746_v58, %v2692_v60 }
 0x115   : > { %765 = vrot.lane.b32.xlu0 %v761_v63, %s2471_s14  ;;  %1757 = vrot.lane.b32.xlu1 %v1752_v0, %s2461_s22  ;;  %v788_v63 = vstv %s2801_s18  ;;  %s2953_s18 = sld [smem:[#allocation4 + $0x35]] }
 0x116   : > { %v789_v0 = vmul.f32 %v788_v63, %v2692_v60 }
 0x119   : > { %821 = vrot.lane.b32.xlu0 %v817_v2, %s2472_s16  ;;  %1813 = vrot.lane.b32.xlu1 %v1808_v3, %s2470_s12  ;;  %v802_v2 = vstv %s2808_s19  ;;  %s2964_s19 = sld [smem:[#allocation4 + $0x36]] }
 0x11a   : > { %v803_v3 = vmul.f32 %v802_v2, %v2692_v60  ;;  %v804_v29 = vmul.f32 %v802_v2, %v2731_v15 }
 0x11d   : > { %879 = vrot.lane.b32.xlu0 %v875_v7, %s2468_s5  ;;  %653 = vrot.lane.b32.xlu1 %v648_v8, %s2461_s22  ;;  %v846_v7 = vstv %s2815_s23  ;;  %s2975_s23 = sld [smem:[#allocation4 + $0x3d]] }
 0x11e   : > { %v847_v8 = vmul.f32 %v846_v7, %v2710_v4 }
 0x121   : > { %935 = vrot.lane.b32.xlu0 %v931_v10, %s2469_s7  ;;  %709 = vrot.lane.b32.xlu1 %v704_v11, %s2470_s12  ;;  %v860_v10 = vstv %s2822_s24  ;;  %s2984_s24 = sld [smem:[#allocation4 + $0x3e]] }
 0x122   : > { %v861_v14 = vmul.f32 %v860_v10, %v2710_v4 }
 0x125   : > { %1019 = vrot.lane.b32.xlu0 %v1015_v16, %s2461_s22  ;;  %767 = vrot.lane.b32.xlu1 %v762_v17, %s2471_s14  ;;  %v748_v16 = vmul.f32 %v746_v58, %v2731_v15  ;;  %v902_v17 = vstv %s2829_s25  ;;  %s2995_s25 = sld [smem:[#allocation4 + $0x41]] }
 0x126   : > { %v904_v53 = vmul.f32 %v902_v17, %v2749_v24 }
 0x129   : > { %1075 = vrot.lane.b32.xlu0 %v1071_v20, %s2470_s12  ;;  %823 = vrot.lane.b32.xlu1 %v818_v21, %s2472_s16  ;;  %v903_v20 = vmul.f32 %v902_v17, %v2710_v4  ;;  %v790_v21 = vmul.f32 %v788_v63, %v2731_v15  ;;  %v1098_v63 = vstv %s2885_s3  ;;  %v1466_v15 = vstv %s3017_s28  ;;  %s3044_s3 = sld [smem:[#allocation4 + $0x49]]  ;;  %s3219_s28 = sld [smem:[#allocation4 + $0xc]] }
 0x12d   : > { %1133 = vrot.lane.b32.xlu0 %v1129_v26, %s2471_s14  ;;  %881 = vrot.lane.b32.xlu1 %v876_v27, %s2468_s5  ;;  %v917_v27 = vmul.f32 %v916_v23, %v2710_v4 }
 0x131   : > { %1189 = vrot.lane.b32.xlu0 %v1185_v31, %s2472_s16  ;;  %937 = vrot.lane.b32.xlu1 %v932_v32, %s2469_s7  ;;  %v2862_v31 = vld [vmem:[#allocation2 + $0x4] sm:$0xff]  ;;  %v984_v32 = vstv %s2845_s27  ;;  %s3006_s27 = sld [smem:[#allocation4 + $0x42]] }
 0x132   : > { %v999_v43 = vmul.f32 %v998_v40, %v2862_v31 }
 0x135   : > { %621 = vrot.lane.b32.xlu0 %v617_v37, %s2473_s11  ;;  %1021 = vrot.lane.b32.xlu1 %v1016_v39, %s2461_s22  ;;  %v985_v37 = vmul.f32 %v984_v32, %v2862_v31  ;;  %v848_v39 = vmul.f32 %v846_v7, %v2749_v24  ;;  %v1114_v7 = vstv %s2896_s4  ;;  %s3055_s4 = sld [smem:[#allocation4 + $0x4a]] }
 0x139   : > { %635 = vrot.lane.b32.xlu0 %v631_v41, %s2473_s11  ;;  %1077 = vrot.lane.b32.xlu1 %v1072_v42, %s2470_s12 }
 0x13d   : > { %679 = vrot.lane.b32.xlu0 %v675_v47, %s2470_s12  ;;  %1135 = vrot.lane.b32.xlu1 %v1130_v48, %s2471_s14  ;;  %v862_v47 = vmul.f32 %v860_v10, %v2749_v24  ;;  %v1042_v48 = vstv %s2865_s29  ;;  %v1115_v10 = vmul.f32 %v1114_v7, %v2746_v22  ;;  %s3029_s29 = sld [smem:[#allocation4 + $0x46]] }
 0x141   : > { %693 = vrot.lane.b32.xlu0 %v689_v50, %s2470_s12  ;;  %1191 = vrot.lane.b32.xlu1 %v1186_v51, %s2472_s16  ;;  %v1043_v51 = vmul.f32 %v1042_v48, %v2728_v13 }
 0x143   : > { %v1482_v4 = vstv %s3029_s29  ;;  %s3232_s29 = sld [smem:[#allocation4 + $0x10]] }
 0x145   : > { %735 = vrot.lane.b32.xlu0 %v731_v56, %s2474_s21  ;;  %623 = vrot.lane.b32.xlu1 %v618_v57, %s2473_s11  ;;  %v1056_v56 = vstv %s2874_s30  ;;  %s3039_s30 = sld [smem:[#allocation4 + $0x1f]] }
 0x149   : > { %751 = vrot.lane.b32.xlu0 %v747_v59, %s2471_s14  ;;  %637 = vrot.lane.b32.xlu1 %v632_v61, %s2473_s11  ;;  %v1057_v59 = vmul.f32 %v1056_v56, %v2728_v13  ;;  %v918_v61 = vmul.f32 %v916_v23, %v2749_v24  ;;  %v1044_v23 = vmul.f32 %v1042_v48, %v2767_v35  ;;  %v1424_v24 = vstv %s3006_s27  ;;  %s3209_s27 = sld [smem:[#allocation4 + $0x57]] }
 0x14d   : > { %793 = vrot.lane.b32.xlu0 %v789_v0, %s2472_s16  ;;  %681 = vrot.lane.b32.xlu1 %v676_v1, %s2470_s12  ;;  %v2907_v0 = vld [vmem:[#allocation2 + $0xc] sm:$0xff] }
 0x151   : > { %807 = vrot.lane.b32.xlu0 %v803_v3, %s2472_s16  ;;  %695 = vrot.lane.b32.xlu1 %v690_v5, %s2470_s12  ;;  %v1099_v3 = vmul.f32 %v1098_v63, %v2728_v13  ;;  %v986_v5 = vmul.f32 %v984_v32, %v2907_v0 }
 0x155   : > { %851 = vrot.lane.b32.xlu0 %v847_v8, %s2468_s5  ;;  %737 = vrot.lane.b32.xlu1 %v732_v9, %s2474_s21 }
 0x157   : > { %v2840_v11 = vpop.permute.xlu0 %1247 }
 0x159   : > { %865 = vrot.lane.b32.xlu0 %v861_v14, %s2468_s5  ;;  %753 = vrot.lane.b32.xlu1 %v748_v16, %s2471_s14  ;;  %v1000_v14 = vmul.f32 %v998_v40, %v2907_v0  ;;  %v1156_v16 = vstv %s2909_s6  ;;  %v1214_v40 = vstv %s2931_s13  ;;  %s3067_s6 = sld [smem:[#allocation4 + $0x4d]]  ;;  %s3092_s13 = sld [smem:[#allocation4 + $0x51]] }
 0x15a   : > { %v1215_v48 = vmul.f32 %v1214_v40, %v2593_v12 }
 0x15b   : > { %v2849_v19 = vpop.permute.xlu0 %1303 }
 0x15d   : > { %907 = vrot.lane.b32.xlu0 %v903_v20, %s2469_s7  ;;  %795 = vrot.lane.b32.xlu1 %v790_v21, %s2472_s16  ;;  %v1157_v21 = vmul.f32 %v1156_v16, %v2746_v22 }
 0x15f   : > { %v2858_v26 = vpop.permute.xlu0 %1387 }
 0x161   : > { %921 = vrot.lane.b32.xlu0 %v917_v27, %s2469_s7  ;;  %809 = vrot.lane.b32.xlu1 %v804_v29, %s2472_s16  ;;  %v1170_v27 = vstv %s2920_s8  ;;  %s3079_s8 = sld [smem:[#allocation4 + $0x4e]] }
 0x163   : > { %v2869_v34 = vpop.permute.xlu0 %1443 }
 0x165   : > { %989 = vrot.lane.b32.xlu0 %v985_v37, %s2473_s11  ;;  %853 = vrot.lane.b32.xlu1 %v848_v39, %s2468_s5  ;;  %v1171_v37 = vmul.f32 %v1170_v27, %v2746_v22  ;;  %v1058_v39 = vmul.f32 %v1056_v56, %v2767_v35 }
 0x167   : > { %v2878_v41 = vpop.permute.xlu1 %1249  ;;  %v2880_v42 = vpop.permute.xlu0 %1501 }
 0x169   : > { %1003 = vrot.lane.b32.xlu0 %v999_v43, %s2473_s11  ;;  %867 = vrot.lane.b32.xlu1 %v862_v47, %s2468_s5 }
 0x16b   : > { %v2889_v49 = vpop.permute.xlu1 %1305  ;;  %v2891_v50 = vpop.permute.xlu0 %1557 }
 0x16d   : > { %1047 = vrot.lane.b32.xlu0 %v1043_v51, %s2470_s12  ;;  %909 = vrot.lane.b32.xlu1 %v904_v53, %s2469_s7  ;;  %v1100_v51 = vmul.f32 %v1098_v63, %v2767_v35  ;;  %v1228_v53 = vstv %s2942_s15  ;;  %s3105_s15 = sld [smem:[#allocation4 + $0x52]] }
 0x16e   : > { %v1230_v25 = vmul.f32 %v1228_v53, %v2627_v30 }
 0x16f   : > { %v2900_v57 = vpop.permute.xlu1 %1389  ;;  %v2902_v58 = vpop.permute.xlu0 %1615 }
 0x171   : > { %1061 = vrot.lane.b32.xlu0 %v1057_v59, %s2470_s12  ;;  %923 = vrot.lane.b32.xlu1 %v918_v61, %s2469_s7  ;;  %v1229_v61 = vmul.f32 %v1228_v53, %v2593_v12 }
 0x173   : > { %v2913_v1 = vpop.permute.xlu1 %1445  ;;  %v2915_v2 = vpop.permute.xlu0 %1671 }
 0x175   : > { %1103 = vrot.lane.b32.xlu0 %v1099_v3, %s2474_s21  ;;  %991 = vrot.lane.b32.xlu1 %v986_v5, %s2473_s11  ;;  %v1116_v3 = vmul.f32 %v1114_v7, %v2783_v45  ;;  %v1270_v5 = vstv %s2953_s18  ;;  %s3110_s18 = sld [smem:[#allocation4 + $0x3b]] }
 0x176   : > { %v1272_v22 = vmul.f32 %v1270_v5, %v2627_v30 }
 0x177   : > { %v2924_v8 = vpop.permute.xlu1 %1503  ;;  %v2926_v9 = vpop.permute.xlu0 %1755 }
 0x179   : > { %1119 = vrot.lane.b32.xlu0 %v1115_v10, %s2471_s14  ;;  %1005 = vrot.lane.b32.xlu1 %v1000_v14, %s2473_s11  ;;  %v1271_v14 = vmul.f32 %v1270_v5, %v2593_v12  ;;  %v3041_v5 = vld [vmem:[#allocation2 + $0x21] sm:$0xff] }
 0x17b   : > { %v2935_v17 = vpop.permute.xlu1 %1559  ;;  %v2937_v20 = vpop.permute.xlu0 %1811 }
 0x17d   : > { %1161 = vrot.lane.b32.xlu0 %v1157_v21, %s2472_s16  ;;  %1049 = vrot.lane.b32.xlu1 %v1044_v23, %s2470_s12  ;;  %v1158_v21 = vmul.f32 %v1156_v16, %v2783_v45  ;;  %v1284_v23 = vstv %s2964_s19  ;;  %s3120_s19 = sld [smem:[#allocation4 + $0x59]] }
 0x17f   : > { %v2946_v29 = vpop.permute.xlu1 %1617  ;;  %v2948_v32 = vpop.permute.xlu0 %651 }
 0x181   : > { %1175 = vrot.lane.b32.xlu0 %v1171_v37, %s2472_s16  ;;  %1063 = vrot.lane.b32.xlu1 %v1058_v39, %s2470_s12  ;;  %v1285_v39 = vmul.f32 %v1284_v23, %v2593_v12 }
 0x183   : > { %v2957_v43 = vpop.permute.xlu1 %1673  ;;  %v2959_v47 = vpop.permute.xlu0 %707 }
 0x184   : > { %3684 = vst [vmem:[#allocation15_spill] sm:$0xff] %v2957_v43 }
 0x185   : > { %1219 = vrot.lane.b32.xlu0 %v1215_v48, %s2468_s5  ;;  %1105 = vrot.lane.b32.xlu1 %v1100_v51, %s2474_s21  ;;  %v1172_v48 = vmul.f32 %v1170_v27, %v2783_v45  ;;  %v2992_v51 = vld [vmem:[#allocation2 + $0x19] sm:$0xff]  ;;  %v1216_v27 = vmul.f32 %v1214_v40, %v2627_v30  ;;  %v1410_v45 = vstv %s2995_s25  ;;  %v596_v40 = vstv %s2999_s26  ;;  %s3176_s25 = sld [smem:[#allocation4 + $0x61]]  ;;  %s3189_s26 = sld [smem:[#allocation4 + $0x4]] }
 0x186   : > { %v597_v53 = vmul.f32 %v596_v40, %v2764_v33 }
 0x187   : > { %v2968_v56 = vpop.permute.xlu1 %1757  ;;  %v2970_v59 = vpop.permute.xlu0 %765 }
 0x188   : > { %3685 = vst [vmem:[#allocation16_spill] sm:$0xff] %v2968_v56  ;;  %v1286_v56 = vmul.f32 %v1284_v23, %v2627_v30 }
 0x189   : > { %1233 = vrot.lane.b32.xlu0 %v1229_v61, %s2468_s5  ;;  %1121 = vrot.lane.b32.xlu1 %v1116_v3, %s2471_s14  ;;  %v1352_v61 = vstv %s2975_s23  ;;  %s3134_s23 = sld [smem:[#allocation4 + $0x5a]] }
 0x18a   : > { %v1353_v12 = vmul.f32 %v1352_v61, %v2992_v51  ;;  %v1354_v23 = vmul.f32 %v1352_v61, %v3041_v5  ;;  %v1483_v61 = vmul.f32 %v1482_v4, %v2621_v28 }
 0x18b   : > { %v2979_v63 = vpop.permute.xlu1 %1813  ;;  %v822_v10 = vpop.permute.xlu0 %821 }
 0x18c   : > { %3686 = vst [vmem:[#allocation17_spill] sm:$0xff] %v2979_v63  ;;  %v1425_v63 = vmul.f32 %v1424_v24, %v2605_v18 }
 0x18d   : > { %1275 = vrot.lane.b32.xlu0 %v1271_v14, %s2469_s7  ;;  %1163 = vrot.lane.b32.xlu1 %v1158_v21, %s2472_s16  ;;  %v1366_v14 = vstv %s2984_s24  ;;  %s3163_s24 = sld [smem:[#allocation4 + $0x5e]] }
 0x18f   : > { %v2988_v7 = vpop.permute.xlu1 %653  ;;  %v880_v37 = vpop.permute.xlu0 %879 }
 0x191   : > { %1289 = vrot.lane.b32.xlu0 %v1285_v39, %s2469_s7  ;;  %1177 = vrot.lane.b32.xlu1 %v1172_v48, %s2472_s16  ;;  %v1367_v48 = vmul.f32 %v1366_v14, %v2992_v51 }
 0x193   : > { %v3001_v16 = vpop.permute.xlu1 %709  ;;  %v936_v3 = vpop.permute.xlu0 %935 }
 0x195   : > { %1357 = vrot.lane.b32.xlu0 %v1353_v12, %s2473_s11  ;;  %1221 = vrot.lane.b32.xlu1 %v1216_v27, %s2468_s5  ;;  %v1411_v27 = vmul.f32 %v1410_v45, %v2605_v18 }
 0x197   : > { %v3010_v21 = vpop.permute.xlu1 %767  ;;  %v3012_v39 = vpop.permute.xlu0 %1019 }
 0x199   : > { %1371 = vrot.lane.b32.xlu0 %v1367_v48, %s2473_s11  ;;  %1235 = vrot.lane.b32.xlu1 %v1230_v25, %s2468_s5  ;;  %v657_v25 = vadd.f32 %v2948_v32, %v597_v53  ;;  %v1467_v53 = vmul.f32 %v1466_v15, %v2605_v18  ;;  %v1524_v18 = vstv %s3044_s3  ;;  %s3269_s3 = sld [smem:[#allocation4 + $0x18]] }
 0x19b   : > { %v3022_v35 = vpop.permute.xlu1 %823  ;;  %v3024_v12 = vpop.permute.xlu0 %1075 }
 0x19d   : > { %1415 = vrot.lane.b32.xlu0 %v1411_v27, %s2470_s12  ;;  %1277 = vrot.lane.b32.xlu1 %v1272_v22, %s2469_s7  ;;  %v713_v27 = vadd.f32 %v2959_v47, %v657_v25  ;;  %v964_v25 = vstv %s3039_s30  ;;  %s3257_s30 = sld [smem:[#allocation4 + $0x14]] }
 0x19f   : > { %v3035_v48 = vpop.permute.xlu1 %881  ;;  %v1134_v13 = vpop.permute.xlu0 %1133  ;;  %v771_v22 = vadd.f32 %v2970_v59, %v713_v27 }
 0x1a1   : > { %1429 = vrot.lane.b32.xlu0 %v1425_v63, %s2470_s12  ;;  %1291 = vrot.lane.b32.xlu1 %v1286_v56, %s2469_s7  ;;  %v827_v43 = vadd.f32 %v822_v10, %v771_v22  ;;  %v1368_v63 = vmul.f32 %v1366_v14, %v3041_v5  ;;  %v1412_v14 = vmul.f32 %v1410_v45, %v2641_v38 }
 0x1a2   : > { %v1525_v22 = vmul.f32 %v1524_v18, %v2621_v28  ;;  %v1426_v45 = vmul.f32 %v1424_v24, %v2641_v38 }
 0x1a3   : > { %v3050_v32 = vpop.permute.xlu1 %937  ;;  %v1190_v30 = vpop.permute.xlu0 %1189  ;;  %v885_v47 = vadd.f32 %v880_v37, %v827_v43  ;;  %v965_v43 = vmul.f32 %v964_v25, %v2862_v31 }
 0x1a5   : > { %1359 = vrot.lane.b32.xlu1 %v1354_v23, %s2473_s11  ;;  %1471 = vrot.lane.b32.xlu0 %v1467_v53, %s2474_s21  ;;  %v941_v27 = vadd.f32 %v936_v3, %v885_v47  ;;  %v1538_v23 = vstv %s3055_s4  ;;  %v598_v3 = vmul.f32 %v596_v40, %v2799_v55  ;;  %s3281_s4 = sld [smem:[#allocation4 + $0x20]] }
 0x1a7   : > { %v3059_v56 = vpop.permute.xlu1 %1021  ;;  %v3061_v59 = vpop.permute.xlu0 %621  ;;  %v967_v53 = vadd.f32 %v965_v43, %v941_v27  ;;  %v658_v47 = vadd.f32 %v2988_v7, %v598_v3  ;;  %v1596_v3 = vstv %s3079_s8  ;;  %s2475_s8 = smov 122  }
 0x1a8   : > { %3687 = vst [vmem:[#allocation18_spill] sm:$0xff] %v3061_v59  ;;  %v1582_v59 = vstv %s3067_s6  ;;  %s3293_s6 = sld [smem:[#allocation4 + $0x24]] }
 0x1a9   : > { %1373 = vrot.lane.b32.xlu1 %v1368_v63, %s2473_s11  ;;  %1487 = vrot.lane.b32.xlu0 %v1483_v61, %s2471_s14  ;;  %v714_v40 = vadd.f32 %v3001_v16, %v658_v47  ;;  %v1025_v27 = vadd.f32 %v3012_v39, %v967_v53  ;;  %v1583_v24 = vmul.f32 %v1582_v59, %v2638_v36 }
 0x1aa   : > { %v1597_v53 = vmul.f32 %v1596_v3, %v2638_v36 }
 0x1ab   : > { %v3072_v10 = vpop.permute.xlu1 %1077  ;;  %v3074_v37 = vpop.permute.xlu0 %635  ;;  %v772_v7 = vadd.f32 %v3010_v21, %v714_v40  ;;  %v1081_v43 = vadd.f32 %v3024_v12, %v1025_v27  ;;  %v1652_v27 = vstv %s3105_s15  ;;  %s3317_s15 = sld [smem:[#allocation4 + $0x2c]] }
 0x1ac   : > { %3688 = vst [vmem:[#allocation19_spill] sm:$0xff] %v3074_v37  ;;  %v1539_v37 = vmul.f32 %v1538_v23, %v2621_v28  ;;  %v1468_v28 = vmul.f32 %v1466_v15, %v2641_v38  ;;  %v1484_v15 = vmul.f32 %v1482_v4, %v2659_v46 }
 0x1ad   : > { %1417 = vrot.lane.b32.xlu1 %v1412_v14, %s2470_s12  ;;  %1529 = vrot.lane.b32.xlu0 %v1525_v22, %s2472_s16  ;;  %v828_v16 = vadd.f32 %v3022_v35, %v772_v7  ;;  %v1139_v39 = vadd.f32 %v1134_v13, %v1081_v43  ;;  %v1638_v35 = vstv %s3092_s13  ;;  %s3305_s13 = sld [smem:[#allocation4 + $0x28]] }
 0x1ae   : > { %v1639_v40 = vmul.f32 %v1638_v35, %v2638_v36 }
 0x1af   : > { %v3085_v63 = vpop.permute.xlu1 %1135  ;;  %v3087_v61 = vpop.permute.xlu0 %679  ;;  %v886_v21 = vadd.f32 %v3035_v48, %v828_v16  ;;  %v1195_v12 = vadd.f32 %v1190_v30, %v1139_v39  ;;  %v966_v30 = vmul.f32 %v964_v25, %v2907_v0  ;;  %v1720_v16 = vstv %s3120_s19  ;;  %s3330_s19 = sld [smem:[#allocation4 + $0x1]] }
 0x1b1   : > { %1431 = vrot.lane.b32.xlu1 %v1426_v45, %s2470_s12  ;;  %1543 = vrot.lane.b32.xlu0 %v1539_v37, %s2472_s16  ;;  %v942_v13 = vadd.f32 %v3050_v32, %v886_v21  ;;  %v1253_v48 = vadd.f32 %v2840_v11, %v1195_v12  ;;  %v1526_v45 = vmul.f32 %v1524_v18, %v2659_v46  ;;  %v1332_v11 = vstv %s3110_s18  ;;  %s3328_s18 = sld [smem:[#allocation4 + $0x30]] }
 0x1b2   : > { %v1540_v18 = vmul.f32 %v1538_v23, %v2659_v46  ;;  %v1333_v39 = vmul.f32 %v1332_v11, %v2992_v51  ;;  %v1584_v23 = vmul.f32 %v1582_v59, %v2677_v54  ;;  %v1598_v59 = vmul.f32 %v1596_v3, %v2677_v54 }
 0x1b3   : > { %v1192_v14 = vpop.permute.xlu1 %1191  ;;  %v3100_v22 = vpop.permute.xlu0 %693  ;;  %v968_v32 = vadd.f32 %v966_v30, %v942_v13  ;;  %v1309_v25 = vadd.f32 %v2849_v19, %v1253_v48  ;;  %v1640_v3 = vmul.f32 %v1638_v35, %v2677_v54  ;;  %v1654_v35 = vmul.f32 %v1652_v27, %v2677_v54 }
 0x1b5   : > { %1473 = vrot.lane.b32.xlu1 %v1468_v28, %s2474_s21  ;;  %1587 = vrot.lane.b32.xlu0 %v1583_v24, %s2468_s5  ;;  %v1653_v28 = vmul.f32 %v1652_v27, %v2638_v36  ;;  %v3146_v24 = vld [vmem:[#allocation2 + $0x1d] sm:$0xff]  ;;  %v1026_v21 = vadd.f32 %v3059_v56, %v968_v32  ;;  %v1335_v19 = vadd.f32 %v1333_v39, %v1309_v25 }
 0x1b7   : > { %v3113_v37 = vpop.permute.xlu1 %623  ;;  %v3115_v38 = vpop.permute.xlu0 %735  ;;  %v1082_v12 = vadd.f32 %v3072_v10, %v1026_v21  ;;  %v1393_v10 = vadd.f32 %v2858_v26, %v1335_v19  ;;  %v3201_v19 = vld [vmem:[#allocation2 + $0x25] sm:$0xff] }
 0x1b8   : > { %3689 = vst [vmem:[#allocation20_spill] sm:$0xff] %v3201_v19 }
 0x1b9   : > { %1489 = vrot.lane.b32.xlu1 %v1484_v15, %s2471_s14  ;;  %1601 = vrot.lane.b32.xlu0 %v1597_v53, %s2468_s5  ;;  %s3149_s14 = sld [smem:[#allocation4 + $0x5d]]  ;;  %v1721_v15 = vmul.f32 %v1720_v16, %v3146_v24  ;;  %v1734_v53 = vstv %s3134_s23  ;;  %v1140_v56 = vadd.f32 %v3085_v63, %v1082_v12  ;;  %v1449_v63 = vadd.f32 %v2869_v34, %v1393_v10  ;;  %s3341_s23 = sld [smem:[#allocation4 + $0x34]] }
 0x1ba   : > { %v1834_v12 = vstv %s3176_s25  ;;  %s3367_s25 = sld [smem:[#allocation4 + $0x40]] }
 0x1bb   : > { %v3127_v47 = vpop.permute.xlu1 %637  ;;  %v3129_v4 = vpop.permute.xlu0 %751  ;;  %v1196_v13 = vadd.f32 %v1192_v14, %v1140_v56  ;;  %v1507_v34 = vadd.f32 %v2880_v42, %v1449_v63  ;;  %v1835_v56 = vmul.f32 %v1834_v12, %v2656_v44  ;;  %v1700_v63 = vstv %s3209_s27  ;;  %s3393_s27 = sld [smem:[#allocation4 + $0x1e]] }
 0x1bd   : > { %1531 = vrot.lane.b32.xlu1 %v1526_v45, %s2472_s16  ;;  %1643 = vrot.lane.b32.xlu0 %v1639_v40, %s2469_s7  ;;  %v1735_v45 = vmul.f32 %v1734_v53, %v3146_v24  ;;  %v1254_v26 = vadd.f32 %v2878_v41, %v1196_v13  ;;  %v1563_v42 = vadd.f32 %v2891_v50, %v1507_v34  ;;  %v716_v34 = vstv %s3219_s28  ;;  %s3406_s28 = sld [smem:[#allocation4 + $0x48]] }
 0x1bf   : > { %v3140_v7 = vpop.permute.xlu1 %681  ;;  %v3142_v43 = vpop.permute.xlu0 %793  ;;  %v1778_v40 = vstv %s3149_s14  ;;  %v1310_v41 = vadd.f32 %v2889_v49, %v1254_v26  ;;  %s3343_s14 = sld [smem:[#allocation4 + $0x2]] }
 0x1c0   : > { %v1779_v25 = vmul.f32 %v1778_v40, %v2656_v44 }
 0x1c1   : > { %1545 = vrot.lane.b32.xlu1 %v1540_v18, %s2472_s16  ;;  %1657 = vrot.lane.b32.xlu0 %v1653_v28, %s2469_s7  ;;  %v1792_v18 = vstv %s3163_s24  ;;  %s3354_s24 = sld [smem:[#allocation4 + $0x3c]] }
 0x1c2   : > { %v1793_v21 = vmul.f32 %v1792_v18, %v2656_v44  ;;  %v1621_v44 = vadd.f32 %v2902_v58, %v1563_v42 }
 0x1c3   : > { %v3156_v46 = vpop.permute.xlu1 %695  ;;  %v3158_v36 = vpop.permute.xlu0 %807 }
 0x1c4   : > { %v1677_v58 = vadd.f32 %v2915_v2, %v1621_v44 }
 0x1c5   : > { %1589 = vrot.lane.b32.xlu1 %v1584_v23, %s2468_s5  ;;  %1725 = vrot.lane.b32.xlu0 %v1721_v15, %s2473_s11  ;;  %v1334_v23 = vmul.f32 %v1332_v11, %v3041_v5  ;;  %v1722_v15 = vmul.f32 %v1720_v16, %v3201_v19  ;;  %v602_v11 = vstv %s3189_s26  ;;  %s3373_s26 = sld [smem:[#allocation4 + $0x1d]] }
 0x1c6   : > { %v603_v16 = vmul.f32 %v602_v11, %v2764_v33 }
 0x1c7   : > { %v3169_v48 = vpop.permute.xlu1 %737  ;;  %v3171_v30 = vpop.permute.xlu0 %851  ;;  %v1336_v49 = vadd.f32 %v1334_v23, %v1310_v41  ;;  %v1701_v41 = vmul.f32 %v1700_v63, %v3146_v24  ;;  %v1794_v23 = vmul.f32 %v1792_v18, %v2695_v62 }
 0x1c9   : > { %1603 = vrot.lane.b32.xlu1 %v1598_v59, %s2468_s5  ;;  %1739 = vrot.lane.b32.xlu0 %v1735_v45, %s2473_s11  ;;  %s3204_s5 = sld [smem:[#allocation4 + $0x8]]  ;;  %v1394_v50 = vadd.f32 %v2900_v57, %v1336_v49  ;;  %v1736_v59 = vmul.f32 %v1734_v53, %v3201_v19  ;;  %v1780_v53 = vmul.f32 %v1778_v40, %v2695_v62  ;;  %v774_v49 = vstv %s3232_s29  ;;  %s3420_s29 = sld [smem:[#allocation4 + $0x4c]] }
 0x1ca   : > { %v717_v40 = vmul.f32 %v716_v34, %v2674_v52  ;;  %v1703_v42 = vadd.f32 %v1701_v41, %v1677_v58  ;;  %v775_v18 = vmul.f32 %v774_v49, %v2692_v60 }
 0x1cb   : > { %v3182_v14 = vpop.permute.xlu1 %753  ;;  %v3184_v32 = vpop.permute.xlu0 %865  ;;  %v1450_v57 = vadd.f32 %v2913_v1, %v1394_v50 }
 0x1cd   : > { %1645 = vrot.lane.b32.xlu1 %v1640_v3, %s2469_s7  ;;  %1783 = vrot.lane.b32.xlu0 %v1779_v25, %s2470_s12  ;;  %v1508_v1 = vadd.f32 %v2924_v8, %v1450_v57 }
 0x1cf   : > { %v3195_v28 = vpop.permute.xlu1 %795  ;;  %v3197_v39 = vpop.permute.xlu0 %907  ;;  %v660_v45 = vstv %s3204_s5  ;;  %v1564_v2 = vadd.f32 %v2935_v17, %v1508_v1  ;;  %s3387_s5 = sld [smem:[#allocation4 + $0x44]] }
 0x1d0   : > { %v661_v25 = vmul.f32 %v660_v45, %v2674_v52  ;;  %v1761_v52 = vadd.f32 %v2926_v9, %v1703_v42  ;;  %v662_v57 = vmul.f32 %v660_v45, %v2713_v6  ;;  %v718_v45 = vmul.f32 %v716_v34, %v2713_v6  ;;  %v3694_v6 = vld [vmem:[#allocation16_spill] sm:$0xff] }
 0x1d1   : > { %1659 = vrot.lane.b32.xlu1 %v1654_v35, %s2469_s7  ;;  %1797 = vrot.lane.b32.xlu0 %v1793_v21, %s2470_s12 }
 0x1d3   : > { %v3212_v54 = vpop.permute.xlu1 %809  ;;  %v3214_v27 = vpop.permute.xlu0 %921 }
 0x1d5   : > { %1727 = vrot.lane.b32.xlu1 %v1722_v15, %s2473_s11  ;;  %1839 = vrot.lane.b32.xlu0 %v1835_v56, %s2474_s21  ;;  %v1836_v56 = vmul.f32 %v1834_v12, %v2695_v62  ;;  %v1622_v62 = vadd.f32 %v2946_v29, %v1564_v2  ;;  %v830_v12 = vstv %s3257_s30  ;;  %v1702_v29 = vmul.f32 %v1700_v63, %v3201_v19  ;;  %v3693_v2 = vld [vmem:[#allocation10_spill] sm:$0xff]  ;;  %s3439_s30 = sld [smem:[#allocation4 + $0x50]] }
 0x1d7   : > { %v3224_v10 = vpop.permute.xlu1 %853  ;;  %v3226_v13 = vpop.permute.xlu0 %989 }
 0x1d9   : > { %1741 = vrot.lane.b32.xlu1 %v1736_v59, %s2473_s11  ;;  %607 = vrot.lane.b32.xlu0 %v603_v16, %s2473_s11  ;;  %v604_v59 = vmul.f32 %v602_v11, %v2799_v55  ;;  %v1817_v16 = vadd.f32 %v2937_v20, %v1761_v52  ;;  %v831_v11 = vmul.f32 %v830_v12, %v2692_v60  ;;  %v3691_v60 = vld [vmem:[#allocation8_spill] sm:$0xff]  ;;  %v1028_v52 = vstv %s3293_s6  ;;  %s3477_s6 = sld [smem:[#allocation4 + $0x3a]] }
 0x1db   : > { %v3238_v26 = vpop.permute.xlu1 %867  ;;  %v3240_v3 = vpop.permute.xlu0 %1003 }
 0x1dd   : > { %1785 = vrot.lane.b32.xlu1 %v1780_v53, %s2470_s12  ;;  %665 = vrot.lane.b32.xlu0 %v661_v25, %s2470_s12  ;;  %v3690_v53 = vld [vmem:[#allocation15_spill] sm:$0xff]  ;;  %v888_v25 = vstv %s3269_s3  ;;  %s3451_s3 = sld [smem:[#allocation4 + $0x39]] }
 0x1de   : > { %v1678_v20 = vadd.f32 %v3690_v53, %v1622_v62  ;;  %v889_v1 = vmul.f32 %v888_v25, %v3691_v60  ;;  %v3695_v62 = vld [vmem:[#allocation17_spill] sm:$0xff]  ;;  %v1084_v53 = vstv %s3305_s13  ;;  %s3489_s13 = sld [smem:[#allocation4 + $0x5c]] }
 0x1df   : > { %v3250_v35 = vpop.permute.xlu1 %909  ;;  %v3252_v21 = vpop.permute.xlu0 %1047 }
 0x1e1   : > { %1799 = vrot.lane.b32.xlu1 %v1794_v23, %s2470_s12  ;;  %721 = vrot.lane.b32.xlu0 %v717_v40, %s2474_s21  ;;  %v1704_v23 = vadd.f32 %v1702_v29, %v1678_v20  ;;  %v970_v40 = vstv %s3281_s4  ;;  %s3462_s4 = sld [smem:[#allocation4 + $0x58]] }
 0x1e3   : > { %v3262_v8 = vpop.permute.xlu1 %923  ;;  %v3264_v15 = vpop.permute.xlu0 %1061  ;;  %v1762_v34 = vadd.f32 %v3694_v6, %v1704_v23 }
 0x1e5   : > { %1841 = vrot.lane.b32.xlu1 %v1836_v56, %s2474_s21  ;;  %779 = vrot.lane.b32.xlu0 %v775_v18, %s2472_s16  ;;  %v776_v56 = vmul.f32 %v774_v49, %v3693_v2  ;;  %v971_v18 = vmul.f32 %v970_v40, %v2862_v31 }
 0x1e7   : > { %v3273_v50 = vpop.permute.xlu1 %991  ;;  %v3275_v17 = vpop.permute.xlu0 %1103 }
 0x1e9   : > { %609 = vrot.lane.b32.xlu1 %v604_v59, %s2473_s11  ;;  %1859 = vrot.lane.b32.xlu0 %v1817_v16, %s2470_s12 }
 0x1eb   : > { %v3285_v9 = vpop.permute.xlu1 %1005  ;;  %v3287_v44 = vpop.permute.xlu0 %1119 }
 0x1ed   : > { %667 = vrot.lane.b32.xlu1 %v662_v57, %s2470_s12  ;;  %835 = vrot.lane.b32.xlu0 %v831_v11, %s2475_s8  ;;  %v1818_v57 = vadd.f32 %v3695_v62, %v1762_v34  ;;  %v3696_v11 = vld [vmem:[#allocation9_spill] sm:$0xff]  ;;  %v1198_v34 = vstv %s3328_s18  ;;  %v584_v62 = vstv %s3330_s19  ;;  %s3534_s18 = sld [smem:[#allocation4 + $0x55]]  ;;  %s3559_s19 = sld [smem:[#allocation4 + $0x56]] }
 0x1ee   : > { %v1029_v49 = vmul.f32 %v1028_v52, %v3696_v11  ;;  %v1085_v60 = vmul.f32 %v1084_v53, %v3696_v11 }
 0x1ef   : > { %v3298_v58 = vpop.permute.xlu1 %1049  ;;  %v3300_v41 = vpop.permute.xlu0 %1161 }
 0x1f1   : > { %723 = vrot.lane.b32.xlu1 %v718_v45, %s2474_s21  ;;  %893 = vrot.lane.b32.xlu0 %v889_v1, %s2469_s7  ;;  %v832_v45 = vmul.f32 %v830_v12, %v3693_v2  ;;  %v1142_v1 = vstv %s3317_s15  ;;  %v3700_v12 = vld [vmem:[#allocation11_spill] sm:$0xff]  ;;  %s3509_s15 = sld [smem:[#allocation4 + $0x60]] }
 0x1f2   : > { %v1143_v2 = vmul.f32 %v1142_v1, %v3700_v12 }
 0x1f3   : > { %v3309_v42 = vpop.permute.xlu1 %1063  ;;  %v3311_v63 = vpop.permute.xlu0 %1175 }
 0x1f4   : > { %3692 = vst [vmem:[#allocation15_spill] sm:$0xff] %v3309_v42  ;;  %v1338_v42 = vstv %s3354_s24  ;;  %s2480_s24 = smov 77  }
 0x1f5   : > { %781 = vrot.lane.b32.xlu1 %v776_v56, %s2472_s16  ;;  %975 = vrot.lane.b32.xlu0 %v971_v18, %s2473_s11  ;;  %v3699_v18 = vld [vmem:[#allocation12_spill] sm:$0xff] }
 0x1f6   : > { %v890_v6 = vmul.f32 %v888_v25, %v3699_v18  ;;  %v1199_v25 = vmul.f32 %v1198_v34, %v3700_v12  ;;  %v590_v18 = vstv %s3343_s14  ;;  %v3703_v12 = vld [vmem:[#allocation13_spill] sm:$0xff]  ;;  %s2478_s14 = smov 45  }
 0x1f7   : > { %v3321_v59 = vpop.permute.xlu1 %1105  ;;  %v3323_v16 = vpop.permute.xlu0 %1219 }
 0x1f9   : > { %1861 = vrot.lane.b32.xlu1 %v1818_v57, %s2470_s12  ;;  %1033 = vrot.lane.b32.xlu0 %v1029_v49, %s2470_s12  ;;  %v972_v49 = vmul.f32 %v970_v40, %v2907_v0 }
 0x1fb   : > { %v3334_v20 = vpop.permute.xlu1 %1121  ;;  %v3336_v29 = vpop.permute.xlu0 %1233 }
 0x1fc   : > { %3697 = vst [vmem:[#allocation8_spill] sm:$0xff] %v3334_v20  ;;  %v2413_v20 = vld [vmem:[#allocation2 + $0x18] sm:$0xff] }
 0x1fd   : > { %837 = vrot.lane.b32.xlu1 %v832_v45, %s2475_s8  ;;  %1089 = vrot.lane.b32.xlu0 %v1085_v60, %s2474_s21  ;;  %v585_v45 = vmul.f32 %v584_v62, %v2764_v33  ;;  %v3674_v60 = vstv %s3341_s23 }
 0x1ff   : > { %v3347_v23 = vpop.permute.xlu1 %1163  ;;  %v3349_v56 = vpop.permute.xlu0 %1275 }
 0x200   : > { %3698 = vst [vmem:[#allocation10_spill] sm:$0xff] %v3347_v23  ;;  %v1257_v23 = vmul.f32 %v2413_v20, %v3674_v60 }
 0x201   : > { %895 = vrot.lane.b32.xlu1 %v890_v6, %s2469_s7  ;;  %1147 = vrot.lane.b32.xlu0 %v1143_v2, %s2472_s16  ;;  %v3702_v6 = vld [vmem:[#allocation18_spill] sm:$0xff] }
 0x202   : > { %v627_v2 = vadd.f32 %v3702_v6, %v585_v45  ;;  %v3704_v45 = vld [vmem:[#allocation19_spill] sm:$0xff] }
 0x203   : > { %v3359_v57 = vpop.permute.xlu1 %1177  ;;  %v3361_v11 = vpop.permute.xlu0 %1289 }
 0x204   : > { %3701 = vst [vmem:[#allocation16_spill] sm:$0xff] %v3359_v57  ;;  %v1030_v57 = vmul.f32 %v1028_v52, %v3703_v12 }
 0x205   : > { %977 = vrot.lane.b32.xlu1 %v972_v49, %s2473_s11  ;;  %1203 = vrot.lane.b32.xlu0 %v1199_v25, %s2475_s8  ;;  %v591_v49 = vmul.f32 %v590_v18, %v2764_v33  ;;  %v685_v25 = vadd.f32 %v3087_v61, %v627_v2  ;;  %v1086_v33 = vmul.f32 %v1084_v53, %v3703_v12  ;;  %v1396_v2 = vstv %s3367_s25  ;;  %s2481_s25 = smov 93  }
 0x206   : > { %v1339_v61 = vmul.f32 %v1338_v42, %v2992_v51  ;;  %v952_v12 = vstv %s3373_s26  ;;  %s2482_s26 = smov 109  }
 0x207   : > { %v3375_v19 = vpop.permute.xlu1 %1221  ;;  %v3377_v40 = vpop.permute.xlu0 %1357  ;;  %v641_v6 = vadd.f32 %v3704_v45, %v591_v49  ;;  %v741_v52 = vadd.f32 %v3115_v38, %v685_v25  ;;  %v2414_v45 = vld [vmem:[#allocation2 + $0x1a] sm:$0xff] }
 0x209   : > { %1035 = vrot.lane.b32.xlu1 %v1030_v57, %s2470_s12  ;;  %1261 = vrot.lane.b32.xlu0 %v1257_v23, %s2469_s7  ;;  %v699_v57 = vadd.f32 %v3100_v22, %v641_v6  ;;  %v799_v23 = vadd.f32 %v3142_v43, %v741_v52  ;;  %v3705_v43 = vld [vmem:[#allocation14_spill] sm:$0xff]  ;;  %v1397_v6 = vmul.f32 %v2414_v45, %v1396_v2 }
 0x20a   : > { %v1144_v25 = vmul.f32 %v1142_v1, %v3705_v43  ;;  %v953_v1 = vmul.f32 %v952_v12, %v2862_v31 }
 0x20b   : > { %v3395_v20 = vpop.permute.xlu1 %1235  ;;  %v3397_v60 = vpop.permute.xlu0 %1371  ;;  %v757_v38 = vadd.f32 %v3129_v4, %v699_v57  ;;  %v857_v53 = vadd.f32 %v3171_v30, %v799_v23 }
 0x20d   : > { %1091 = vrot.lane.b32.xlu1 %v1086_v33, %s2474_s21  ;;  %1343 = vrot.lane.b32.xlu0 %v1339_v61, %s2473_s11  ;;  %v813_v52 = vadd.f32 %v3158_v36, %v757_v38  ;;  %v913_v4 = vadd.f32 %v3197_v39, %v857_v53  ;;  %v1452_v33 = vstv %s3387_s5  ;;  %v958_v61 = vstv %s3393_s27  ;;  %s157_s27 = scalar_lea.vmem %s3657_s2, %s2358_s17 }
 0x20e   : > { %v1200_v36 = vmul.f32 %v1198_v34, %v3705_v43  ;;  %v1453_v39 = vmul.f32 %v2414_v45, %v1452_v33  ;;  %v586_v38 = vmul.f32 %v584_v62, %v2799_v55  ;;  %v959_v45 = vmul.f32 %v958_v61, %v2862_v31 }
 0x20f   : > { %v3413_v49 = vpop.permute.xlu1 %1277  ;;  %v3415_v22 = vpop.permute.xlu0 %1415  ;;  %v871_v30 = vadd.f32 %v3184_v32, %v813_v52  ;;  %v955_v53 = vadd.f32 %v953_v1, %v913_v4  ;;  %v2416_v4 = vld [vmem:[#allocation2 + $0x1b] sm:$0xff]  ;;  %v1566_v1 = vstv %s3420_s29 }
 0x210   : > { %v628_v34 = vadd.f32 %v3113_v37, %v586_v38  ;;  %v3464_v37 = vld [vmem:[#allocation2 + $0x8] sm:$0xff] }
 0x211   : > { %1149 = vrot.lane.b32.xlu1 %v1144_v25, %s2472_s16  ;;  %1401 = vrot.lane.b32.xlu0 %v1397_v6, %s2470_s12  ;;  %v927_v32 = vadd.f32 %v3214_v27, %v871_v30  ;;  %v1510_v25 = vstv %s3406_s28  ;;  %v995_v43 = vadd.f32 %v3226_v13, %v955_v53  ;;  %v2415_v27 = vld [vmem:[#allocation2 + $0x20] sm:$0xff]  ;;  %v3706_v6 = vstv %s3341_s23  ;;  %s2477_s23 = smov 29  }
 0x212   : > { %v1258_v52 = vmul.f32 %v2415_v27, %v3706_v6  ;;  %v1511_v30 = vmul.f32 %v2416_v4, %v1510_v25  ;;  %v592_v31 = vmul.f32 %v3464_v37, %v590_v18  ;;  %v686_v13 = vadd.f32 %v3140_v7, %v628_v34 }
 0x213   : > { %v3432_v57 = vpop.permute.xlu1 %1291  ;;  %v3434_v23 = vpop.permute.xlu0 %1429  ;;  %v1624_v34 = vstv %s3439_s30 }
 0x214   : > { %v642_v38 = vadd.f32 %v3127_v47, %v592_v31  ;;  %v742_v53 = vadd.f32 %v3169_v48, %v686_v13 }
 0x215   : > { %1205 = vrot.lane.b32.xlu1 %v1200_v36, %s2475_s8  ;;  %1457 = vrot.lane.b32.xlu0 %v1453_v39, %s2474_s21  ;;  %v961_v36 = vadd.f32 %v959_v45, %v927_v32  ;;  %v1053_v39 = vadd.f32 %v3252_v21, %v995_v43  ;;  %v1340_v21 = vmul.f32 %v1338_v42, %v3041_v5 }
 0x216   : > { %v1567_v32 = vmul.f32 %v2416_v4, %v1566_v1  ;;  %v700_v47 = vadd.f32 %v3156_v46, %v642_v38  ;;  %v800_v48 = vadd.f32 %v3195_v28, %v742_v53 }
 0x217   : > { %v3453_v55 = vpop.permute.xlu1 %1359  ;;  %v3455_v62 = vpop.permute.xlu0 %1471  ;;  %v1009_v27 = vadd.f32 %v3240_v3, %v961_v36  ;;  %v1109_v6 = vadd.f32 %v3275_v17, %v1053_v39  ;;  %v954_v36 = vmul.f32 %v952_v12, %v2907_v0 }
 0x218   : > { %v758_v42 = vadd.f32 %v3182_v14, %v700_v47  ;;  %v858_v43 = vadd.f32 %v3224_v10, %v800_v48  ;;  %v1706_v14 = vstv %s3462_s4 }
 0x219   : > { %1263 = vrot.lane.b32.xlu1 %v1258_v52, %s2469_s7  ;;  %1515 = vrot.lane.b32.xlu0 %v1511_v30, %s2472_s16  ;;  %v1067_v3 = vadd.f32 %v3264_v15, %v1009_v27  ;;  %v1167_v17 = vadd.f32 %v3300_v41, %v1109_v6  ;;  %v1320_v52 = vstv %s3451_s3  ;;  %v2418_v15 = vld [vmem:[#allocation2 + $0x22] sm:$0xff]  ;;  %v1707_v53 = vmul.f32 %v1706_v14, %v3146_v24 }
 0x21a   : > { %v1398_v41 = vmul.f32 %v2418_v15, %v1396_v2  ;;  %v2419_v30 = vld [vmem:[#allocation2 + $0x1c] sm:$0xff]  ;;  %v814_v10 = vadd.f32 %v3212_v54, %v758_v42  ;;  %v1321_v54 = vmul.f32 %v1320_v52, %v2992_v51  ;;  %v1454_v38 = vmul.f32 %v2418_v15, %v1452_v33 }
 0x21b   : > { %v3479_v18 = vpop.permute.xlu1 %1373  ;;  %v3481_v7 = vpop.permute.xlu0 %1487  ;;  %v1125_v45 = vadd.f32 %v3287_v44, %v1067_v3  ;;  %v1225_v46 = vadd.f32 %v3323_v16, %v1167_v17  ;;  %v1625_v31 = vmul.f32 %v2419_v30, %v1624_v34  ;;  %v914_v44 = vadd.f32 %v3250_v35, %v858_v43  ;;  %v2420_v3 = vld [vmem:[#allocation2 + $0x23] sm:$0xff] }
 0x21c   : > { %v872_v2 = vadd.f32 %v3238_v26, %v814_v10  ;;  %v1326_v35 = vstv %s3477_s6  ;;  %v1764_v26 = vstv %s3489_s13  ;;  %v2421_v17 = vld [vmem:[#allocation2 + $0x1e] sm:$0xff]  ;;  %v1688_v30 = vstv %s3534_s18 }
 0x21d   : > { %1345 = vrot.lane.b32.xlu1 %v1340_v21, %s2473_s11  ;;  %1571 = vrot.lane.b32.xlu0 %v1567_v32, %s2475_s8  ;;  %v1181_v16 = vadd.f32 %v3311_v63, %v1125_v45  ;;  %v1281_v13 = vadd.f32 %v3349_v56, %v1225_v46  ;;  %v956_v12 = vadd.f32 %v954_v36, %v914_v44  ;;  %v3708_v44 = vld [vmem:[#allocation10_spill] sm:$0xff] }
 0x21e   : > { %v960_v21 = vmul.f32 %v958_v61, %v2907_v0  ;;  %v1327_v47 = vmul.f32 %v1326_v35, %v2992_v51  ;;  %v1765_v42 = vmul.f32 %v2421_v17, %v1764_v26 }
 0x21f   : > { %v3502_v28 = vpop.permute.xlu1 %1417  ;;  %v1530_v4 = vpop.permute.xlu0 %1529  ;;  %v1239_v39 = vadd.f32 %v3336_v29, %v1181_v16  ;;  %v928_v29 = vadd.f32 %v3262_v8, %v872_v2  ;;  %v1323_v6 = vadd.f32 %v1321_v54, %v1281_v13  ;;  %v996_v33 = vadd.f32 %v3273_v50, %v956_v12  ;;  %v2422_v54 = vld [vmem:[#allocation2 + $0x24] sm:$0xff] }
 0x220   : > { %v1820_v50 = vstv %s3509_s15 }
 0x221   : > { %1403 = vrot.lane.b32.xlu1 %v1398_v41, %s2470_s12  ;;  %1629 = vrot.lane.b32.xlu0 %v1625_v31, %s2469_s7  ;;  %v1295_v27 = vadd.f32 %v3361_v11, %v1239_v39  ;;  %v1363_v32 = vadd.f32 %v3377_v40, %v1323_v6  ;;  %v1512_v11 = vmul.f32 %v2420_v3, %v1510_v25  ;;  %v3707_v31 = vld [vmem:[#allocation15_spill] sm:$0xff] }
 0x222   : > { %v962_v43 = vadd.f32 %v960_v21, %v928_v29  ;;  %v1054_v0 = vadd.f32 %v3298_v58, %v996_v33  ;;  %v1568_v58 = vmul.f32 %v2420_v3, %v1566_v1  ;;  %v1322_v6 = vmul.f32 %v1320_v52, %v3041_v5 }
 0x223   : > { %v3526_v63 = vpop.permute.xlu1 %1431  ;;  %v1544_v56 = vpop.permute.xlu0 %1543  ;;  %v1329_v40 = vadd.f32 %v1327_v47, %v1295_v27  ;;  %v1421_v61 = vadd.f32 %v3415_v22, %v1363_v32  ;;  %v1821_v22 = vmul.f32 %v2421_v17, %v1820_v50  ;;  %v3711_v47 = vld [vmem:[#allocation20_spill] sm:$0xff]  ;;  %v1328_v52 = vmul.f32 %v1326_v35, %v3041_v5 }
 0x224   : > { %v1010_v51 = vadd.f32 %v3285_v9, %v962_v43  ;;  %v1110_v25 = vadd.f32 %v3321_v59, %v1054_v0  ;;  %v3709_v59 = vld [vmem:[#allocation8_spill] sm:$0xff]  ;;  %v2423_v0 = vld [vmem:[#allocation2 + $0x26] sm:$0xff] }
 0x225   : > { %1459 = vrot.lane.b32.xlu1 %v1454_v38, %s2474_s21  ;;  %1711 = vrot.lane.b32.xlu0 %v1707_v53, %s2473_s11  ;;  %v1377_v45 = vadd.f32 %v3397_v60, %v1329_v40  ;;  %v1477_v46 = vadd.f32 %v3455_v62, %v1421_v61  ;;  %v3710_v38 = vld [vmem:[#allocation16_spill] sm:$0xff] }
 0x226   : > { %v1068_v10 = vadd.f32 %v3707_v31, %v1010_v51  ;;  %v1168_v16 = vadd.f32 %v3708_v44, %v1110_v25  ;;  %v1690_v31 = vmul.f32 %v1688_v30, %v3711_v47 }
 0x227   : > { %v3548_v8 = vpop.permute.xlu1 %1473  ;;  %v1588_v48 = vpop.permute.xlu0 %1587  ;;  %v1435_v9 = vadd.f32 %v3434_v23, %v1377_v45  ;;  %v1535_v13 = vadd.f32 %v1530_v4, %v1477_v46  ;;  %v1626_v23 = vmul.f32 %v2422_v54, %v1624_v34  ;;  %v1689_v4 = vmul.f32 %v1688_v30, %v3146_v24 }
 0x228   : > { %v1126_v60 = vadd.f32 %v3709_v59, %v1068_v10  ;;  %v1226_v62 = vadd.f32 %v3375_v19, %v1168_v16  ;;  %v1694_v19 = vstv %s3559_s19  ;;  %v1822_v45 = vmul.f32 %v2423_v0, %v1820_v50 }
 0x229   : > { %1517 = vrot.lane.b32.xlu1 %v1512_v11, %s2472_s16  ;;  %1769 = vrot.lane.b32.xlu0 %v1765_v42, %s2470_s12  ;;  %v1493_v1 = vadd.f32 %v3481_v7, %v1435_v9  ;;  %v1593_v2 = vadd.f32 %v1588_v48, %v1535_v13  ;;  %v1708_v48 = vmul.f32 %v1706_v14, %v3711_v47 }
 0x22a   : > { %v1182_v53 = vadd.f32 %v3710_v38, %v1126_v60  ;;  %v1282_v29 = vadd.f32 %v3413_v49, %v1226_v62  ;;  %v1695_v11 = vmul.f32 %v1694_v19, %v3146_v24  ;;  %v1766_v14 = vmul.f32 %v2423_v0, %v1764_v26 }
 0x22b   : > { %v1490_v15 = vpop.permute.xlu1 %1489  ;;  %v1602_v41 = vpop.permute.xlu0 %1601  ;;  %v1549_v12 = vadd.f32 %v1544_v56, %v1493_v1  ;;  %v1696_v16 = vmul.f32 %v1694_v19, %v3711_v47 }
 0x22c   : > { %v1240_v7 = vadd.f32 %v3395_v20, %v1182_v53  ;;  %v1324_v56 = vadd.f32 %v1322_v6, %v1282_v29 }
 0x22d   : > { %1573 = vrot.lane.b32.xlu1 %v1568_v58, %s2475_s8  ;;  %1825 = vrot.lane.b32.xlu0 %v1821_v22, %s2474_s21  ;;  %v1607_v33 = vadd.f32 %v1602_v41, %v1549_v12  ;;  %s2476_s8 = smov 13  }
 0x22e   : > { %v1296_v49 = vadd.f32 %v3432_v57, %v1240_v7  ;;  %v1364_v20 = vadd.f32 %v3453_v55, %v1324_v56 }
 0x22f   : > { %v1532_v36 = vpop.permute.xlu1 %1531  ;;  %v1644_v39 = vpop.permute.xlu0 %1643 }
 0x230   : > { %v1649_v27 = vadd.f32 %v1644_v39, %v1593_v2  ;;  %v1330_v40 = vadd.f32 %v1328_v52, %v1296_v49  ;;  %v1422_v57 = vadd.f32 %v3502_v28, %v1364_v20  ;;  %v2424_v2 = vld [vmem:[#allocation2] sm:$0xff] }
 0x231   : > { %1631 = vrot.lane.b32.xlu1 %v1626_v23, %s2469_s7 }
 0x232   : > { %v1691_v34 = vadd.f32 %v1689_v4, %v1649_v27  ;;  %v1378_v61 = vadd.f32 %v3479_v18, %v1330_v40  ;;  %v1478_v51 = vadd.f32 %v3548_v8, %v1422_v57 }
 0x233   : > { %v1546_v21 = vpop.permute.xlu1 %1545  ;;  %v1658_v32 = vpop.permute.xlu0 %1657 }
 0x234   : > { %v1663_v3 = vadd.f32 %v1658_v32, %v1607_v33  ;;  %v1436_v5 = vadd.f32 %v3526_v63, %v1378_v61  ;;  %v1536_v35 = vadd.f32 %v1532_v36, %v1478_v51 }
 0x235   : > { %1713 = vrot.lane.b32.xlu1 %v1708_v48, %s2473_s11  ;;  %s3610_s11 = sld [smem:[#allocation4]] }
 0x236   : > { %v1697_v17 = vadd.f32 %v1695_v11, %v1663_v3  ;;  %v1494_v46 = vadd.f32 %v1490_v15, %v1436_v5  ;;  %v2425_v5 = vld [vmem:[#allocation2 + $0x4] sm:$0xff] }
 0x237   : > { %v1590_v42 = vpop.permute.xlu1 %1589  ;;  %v1726_v43 = vpop.permute.xlu0 %1725 }
 0x238   : > { %v1594_v26 = vadd.f32 %v1590_v42, %v1536_v35  ;;  %v1550_v28 = vadd.f32 %v1546_v21, %v1494_v46  ;;  %v1731_v44 = vadd.f32 %v1726_v43, %v1691_v34 }
 0x239   : > { %1771 = vrot.lane.b32.xlu1 %v1766_v14, %s2470_s12 }
 0x23b   : > { %v1604_v25 = vpop.permute.xlu1 %1603  ;;  %v1740_v55 = vpop.permute.xlu0 %1739  ;;  %v578_v62 = vstv %s3610_s11 }
 0x23c   : > { %v1608_v18 = vadd.f32 %v1604_v25, %v1550_v28  ;;  %v579_v36 = vmul.f32 %v2424_v2, %v578_v62  ;;  %v1745_v6 = vadd.f32 %v1740_v55, %v1697_v17  ;;  %v580_v49 = vmul.f32 %v3464_v37, %v578_v62 }
 0x23d   : > { %1827 = vrot.lane.b32.xlu1 %v1822_v45, %s2474_s21  ;;  %s3618_s21 = sld [smem:[#allocation4 + $0x1c]] }
 0x23f   : > { %v1646_v41 = vpop.permute.xlu1 %1645  ;;  %v1784_v58 = vpop.permute.xlu0 %1783 }
 0x240   : > { %v1650_v22 = vadd.f32 %v1646_v41, %v1594_v26  ;;  %v1789_v9 = vadd.f32 %v1784_v58, %v1731_v44 }
 0x242   : > { %v1692_v8 = vadd.f32 %v1690_v31, %v1650_v22 }
 0x243   : > { %v1660_v10 = vpop.permute.xlu1 %1659  ;;  %v1798_v50 = vpop.permute.xlu0 %1797  ;;  %v946_v51 = vstv %s3618_s21 }
 0x244   : > { %v1664_v63 = vadd.f32 %v1660_v10, %v1608_v18  ;;  %v1803_v21 = vadd.f32 %v1798_v50, %v1745_v6  ;;  %v947_v35 = vmul.f32 %v2425_v5, %v946_v51 }
 0x246   : > { %v1698_v15 = vadd.f32 %v1696_v16, %v1664_v63 }
 0x247   : > { %v1728_v13 = vpop.permute.xlu1 %1727  ;;  %v1840_v59 = vpop.permute.xlu0 %1839 }
 0x248   : > { %v1845_v60 = vadd.f32 %v1840_v59, %v1789_v9  ;;  %v1732_v29 = vadd.f32 %v1728_v13, %v1692_v8 }
 0x24a   : > { %1849 = vrot.lane.b32.xlu0 %v1845_v60, %s2470_s12  ;;  %v2426_v60 = vld [vmem:[#allocation2 + $0xc] sm:$0xff] }
 0x24b   : > { %v1742_v30 = vpop.permute.xlu1 %1741  ;;  %v608_v1 = vpop.permute.xlu0 %607  ;;  %v948_v62 = vmul.f32 %v2426_v60, %v946_v51 }
 0x24c   : > { %v613_v39 = vadd.f32 %v608_v1, %v579_v36  ;;  %v1746_v40 = vadd.f32 %v1742_v30, %v1698_v15  ;;  %v2427_v1 = vld [vmem:[#allocation2 + $0x19] sm:$0xff] }
 0x24f   : > { %v1786_v54 = vpop.permute.xlu1 %1785  ;;  %v666_v23 = vpop.permute.xlu0 %665 }
 0x250   : > { %v671_v4 = vadd.f32 %v666_v23, %v613_v39  ;;  %v1790_v27 = vadd.f32 %v1786_v54, %v1732_v29 }
 0x253   : > { %v1800_v38 = vpop.permute.xlu1 %1799  ;;  %v722_v53 = vpop.permute.xlu0 %721 }
 0x254   : > { %v727_v12 = vadd.f32 %v722_v53, %v671_v4  ;;  %v1804_v37 = vadd.f32 %v1800_v38, %v1746_v40 }
 0x257   : > { %v1842_v19 = vpop.permute.xlu1 %1841  ;;  %v780_v7 = vpop.permute.xlu0 %779 }
 0x258   : > { %v1846_v33 = vadd.f32 %v1842_v19, %v1790_v27  ;;  %v785_v34 = vadd.f32 %v780_v7, %v727_v12 }
 0x25a   : > { %1851 = vrot.lane.b32.xlu1 %v1846_v33, %s2470_s12  ;;  %s3622_s12 = sld [smem:[#allocation4 + $0x38]] }
 0x25b   : > { %v610_v32 = vpop.permute.xlu1 %609  ;;  %v1860_v48 = vpop.permute.xlu0 %1859 }
 0x25c   : > { %v1865_v56 = vadd.f32 %v1860_v48, %v1803_v21  ;;  %v614_v3 = vadd.f32 %v610_v32, %v580_v49  ;;  %v2428_v49 = vld [vmem:[#allocation2 + $0x21] sm:$0xff] }
 0x25e   : > { %1869 = vrot.lane.b32.xlu0 %v1865_v56, %s2472_s16 }
 0x25f   : > { %v668_v11 = vpop.permute.xlu1 %667  ;;  %v836_v20 = vpop.permute.xlu0 %835 }
 0x260   : > { %v672_v52 = vadd.f32 %v668_v11, %v614_v3  ;;  %v841_v57 = vadd.f32 %v836_v20, %v785_v34  ;;  %v1314_v16 = vstv %s3622_s12 }
 0x261   : > { %v1315_v2 = vmul.f32 %v2427_v1, %v1314_v16  ;;  %v1316_v56 = vmul.f32 %v2428_v49, %v1314_v16 }
 0x263   : > { %v724_v17 = vpop.permute.xlu1 %723  ;;  %v894_v42 = vpop.permute.xlu0 %893 }
 0x264   : > { %v728_v43 = vadd.f32 %v724_v17, %v672_v52  ;;  %v899_v25 = vadd.f32 %v894_v42, %v841_v57 }
 0x266   : > { %v949_v26 = vadd.f32 %v947_v35, %v899_v25 }
 0x267   : > { %v782_v0 = vpop.permute.xlu1 %781  ;;  %v976_v14 = vpop.permute.xlu0 %975 }
 0x268   : > { %v786_v61 = vadd.f32 %v782_v0, %v728_v43  ;;  %v981_v28 = vadd.f32 %v976_v14, %v949_v26 }
 0x26b   : > { %v1862_v55 = vpop.permute.xlu1 %1861  ;;  %v1034_v45 = vpop.permute.xlu0 %1033 }
 0x26c   : > { %v1866_v46 = vadd.f32 %v1862_v55, %v1804_v37  ;;  %v1039_v18 = vadd.f32 %v1034_v45, %v981_v28 }
 0x26e   : > { %1871 = vrot.lane.b32.xlu1 %v1866_v46, %s2472_s16  ;;  %s3625_s16 = sld [smem:[#allocation4 + $0x54]] }
 0x26f   : > { %v838_v41 = vpop.permute.xlu1 %837  ;;  %v1090_v58 = vpop.permute.xlu0 %1089 }
 0x270   : > { %v1095_v8 = vadd.f32 %v1090_v58, %v1039_v18  ;;  %v842_v44 = vadd.f32 %v838_v41, %v786_v61 }
 0x273   : > { %v896_v22 = vpop.permute.xlu1 %895  ;;  %v1148_v31 = vpop.permute.xlu0 %1147 }
 0x274   : > { %v1153_v63 = vadd.f32 %v1148_v31, %v1095_v8  ;;  %v900_v9 = vadd.f32 %v896_v22, %v842_v44  ;;  %v1682_v42 = vstv %s3625_s16 }
 0x275   : > { %v1683_v57 = vmul.f32 %v1682_v42, %v3146_v24  ;;  %v1684_v58 = vmul.f32 %v1682_v42, %v3711_v47 }
 0x276   : > { %v950_v36 = vadd.f32 %v948_v62, %v900_v9 }
 0x277   : > { %v978_v10 = vpop.permute.xlu1 %977  ;;  %v1204_v50 = vpop.permute.xlu0 %1203 }
 0x278   : > { %v1209_v15 = vadd.f32 %v1204_v50, %v1153_v63  ;;  %v982_v4 = vadd.f32 %v978_v10, %v950_v36 }
 0x27b   : > { %v1036_v13 = vpop.permute.xlu1 %1035  ;;  %v1262_v59 = vpop.permute.xlu0 %1261 }
 0x27c   : > { %v1267_v30 = vadd.f32 %v1262_v59, %v1209_v15  ;;  %v1040_v29 = vadd.f32 %v1036_v13, %v982_v4 }
 0x27e   : > { %v1317_v39 = vadd.f32 %v1315_v2, %v1267_v30 }
 0x27f   : > { %v1092_v54 = vpop.permute.xlu1 %1091  ;;  %v1344_v23 = vpop.permute.xlu0 %1343 }
 0x280   : > { %v1096_v12 = vadd.f32 %v1092_v54, %v1040_v29  ;;  %v1349_v6 = vadd.f32 %v1344_v23, %v1317_v39 }
 0x283   : > { %v1150_v38 = vpop.permute.xlu1 %1149  ;;  %v1402_v53 = vpop.permute.xlu0 %1401 }
 0x284   : > { %v1154_v7 = vadd.f32 %v1150_v38, %v1096_v12  ;;  %v1407_v32 = vadd.f32 %v1402_v53, %v1349_v6 }
 0x287   : > { %v1206_v27 = vpop.permute.xlu1 %1205  ;;  %v1458_v19 = vpop.permute.xlu0 %1457 }
 0x288   : > { %v1210_v33 = vadd.f32 %v1206_v27, %v1154_v7  ;;  %v1463_v3 = vadd.f32 %v1458_v19, %v1407_v32 }
 0x28b   : > { %v1264_v34 = vpop.permute.xlu1 %1263  ;;  %v1516_v21 = vpop.permute.xlu0 %1515 }
 0x28c   : > { %v1268_v48 = vadd.f32 %v1264_v34, %v1210_v33  ;;  %v1521_v17 = vadd.f32 %v1516_v21, %v1463_v3 }
 0x28e   : > { %v1318_v11 = vadd.f32 %v1316_v56, %v1268_v48 }
 0x28f   : > { %v1346_v20 = vpop.permute.xlu1 %1345  ;;  %v1572_v52 = vpop.permute.xlu0 %1571 }
 0x290   : > { %v1577_v43 = vadd.f32 %v1572_v52, %v1521_v17  ;;  %v1350_v37 = vadd.f32 %v1346_v20, %v1318_v11 }
 0x293   : > { %v1404_v0 = vpop.permute.xlu1 %1403  ;;  %v1630_v14 = vpop.permute.xlu0 %1629 }
 0x294   : > { %v1635_v40 = vadd.f32 %v1630_v14, %v1577_v43  ;;  %v1408_v55 = vadd.f32 %v1404_v0, %v1350_v37 }
 0x296   : > { %v1685_v61 = vadd.f32 %v1683_v57, %v1635_v40 }
 0x297   : > { %v1460_v51 = vpop.permute.xlu1 %1459  ;;  %v1712_v22 = vpop.permute.xlu0 %1711 }
 0x298   : > { %v1464_v45 = vadd.f32 %v1460_v51, %v1408_v55  ;;  %v1717_v8 = vadd.f32 %v1712_v22, %v1685_v61 }
 0x29b   : > { %v1518_v25 = vpop.permute.xlu1 %1517  ;;  %v1770_v31 = vpop.permute.xlu0 %1769 }
 0x29c   : > { %v1522_v35 = vadd.f32 %v1518_v25, %v1464_v45  ;;  %v1775_v10 = vadd.f32 %v1770_v31, %v1717_v8 }
 0x29f   : > { %v1574_v5 = vpop.permute.xlu1 %1573  ;;  %v1826_v18 = vpop.permute.xlu0 %1825 }
 0x2a0   : > { %v1578_v46 = vadd.f32 %v1574_v5, %v1522_v35  ;;  %v1831_v44 = vadd.f32 %v1826_v18, %v1775_v10 }
 0x2a3   : > { %v1632_v26 = vpop.permute.xlu1 %1631 }
 0x2a4   : > { %v1636_v41 = vadd.f32 %v1632_v26, %v1578_v46 }
 0x2a6   : > { %v1686_v28 = vadd.f32 %v1684_v58, %v1636_v41  ;;  %v3712_v58 = vld [vmem:[#allocation7_spill] sm:$0xff] }
 0x2a7   : > { %v1714_v24 = vpop.permute.xlu1 %1713  ;;  %v2125_v22 = vsub.s32 1, %v3712_v58 }
 0x2a8   : > { %v1718_v60 = vadd.f32 %v1714_v24, %v1686_v28  ;;  %v2121_v28 = vsub.s32 0, %v3712_v58  ;;  %v2429_v24 = vld [vmem:[%s2536_s20] sm:$0xff] }
 0x2ab   : > { %v1772_v15 = vpop.permute.xlu1 %1771 }
 0x2ac   : > { %v1776_v62 = vadd.f32 %v1772_v15, %v1718_v60 }
 0x2af   : > { %v1828_v59 = vpop.permute.xlu1 %1827 }
 0x2b0   : > { %v1832_v47 = vadd.f32 %v1828_v59, %v1776_v62 }
 0x2bc   : > { %v1850_v50 = vpop.permute.xlu0 %1849 }
 0x2bd   : > { %v1855_v63 = vadd.f32 %v1850_v50, %v1831_v44 }
 0x2cc   : > { %v1852_v30 = vpop.permute.xlu1 %1851 }
 0x2cd   : > { %v1856_v2 = vadd.f32 %v1852_v30, %v1832_v47 }
 0x2d0   : > { %v1870_v16 = vpop.permute.xlu0 %1869 }
 0x2d1   : > { %v1875_v9 = vadd.f32 %v1870_v16, %v1855_v63 }
 0x2d3   : > { %v2338_v13 = vmul.f32 -1.442695, %v1875_v9 }
 0x2d5   : > { %2405 = vpow2.f32 %v2338_v13 }
 0x2df   : > { %v2406_v1 = vpop.eup %2405 }
 0x2e0   : > { %v1883_v36 = vadd.f32 1.0, %v2406_v1  ;;  %v1872_v39 = vpop.permute.xlu1 %1871 }
 0x2e1   : > { %v1876_v54 = vadd.f32 %v1872_v39, %v1856_v2 }
 0x2e2   : > { %2407 = vrcp.f32 %v1883_v36 }
 0x2e3   : > { %v2339_v23 = vmul.f32 -1.442695, %v1876_v54 }
 0x2e5   : > { %2409 = vpow2.f32 %v2339_v23 }
 0x2ec   : > { %v2408_v4 = vpop.eup %2407 }
 0x2ed   : > { %1891 = vrot.lane.b32.xlu0 %v2408_v4, %s2461_s22 }
 0x2ef   : > { %v2410_v38 = vpop.eup %2409 }
 0x2f0   : > { %v1884_v53 = vadd.f32 1.0, %v2410_v38 }
 0x2f2   : > { %2411 = vrcp.f32 %v1884_v53 }
 0x2fc   : > { %v2412_v29 = vpop.eup %2411 }
 0x2fd   : > { %1893 = vrot.lane.b32.xlu1 %v2412_v29, %s2461_s22  ;;  %s2479_s22 = smov 61  }
 0x35f   : > { %v1892_v12 = vpop.permute.xlu0 %1891 }
 0x360   : > { %1898 = vst.msk [vmem:[#allocation2 + $0x3] sm:$0xff] %vm1897_vm6, %v1892_v12 }
 0x367   : > { %v2340_v27 = vld.sshfl [vmem:[#allocation2 + $0x3] sm:$0x1 pattern:$0x76325410] }
 0x368   : > { %1909 = vrot.lane.b32.xlu0 %v2340_v27, %s2469_s7  ;;  %v2341_v19 = vld.sshfl [vmem:[#allocation2 + $0x4] sm:$0x1 pattern:$0x76325410] }
 0x369   : > { %v2342_v6 = vld.sshfl [vmem:[#allocation2 + $0x5] sm:$0x1 pattern:$0x76325410] }
 0x36a   : > { %v2343_v33 = vld.sshfl [vmem:[#allocation2 + $0x6] sm:$0x1 pattern:$0x76325410] }
 0x36b   : > { %v2344_v34 = vld.sshfl [vmem:[#allocation2 + $0x7] sm:$0x1 pattern:$0x76325410] }
 0x36c   : > { %1923 = vrot.lane.b32.xlu0 %v2341_v19, %s2476_s8  ;;  %v2345_v32 = vld.sshfl [vmem:[#allocation2 + $0x8] sm:$0x1 pattern:$0x76325410] }
 0x36d   : > { %v2346_v49 = vld.sshfl [vmem:[#allocation2 + $0x9] sm:$0x1 pattern:$0x76325410] }
 0x36e   : > { %v2347_v3 = vld.sshfl [vmem:[#allocation2 + $0xa] sm:$0x1 pattern:$0x76325410] }
 0x36f   : > { %v1894_v7 = vpop.permute.xlu1 %1893 }
 0x370   : > { %1899 = vst.msk [vmem:[#allocation2 + $0xb] sm:$0xff] %vm1897_vm6, %v1894_v7  ;;  %1937 = vrot.lane.b32.xlu0 %v2342_v6, %s2477_s23 }
 0x374   : > { %1951 = vrot.lane.b32.xlu0 %v2343_v33, %s2478_s14 }
 0x377   : > { %v2348_v21 = vld.sshfl [vmem:[#allocation2 + $0xb] sm:$0x1 pattern:$0x76325410] }
 0x378   : > { %2021 = vrot.lane.b32.xlu1 %v2348_v21, %s2469_s7  ;;  %1965 = vrot.lane.b32.xlu0 %v2344_v34, %s2479_s22  ;;  %v2349_v48 = vld.sshfl [vmem:[#allocation2 + $0xc] sm:$0x1 pattern:$0x76325410] }
 0x379   : > { %v2350_v56 = vld.sshfl [vmem:[#allocation2 + $0xd] sm:$0x1 pattern:$0x76325410] }
 0x37a   : > { %v2351_v11 = vld.sshfl [vmem:[#allocation2 + $0xe] sm:$0x1 pattern:$0x76325410] }
 0x37b   : > { %v2352_v20 = vld.sshfl [vmem:[#allocation2 + $0xf] sm:$0x1 pattern:$0x76325410] }
 0x37c   : > { %2034 = vrot.lane.b32.xlu1 %v2349_v48, %s2476_s8  ;;  %1979 = vrot.lane.b32.xlu0 %v2345_v32, %s2480_s24  ;;  %v2353_v52 = vld.sshfl [vmem:[#allocation2 + $0x10] sm:$0x1 pattern:$0x76325410] }
 0x37d   : > { %v2354_v17 = vld.sshfl [vmem:[#allocation2 + $0x11] sm:$0x1 pattern:$0x76325410] }
 0x37e   : > { %v2355_v42 = vld.sshfl [vmem:[#allocation2 + $0x12] sm:$0x1 pattern:$0x76325410] }
 0x380   : > { %2047 = vrot.lane.b32.xlu1 %v2350_v56, %s2477_s23  ;;  %1993 = vrot.lane.b32.xlu0 %v2346_v49, %s2481_s25 }
 0x384   : > { %2060 = vrot.lane.b32.xlu1 %v2351_v11, %s2478_s14  ;;  %2007 = vrot.lane.b32.xlu0 %v2347_v3, %s2482_s26 }
 0x388   : > { %2073 = vrot.lane.b32.xlu1 %v2352_v20, %s2479_s22 }
 0x38c   : > { %2086 = vrot.lane.b32.xlu1 %v2353_v52, %s2480_s24 }
 0x390   : > { %2099 = vrot.lane.b32.xlu1 %v2354_v17, %s2481_s25 }
 0x394   : > { %2112 = vrot.lane.b32.xlu1 %v2355_v42, %s2482_s26 }
 0x3da   : > { %v1910_v43 = vpop.permute.xlu0 %1909 }
 0x3db   : > { %1913 = vst.msk [vmem:[#allocation3] sm:$0x1] %vm1912_vm7, %v1910_v43 }
 0x3de   : > { %v1924_v0 = vpop.permute.xlu0 %1923 }
 0x3df   : > { %1927 = vst.msk [vmem:[#allocation3] sm:$0x1] %vm1926_vm8, %v1924_v0 }
 0x3e2   : > { %v1938_v14 = vpop.permute.xlu0 %1937 }
 0x3e3   : > { %1941 = vst.msk [vmem:[#allocation3] sm:$0x1] %vm1940_vm9, %v1938_v14 }
 0x3e6   : > { %v1952_v40 = vpop.permute.xlu0 %1951 }
 0x3e7   : > { %1955 = vst.msk [vmem:[#allocation3] sm:$0x1] %vm1954_vm10, %v1952_v40 }
 0x3ea   : > { %v2022_v57 = vpop.permute.xlu1 %2021  ;;  %v1966_v61 = vpop.permute.xlu0 %1965 }
 0x3eb   : > { %2024 = vst.msk [vmem:[#allocation3 + $0x2] sm:$0x1] %vm1912_vm7, %v2022_v57 }
 0x3ec   : > { %1969 = vst.msk [vmem:[#allocation3] sm:$0x1] %vm1968_vm11, %v1966_v61 }
 0x3ee   : > { %v2035_v51 = vpop.permute.xlu1 %2034  ;;  %v1980_v37 = vpop.permute.xlu0 %1979 }
 0x3ef   : > { %2037 = vst.msk [vmem:[#allocation3 + $0x2] sm:$0x1] %vm1926_vm8, %v2035_v51 }
 0x3f0   : > { %1983 = vst.msk [vmem:[#allocation3] sm:$0x1] %vm1982_vm12, %v1980_v37 }
 0x3f2   : > { %v2048_v25 = vpop.permute.xlu1 %2047  ;;  %v1994_v55 = vpop.permute.xlu0 %1993 }
 0x3f3   : > { %2050 = vst.msk [vmem:[#allocation3 + $0x2] sm:$0x1] %vm1940_vm9, %v2048_v25 }
 0x3f4   : > { %1997 = vst.msk [vmem:[#allocation3] sm:$0x1] %vm1996_vm13, %v1994_v55 }
 0x3f6   : > { %v2061_v45 = vpop.permute.xlu1 %2060  ;;  %v2008_v5 = vpop.permute.xlu0 %2007 }
 0x3f7   : > { %2063 = vst.msk [vmem:[#allocation3 + $0x2] sm:$0x1] %vm1954_vm10, %v2061_v45 }
 0x3f8   : > { %2011 = vst.msk [vmem:[#allocation3] sm:$0x1] %vm2010_vm14, %v2008_v5 }
 0x3fa   : > { %v2074_v35 = vpop.permute.xlu1 %2073 }
 0x3fb   : > { %2076 = vst.msk [vmem:[#allocation3 + $0x2] sm:$0x1] %vm1968_vm11, %v2074_v35 }
 0x3fe   : > { %v2087_v46 = vpop.permute.xlu1 %2086 }
 0x3ff   : > { %2089 = vst.msk [vmem:[#allocation3 + $0x2] sm:$0x1] %vm1982_vm12, %v2087_v46 }
 0x402   : > { %v2100_v26 = vpop.permute.xlu1 %2099 }
 0x403   : > { %2102 = vst.msk [vmem:[#allocation3 + $0x2] sm:$0x1] %vm1996_vm13, %v2100_v26 }
 0x406   : > { %v2113_v41 = vpop.permute.xlu1 %2112 }
 0x407   : > { %2115 = vst.msk [vmem:[#allocation3 + $0x2] sm:$0x1] %vm2010_vm14, %v2113_v41 }
 0x40e   : > { %v2116_v31 = vld [vmem:[#allocation3] ss:$2 sm:$0x3] }
 0x40f   : > { %v2122_v18 = vrot.slane %v2116_v31, %v2121_v28  ;;  %v2126_v8 = vrot.slane %v2116_v31, %v2125_v22 }
 0x411   : > { %v2127_v10 = vcombine.low %v2122_v18, %v2126_v8 }
 0x413   : > { %v2129_v50 = vmul.f32 %v2429_v24, %v2127_v10 }
 0x415   : > { %2130 = vst [vmem:[%s157_s27] sm:$0xff] %v2129_v50 }
 0x416 PF: > { %s13_s9 = sadd.s32 1, %s2455_s9  }
 0x417   : > { %p10_p1 = scmp.ge.s32.totalorder %s13_s9, 4  }
 0x419   :  { %12 = sbr.rel (!%p10_p1) target bundleno = 1 (0x1), region = 65 }
 0x420   :  { %2152 = vsyncpa [#allocation5], 1 }
 0x421   :  { %2154 = vsyncpa [#allocation5 + $0x1], 1 }

</bundles_post_ra>
